<compile_context>
chip_gen: v7x
topology: tpu7x:2x2x1
jax: 0.10.0
libtpu: 0.0.40
codegen_flags: <defaults>
</compile_context>

<pallas_src>
import numpy as np
import jax
import jax.numpy as jnp
from jax.experimental import pallas as pl
from jax.experimental.pallas import tpu as pltpu


def _classification_net_kernel(
        x_ref, len_ref,
        w_x_ref, b_all_ref, whh_f_ref, whh_b_ref,
        w_pk_f_ref, w_pk_b_ref, qembT_ref,
        w1_0_ref, w1_1_ref, b1_ref, w2_ref, b2_ref,
        out_ref,
        outf_s, outb_s):
    T, Bt, D = x_ref.shape
    H = whh_f_ref.shape[0]
    H2, H3, H4 = 2 * H, 3 * H, 4 * H
    f32 = jnp.float32

    def mdot(a, b):
        # MXU matmul; operands may be bf16 (wrapper choice), accumulate in f32.
        return jnp.dot(a.astype(b.dtype), b, preferred_element_type=f32)

    # ---- loop-invariant precompute (hoisted off the serial recurrence) ----
    lens = len_ref[...]                                            # (Bt, 1) i32
    t_idx = jax.lax.broadcasted_iota(jnp.int32, (T, Bt, 1), 0)
    valid = t_idx < lens[None, :, :]                               # (T, Bt, 1) bool

    # One batched MXU matmul for the input projection of BOTH LSTM directions,
    # biases folded in:   (T*Bt, D) @ (D, 8H) + (1, 8H).
    x_flat = x_ref[...].reshape(T * Bt, D)
    xg = mdot(x_flat, w_x_ref[...]) + b_all_ref[...]               # (T*Bt, 8H) f32

    whh_f = whh_f_ref[...]                                         # (H, 4H) f32
    whh_b = whh_b_ref[...]

    def lstm_step(h, c, gates_x, whh, mask):
        # gate order is (i, f, o, g): one sigmoid over 3H + one tanh over H.
        gates = gates_x + jnp.dot(h, whh, preferred_element_type=f32)
        sfo = jax.nn.sigmoid(gates[:, :H3])
        g = jnp.tanh(gates[:, H3:])
        i_g, f_g, o_g = sfo[:, :H], sfo[:, H:H2], sfo[:, H2:]
        c_new = f_g * c + i_g * g
        h_new = o_g * jnp.tanh(c_new)
        h = jnp.where(mask, h_new, h)
        c = jnp.where(mask, c_new, c)
        return h, c, jnp.where(mask, h_new, 0.0)   # zero-pad like pack/pad_packed

    # ---- forward direction (fully unrolled; T is static and small) ----
    h = jnp.zeros((Bt, H), f32)
    c = jnp.zeros((Bt, H), f32)
    for t in range(T):
        h, c, o_t = lstm_step(h, c, xg[t * Bt:(t + 1) * Bt, :H4], whh_f, valid[t])
        outf_s[pl.ds(t * Bt, Bt), :] = o_t

    # ---- backward direction ----
    h = jnp.zeros((Bt, H), f32)
    c = jnp.zeros((Bt, H), f32)
    for t in range(T - 1, -1, -1):
        h, c, o_t = lstm_step(h, c, xg[t * Bt:(t + 1) * Bt, H4:], whh_b, valid[t])
        outb_s[pl.ds(t * Bt, Bt), :] = o_t

    # ---- fused output/key projections: split fwd/bwd halves, no concat ----
    pk = mdot(outf_s[...], w_pk_f_ref[...]) + mdot(outb_s[...], w_pk_b_ref[...])
    out_proj = pk[:, :H2].reshape(T, Bt, H2)                       # (T, Bt, 2H)
    keys = jnp.tanh(pk[:, H2:])                                    # (T*Bt, 2H)

    # ---- both unique attention heads scored with one MXU matmul ----
    inv_temp = jnp.float32(1.0 / 3.0)                              # Temp = 3
    scores = (mdot(keys, qembT_ref[...]) * inv_temp).reshape(T, Bt, 2)
    scores = jnp.where(valid, scores, jnp.float32(-1e9))           # mask padded steps
    m = jnp.max(scores, axis=0, keepdims=True)
    e = jnp.exp(scores - m)
    denom = jnp.sum(e, axis=0, keepdims=True)
    alpha = e * pl.reciprocal(denom, approx=True)                  # EUP slot

    emb0 = jnp.sum(alpha[:, :, 0:1] * out_proj, axis=0)            # (Bt, 2H)
    emb1 = jnp.sum(alpha[:, :, 1:2] * out_proj, axis=0)            # heads 2..4 == head 1

    # ---- classifier: Linear(8H, FC) -> Linear(FC, n_classes) ----
    # duplicated heads were folded into w1_1 at wrapper time.
    hidden = mdot(emb0, w1_0_ref[...]) + mdot(emb1, w1_1_ref[...]) + b1_ref[...]
    out_ref[...] = mdot(hidden, w2_ref[...]) + b2_ref[...]


def _reorder_gates(w):
    """Permute PyTorch LSTM gate blocks (i, f, g, o) -> (i, f, o, g) along axis 0."""
    H = w.shape[0] // 4
    return jnp.concatenate([w[:2 * H], w[3 * H:], w[2 * H:3 * H]], axis=0)


def classification_net_forward(sent, sent_len, params, *, b_tile=None,
                               compute_dtype=jnp.float32):
    """sent: (T, B, word_emb_dim) f32 time-major, sent_len: (B,) int.

    Returns logits (B, n_classes) = classifier(InnerAttentionMILAEncoder(sent)).
    compute_dtype=jnp.bfloat16 puts the non-recurrence MXU matmuls in bf16
    (recommended on v6e/v7x); the recurrence and all state stay f32.
    """
    T, B, D = sent.shape
    H = params["w_hh_f"].shape[1]
    H2 = 2 * H
    FC = params["w_fc1"].shape[0]
    NC = params["w_fc2"].shape[0]

    if b_tile is None:
        b_tile = 8 if (B % 8 == 0) else B
    assert B % b_tile == 0 and (b_tile == B or b_tile % 8 == 0), \
        "batch tile must equal B or be a multiple of 8 (f32 sublane)"
    nb = B // b_tile
    cd = compute_dtype

    # --- LSTM weights: gate-reorder, transpose, fuse fwd/bwd input projections ---
    wih_f = _reorder_gates(params["w_ih_f"])
    wih_b = _reorder_gates(params["w_ih_b"])
    whh_f = _reorder_gates(params["w_hh_f"]).T                     # (H, 4H), f32 recurrence
    whh_b = _reorder_gates(params["w_hh_b"]).T
    b_f = _reorder_gates(params["b_ih_f"] + params["b_hh_f"])
    b_b = _reorder_gates(params["b_ih_b"] + params["b_hh_b"])
    w_x = jnp.concatenate([wih_f.T, wih_b.T], axis=1).astype(cd)   # (D, 8H)
    b_all = jnp.concatenate([b_f, b_b]).reshape(1, 8 * H).astype(jnp.float32)

    # --- fused (proj_lstm | proj_key), split into forward/backward halves ---
    wproj_t = params["w_proj"].T                                   # y = x @ W.T
    wkey_t = params["w_key"].T
    w_pk_f = jnp.concatenate([wproj_t[:H], wkey_t[:H]], axis=1).astype(cd)   # (H, 4H)
    w_pk_b = jnp.concatenate([wproj_t[H:], wkey_t[H:]], axis=1).astype(cd)

    # --- both attention queries as one (2H, 2) matmul operand ---
    qembT = params["q_emb"].T.astype(jnp.float32)                  # (2H, 2)

    # --- classifier weights: fold duplicated heads 2..4 (same query) into w1_1 ---
    W1, b1 = params["w_fc1"], params["b_fc1"]                      # (FC, 8H), (FC,)
    W2, b2 = params["w_fc2"], params["b_fc2"]                      # (NC, FC), (NC,)
    w1_0 = W1[:, :H2].T.astype(cd)                                                 # (2H, FC)
    w1_1 = (W1[:, H2:2 * H2] + W1[:, 2 * H2:3 * H2] + W1[:, 3 * H2:]).T.astype(cd)  # (2H, FC)
    b1r = b1.reshape(1, FC).astype(jnp.float32)
    w2_t = W2.T.astype(cd)                                         # (FC, NC)
    b2r = b2.reshape(1, NC).astype(jnp.float32)

    x = sent.astype(cd)
    lens = sent_len.astype(jnp.int32).reshape(B, 1)

    w_spec = lambda a: pl.BlockSpec(a.shape, lambda i: (0, 0))     # grid-invariant weights
    in_specs = [
        pl.BlockSpec((T, b_tile, D), lambda i: (0, i, 0)),         # x, blocked over batch
        pl.BlockSpec((b_tile, 1), lambda i: (i, 0)),               # lengths
        w_spec(w_x), w_spec(b_all), w_spec(whh_f), w_spec(whh_b),
        w_spec(w_pk_f), w_spec(w_pk_b), w_spec(qembT),
        w_spec(w1_0), w_spec(w1_1), w_spec(b1r), w_spec(w2_t), w_spec(b2r),
    ]

    return pl.pallas_call(
        _classification_net_kernel,
        out_shape=jax.ShapeDtypeStruct((B, NC), jnp.float32),
        grid_spec=pltpu.PrefetchScalarGridSpec(
            num_scalar_prefetch=0,
            grid=(nb,),
            in_specs=in_specs,
            out_specs=pl.BlockSpec((b_tile, NC), lambda i: (i, 0)),
            scratch_shapes=[
                pltpu.VMEM((T * b_tile, H), jnp.float32),          # forward LSTM outputs
                pltpu.VMEM((T * b_tile, H), jnp.float32),          # backward LSTM outputs
            ],
        ),
        compiler_params=pltpu.CompilerParams(
            dimension_semantics=("parallel",)),   # batch blocks split across TCs (v7x)
    )(x, lens, w_x, b_all, whh_f, whh_b, w_pk_f, w_pk_b, qembT,
      w1_0, w1_1, b1r, w2_t, b2r)


def reference(sent, sent_len, params):
    """Pure-JAX reference mirroring the PyTorch forward semantics."""
    T, B, D = sent.shape
    H = params["w_hh_f"].shape[1]

    def run_dir(w_ih, w_hh, b_ih, b_hh, reverse):
        b = b_ih + b_hh

        def cell(carry, inp):
            h, c = carry
            x_t, t = inp
            gates = x_t @ w_ih.T + h @ w_hh.T + b
            i = jax.nn.sigmoid(gates[:, :H])
            f = jax.nn.sigmoid(gates[:, H:2 * H])
            g = jnp.tanh(gates[:, 2 * H:3 * H])
            o = jax.nn.sigmoid(gates[:, 3 * H:])
            c_new = f * c + i * g
            h_new = o * jnp.tanh(c_new)
            mask = (t < sent_len)[:, None]
            return ((jnp.where(mask, h_new, h), jnp.where(mask, c_new, c)),
                    jnp.where(mask, h_new, 0.0))

        ts = jnp.arange(T)
        init = (jnp.zeros((B, H), jnp.float32), jnp.zeros((B, H), jnp.float32))
        if reverse:
            _, outs = jax.lax.scan(cell, init, (sent[::-1], ts[::-1]))
            return outs[::-1]
        _, outs = jax.lax.scan(cell, init, (sent, ts))
        return outs

    outf = run_dir(params["w_ih_f"], params["w_hh_f"], params["b_ih_f"], params["b_hh_f"], False)
    outb = run_dir(params["w_ih_b"], params["w_hh_b"], params["b_ih_b"], params["b_hh_b"], True)
    so = jnp.transpose(jnp.concatenate([outf, outb], -1), (1, 0, 2))   # (B, T, 2H)
    out_proj = so @ params["w_proj"].T
    key_proj = jnp.tanh(so @ params["w_key"].T)
    embs = []
    for col in (0, 1, 1, 1):
        k = jnp.einsum("btd,d->bt", key_proj, params["q_emb"][col]) / 3.0
        k = k + (k == 0.0) * (-1000.0)
        a = jax.nn.softmax(k, axis=1)
        embs.append(jnp.sum(a[:, :, None] * out_proj, axis=1))
    emb = jnp.concatenate(embs, axis=1)                                 # (B, 8H)
    hidden = emb @ params["w_fc1"].T + params["b_fc1"]
    return hidden @ params["w_fc2"].T + params["b_fc2"]


if __name__ == "__main__":
    # Small config: T=8, B=16 (two batch tiles of 8), word_emb_dim=32,
    # enc_lstm_dim=64, fc_dim=512, n_classes=3.
    T, B, D, H = 8, 16, 32, 64
    FC, NC = 512, 3
    key = jax.random.PRNGKey(0)
    ks = jax.random.split(key, 16)
    s = 1.0 / np.sqrt(H)
    sf = 1.0 / np.sqrt(8 * H)
    sc = 1.0 / np.sqrt(FC)
    params = {
        "w_ih_f": jax.random.uniform(ks[0], (4 * H, D), jnp.float32, -s, s),
        "w_hh_f": jax.random.uniform(ks[1], (4 * H, H), jnp.float32, -s, s),
        "b_ih_f": jax.random.uniform(ks[2], (4 * H,), jnp.float32, -s, s),
        "b_hh_f": jax.random.uniform(ks[3], (4 * H,), jnp.float32, -s, s),
        "w_ih_b": jax.random.uniform(ks[4], (4 * H, D), jnp.float32, -s, s),
        "w_hh_b": jax.random.uniform(ks[5], (4 * H, H), jnp.float32, -s, s),
        "b_ih_b": jax.random.uniform(ks[6], (4 * H,), jnp.float32, -s, s),
        "b_hh_b": jax.random.uniform(ks[7], (4 * H,), jnp.float32, -s, s),
        "w_proj": jax.random.uniform(ks[8], (2 * H, 2 * H), jnp.float32, -s, s),
        "w_key":  jax.random.uniform(ks[9], (2 * H, 2 * H), jnp.float32, -s, s),
        "q_emb":  jax.random.normal(ks[10], (2, 2 * H), jnp.float32) * 0.1,
        "w_fc1":  jax.random.uniform(ks[11], (FC, 8 * H), jnp.float32, -sf, sf),
        "b_fc1":  jax.random.uniform(ks[12], (FC,), jnp.float32, -sf, sf),
        "w_fc2":  jax.random.uniform(ks[13], (NC, FC), jnp.float32, -sc, sc),
        "b_fc2":  jax.random.uniform(ks[14], (NC,), jnp.float32, -sc, sc),
    }
    sent = jax.random.normal(ks[15], (T, B, D), jnp.float32)
    sent_len = jnp.array([8, 5, 3, 2, 7, 6, 4, 1, 8, 8, 2, 5, 3, 6, 7, 4], jnp.int32)

    logits = jax.block_until_ready(classification_net_forward(sent, sent_len, params))
    ref = reference(sent, sent_len, params)

    assert logits.shape == (B, NC)
    np.testing.assert_allclose(np.asarray(logits), np.asarray(ref), rtol=2e-2, atol=2e-2)
    print("KERNEL_OK")
</pallas_src>

<mosaic_0001>
module attributes {stable_mosaic.version = 11 : i64} {
  func.func @_classification_net_kernel(%arg0: i32, %arg1: memref<8x8x32xf32, #tpu.memory_space<vmem>>, %arg2: memref<8x1xi32, #tpu.memory_space<vmem>>, %arg3: memref<32x512xf32, #tpu.memory_space<vmem>>, %arg4: memref<1x512xf32, #tpu.memory_space<vmem>>, %arg5: memref<64x256xf32, #tpu.memory_space<vmem>>, %arg6: memref<64x256xf32, #tpu.memory_space<vmem>>, %arg7: memref<64x256xf32, #tpu.memory_space<vmem>>, %arg8: memref<64x256xf32, #tpu.memory_space<vmem>>, %arg9: memref<128x2xf32, #tpu.memory_space<vmem>>, %arg10: memref<128x512xf32, #tpu.memory_space<vmem>>, %arg11: memref<128x512xf32, #tpu.memory_space<vmem>>, %arg12: memref<1x512xf32, #tpu.memory_space<vmem>>, %arg13: memref<512x3xf32, #tpu.memory_space<vmem>>, %arg14: memref<1x3xf32, #tpu.memory_space<vmem>>, %arg15: memref<8x3xf32, #tpu.memory_space<vmem>>, %arg16: memref<64x64xf32, #tpu.memory_space<vmem>>, %arg17: memref<64x64xf32, #tpu.memory_space<vmem>>) attributes {dimension_semantics = [#tpu.dimension_semantics<parallel>], iteration_bounds = array<i64: 2>, scalar_prefetch = 0 : i64, scratch_operands = 2 : i64, tpu.core_type = #tpu.core_type<tc>, window_params = [{transform_indices = @transform_0, window_bounds = array<i64: 8, 8, 32>}, {transform_indices = @transform_1, window_bounds = array<i64: 8, 1>}, {pipeline_mode = #tpu.pipeline_mode<synchronous>, transform_indices = @transform_2, window_bounds = array<i64: 32, 512>}, {pipeline_mode = #tpu.pipeline_mode<synchronous>, transform_indices = @transform_3, window_bounds = array<i64: 1, 512>}, {pipeline_mode = #tpu.pipeline_mode<synchronous>, transform_indices = @transform_4, window_bounds = array<i64: 64, 256>}, {pipeline_mode = #tpu.pipeline_mode<synchronous>, transform_indices = @transform_5, window_bounds = array<i64: 64, 256>}, {pipeline_mode = #tpu.pipeline_mode<synchronous>, transform_indices = @transform_6, window_bounds = array<i64: 64, 256>}, {pipeline_mode = #tpu.pipeline_mode<synchronous>, transform_indices = @transform_7, window_bounds = array<i64: 64, 256>}, {pipeline_mode = #tpu.pipeline_mode<synchronous>, transform_indices = @transform_8, window_bounds = array<i64: 128, 2>}, {pipeline_mode = #tpu.pipeline_mode<synchronous>, transform_indices = @transform_9, window_bounds = array<i64: 128, 512>}, {pipeline_mode = #tpu.pipeline_mode<synchronous>, transform_indices = @transform_10, window_bounds = array<i64: 128, 512>}, {pipeline_mode = #tpu.pipeline_mode<synchronous>, transform_indices = @transform_11, window_bounds = array<i64: 1, 512>}, {pipeline_mode = #tpu.pipeline_mode<synchronous>, transform_indices = @transform_12, window_bounds = array<i64: 512, 3>}, {pipeline_mode = #tpu.pipeline_mode<synchronous>, transform_indices = @transform_13, window_bounds = array<i64: 1, 3>}, {transform_indices = @transform_14, window_bounds = array<i64: 8, 3>}]} {
    %c0 = arith.constant 0 : index
    %c0_0 = arith.constant 0 : index
    %0 = vector.load %arg2[%c0, %c0_0] : memref<8x1xi32, #tpu.memory_space<vmem>>, vector<8x1xi32>
    %1 = tpu.iota {dimensions = array<i32: 0>} : vector<8x8x1xi32>
    %2 = vector.shape_cast %0 : vector<8x1xi32> to vector<1x8x1xi32>
    %3 = vector.broadcast %2 : vector<1x8x1xi32> to vector<8x8x1xi32>
    %4 = arith.cmpi slt, %1, %3 : vector<8x8x1xi32>
    %c0_1 = arith.constant 0 : index
    %c0_2 = arith.constant 0 : index
    %c0_3 = arith.constant 0 : index
    %5 = vector.load %arg1[%c0_1, %c0_2, %c0_3] : memref<8x8x32xf32, #tpu.memory_space<vmem>>, vector<8x8x32xf32>
    %6 = vector.shape_cast %5 : vector<8x8x32xf32> to vector<64x32xf32>
    %c0_4 = arith.constant 0 : index
    %c0_5 = arith.constant 0 : index
    %7 = vector.load %arg3[%c0_4, %c0_5] : memref<32x512xf32, #tpu.memory_space<vmem>>, vector<32x512xf32>
    %cst = arith.constant dense<0.000000e+00> : vector<64x512xf32>
    %8 = tpu.matmul %6, %7, %cst {dimension_numbers = #tpu.dot_dimension_numbers<[1], [0], [0], [1], [0, 0, 1, 1], [], []>} : vector<64x32xf32>, vector<32x512xf32>, vector<64x512xf32> -> vector<64x512xf32>
    %c0_6 = arith.constant 0 : index
    %c0_7 = arith.constant 0 : index
    %9 = vector.load %arg4[%c0_6, %c0_7] : memref<1x512xf32, #tpu.memory_space<vmem>>, vector<1x512xf32>
    %10 = vector.broadcast %9 : vector<1x512xf32> to vector<64x512xf32>
    %11 = arith.addf %8, %10 : vector<64x512xf32>
    %c0_8 = arith.constant 0 : index
    %c0_9 = arith.constant 0 : index
    %12 = vector.load %arg5[%c0_8, %c0_9] : memref<64x256xf32, #tpu.memory_space<vmem>>, vector<64x256xf32>
    %c0_10 = arith.constant 0 : index
    %c0_11 = arith.constant 0 : index
    %13 = vector.load %arg6[%c0_10, %c0_11] : memref<64x256xf32, #tpu.memory_space<vmem>>, vector<64x256xf32>
    %cst_12 = arith.constant 0.000000e+00 : f32
    %14 = vector.broadcast %cst_12 : f32 to vector<8x64xf32>
    %cst_13 = arith.constant 0.000000e+00 : f32
    %15 = vector.broadcast %cst_13 : f32 to vector<8x64xf32>
    %16 = vector.extract_strided_slice %11 {offsets = [0, 0], sizes = [8, 256], strides = [1, 1]} : vector<64x512xf32> to vector<8x256xf32>
    %17 = vector.extract_strided_slice %4 {offsets = [0, 0, 0], sizes = [1, 8, 1], strides = [1, 1, 1]} : vector<8x8x1xi1> to vector<1x8x1xi1>
    %18 = vector.shape_cast %17 : vector<1x8x1xi1> to vector<8x1xi1>
    %cst_14 = arith.constant dense<0.000000e+00> : vector<8x256xf32>
    %19 = tpu.matmul %14, %12, %cst_14 {dimension_numbers = #tpu.dot_dimension_numbers<[1], [0], [0], [1], [0, 0, 1, 1], [], []>} : vector<8x64xf32>, vector<64x256xf32>, vector<8x256xf32> -> vector<8x256xf32>
    %20 = arith.addf %16, %19 : vector<8x256xf32>
    %21 = vector.extract_strided_slice %20 {offsets = [0, 0], sizes = [8, 192], strides = [1, 1]} : vector<8x256xf32> to vector<8x192xf32>
    %22 = arith.negf %21 : vector<8x192xf32>
    %23 = math.exp %22 : vector<8x192xf32>
    %cst_15 = arith.constant 1.000000e+00 : f32
    %24 = vector.broadcast %cst_15 : f32 to vector<8x192xf32>
    %25 = arith.addf %24, %23 : vector<8x192xf32>
    %26 = arith.divf %24, %25 : vector<8x192xf32>
    %27 = vector.extract_strided_slice %20 {offsets = [0, 192], sizes = [8, 64], strides = [1, 1]} : vector<8x256xf32> to vector<8x64xf32>
    %28 = math.tanh %27 : vector<8x64xf32>
    %29 = vector.extract_strided_slice %26 {offsets = [0, 0], sizes = [8, 64], strides = [1, 1]} : vector<8x192xf32> to vector<8x64xf32>
    %30 = vector.extract_strided_slice %26 {offsets = [0, 64], sizes = [8, 64], strides = [1, 1]} : vector<8x192xf32> to vector<8x64xf32>
    %31 = vector.extract_strided_slice %26 {offsets = [0, 128], sizes = [8, 64], strides = [1, 1]} : vector<8x192xf32> to vector<8x64xf32>
    %32 = arith.mulf %30, %15 : vector<8x64xf32>
    %33 = arith.mulf %29, %28 : vector<8x64xf32>
    %34 = arith.addf %32, %33 : vector<8x64xf32>
    %35 = math.tanh %34 : vector<8x64xf32>
    %36 = arith.mulf %31, %35 : vector<8x64xf32>
    %37 = vector.shape_cast %18 : vector<8x1xi1> to vector<8x1xi1>
    %38 = vector.broadcast %37 : vector<8x1xi1> to vector<8x64xi1>
    %39 = arith.select %38, %36, %14 : vector<8x64xi1>, vector<8x64xf32>
    %40 = vector.shape_cast %18 : vector<8x1xi1> to vector<8x1xi1>
    %41 = vector.broadcast %40 : vector<8x1xi1> to vector<8x64xi1>
    %42 = arith.select %41, %34, %15 : vector<8x64xi1>, vector<8x64xf32>
    %cst_16 = arith.constant 0.000000e+00 : f32
    %43 = vector.shape_cast %18 : vector<8x1xi1> to vector<8x1xi1>
    %44 = vector.broadcast %43 : vector<8x1xi1> to vector<8x64xi1>
    %45 = vector.broadcast %cst_16 : f32 to vector<8x64xf32>
    %46 = arith.select %44, %36, %45 : vector<8x64xi1>, vector<8x64xf32>
    %c0_17 = arith.constant 0 : index
    %c0_18 = arith.constant 0 : index
    %47 = vector.load %arg16[%c0_17, %c0_18] : memref<64x64xf32, #tpu.memory_space<vmem>>, vector<8x64xf32>
    tpu.vector_store %arg16[%c0_17, %c0_18], %46 {strides = array<i32>} : memref<64x64xf32, #tpu.memory_space<vmem>>, vector<8x64xf32>,
    %48 = vector.extract_strided_slice %11 {offsets = [8, 0], sizes = [8, 256], strides = [1, 1]} : vector<64x512xf32> to vector<8x256xf32>
    %49 = vector.extract_strided_slice %4 {offsets = [1, 0, 0], sizes = [1, 8, 1], strides = [1, 1, 1]} : vector<8x8x1xi1> to vector<1x8x1xi1>
    %50 = vector.shape_cast %49 : vector<1x8x1xi1> to vector<8x1xi1>
    %cst_19 = arith.constant dense<0.000000e+00> : vector<8x256xf32>
    %51 = tpu.matmul %39, %12, %cst_19 {dimension_numbers = #tpu.dot_dimension_numbers<[1], [0], [0], [1], [0, 0, 1, 1], [], []>} : vector<8x64xf32>, vector<64x256xf32>, vector<8x256xf32> -> vector<8x256xf32>
    %52 = arith.addf %48, %51 : vector<8x256xf32>
    %53 = vector.extract_strided_slice %52 {offsets = [0, 0], sizes = [8, 192], strides = [1, 1]} : vector<8x256xf32> to vector<8x192xf32>
    %54 = arith.negf %53 : vector<8x192xf32>
    %55 = math.exp %54 : vector<8x192xf32>
    %cst_20 = arith.constant 1.000000e+00 : f32
    %56 = vector.broadcast %cst_20 : f32 to vector<8x192xf32>
    %57 = arith.addf %56, %55 : vector<8x192xf32>
    %58 = arith.divf %56, %57 : vector<8x192xf32>
    %59 = vector.extract_strided_slice %52 {offsets = [0, 192], sizes = [8, 64], strides = [1, 1]} : vector<8x256xf32> to vector<8x64xf32>
    %60 = math.tanh %59 : vector<8x64xf32>
    %61 = vector.extract_strided_slice %58 {offsets = [0, 0], sizes = [8, 64], strides = [1, 1]} : vector<8x192xf32> to vector<8x64xf32>
    %62 = vector.extract_strided_slice %58 {offsets = [0, 64], sizes = [8, 64], strides = [1, 1]} : vector<8x192xf32> to vector<8x64xf32>
    %63 = vector.extract_strided_slice %58 {offsets = [0, 128], sizes = [8, 64], strides = [1, 1]} : vector<8x192xf32> to vector<8x64xf32>
    %64 = arith.mulf %62, %42 : vector<8x64xf32>
    %65 = arith.mulf %61, %60 : vector<8x64xf32>
    %66 = arith.addf %64, %65 : vector<8x64xf32>
    %67 = math.tanh %66 : vector<8x64xf32>
    %68 = arith.mulf %63, %67 : vector<8x64xf32>
    %69 = vector.shape_cast %50 : vector<8x1xi1> to vector<8x1xi1>
    %70 = vector.broadcast %69 : vector<8x1xi1> to vector<8x64xi1>
    %71 = arith.select %70, %68, %39 : vector<8x64xi1>, vector<8x64xf32>
    %72 = vector.shape_cast %50 : vector<8x1xi1> to vector<8x1xi1>
    %73 = vector.broadcast %72 : vector<8x1xi1> to vector<8x64xi1>
    %74 = arith.select %73, %66, %42 : vector<8x64xi1>, vector<8x64xf32>
    %cst_21 = arith.constant 0.000000e+00 : f32
    %75 = vector.shape_cast %50 : vector<8x1xi1> to vector<8x1xi1>
    %76 = vector.broadcast %75 : vector<8x1xi1> to vector<8x64xi1>
    %77 = vector.broadcast %cst_21 : f32 to vector<8x64xf32>
    %78 = arith.select %76, %68, %77 : vector<8x64xi1>, vector<8x64xf32>
    %c8 = arith.constant 8 : index
    %c0_22 = arith.constant 0 : index
    %79 = vector.load %arg16[%c8, %c0_22] : memref<64x64xf32, #tpu.memory_space<vmem>>, vector<8x64xf32>
    tpu.vector_store %arg16[%c8, %c0_22], %78 {strides = array<i32>} : memref<64x64xf32, #tpu.memory_space<vmem>>, vector<8x64xf32>,
    %80 = vector.extract_strided_slice %11 {offsets = [16, 0], sizes = [8, 256], strides = [1, 1]} : vector<64x512xf32> to vector<8x256xf32>
    %81 = vector.extract_strided_slice %4 {offsets = [2, 0, 0], sizes = [1, 8, 1], strides = [1, 1, 1]} : vector<8x8x1xi1> to vector<1x8x1xi1>
    %82 = vector.shape_cast %81 : vector<1x8x1xi1> to vector<8x1xi1>
    %cst_23 = arith.constant dense<0.000000e+00> : vector<8x256xf32>
    %83 = tpu.matmul %71, %12, %cst_23 {dimension_numbers = #tpu.dot_dimension_numbers<[1], [0], [0], [1], [0, 0, 1, 1], [], []>} : vector<8x64xf32>, vector<64x256xf32>, vector<8x256xf32> -> vector<8x256xf32>
    %84 = arith.addf %80, %83 : vector<8x256xf32>
    %85 = vector.extract_strided_slice %84 {offsets = [0, 0], sizes = [8, 192], strides = [1, 1]} : vector<8x256xf32> to vector<8x192xf32>
    %86 = arith.negf %85 : vector<8x192xf32>
    %87 = math.exp %86 : vector<8x192xf32>
    %cst_24 = arith.constant 1.000000e+00 : f32
    %88 = vector.broadcast %cst_24 : f32 to vector<8x192xf32>
    %89 = arith.addf %88, %87 : vector<8x192xf32>
    %90 = arith.divf %88, %89 : vector<8x192xf32>
    %91 = vector.extract_strided_slice %84 {offsets = [0, 192], sizes = [8, 64], strides = [1, 1]} : vector<8x256xf32> to vector<8x64xf32>
    %92 = math.tanh %91 : vector<8x64xf32>
    %93 = vector.extract_strided_slice %90 {offsets = [0, 0], sizes = [8, 64], strides = [1, 1]} : vector<8x192xf32> to vector<8x64xf32>
    %94 = vector.extract_strided_slice %90 {offsets = [0, 64], sizes = [8, 64], strides = [1, 1]} : vector<8x192xf32> to vector<8x64xf32>
    %95 = vector.extract_strided_slice %90 {offsets = [0, 128], sizes = [8, 64], strides = [1, 1]} : vector<8x192xf32> to vector<8x64xf32>
    %96 = arith.mulf %94, %74 : vector<8x64xf32>
    %97 = arith.mulf %93, %92 : vector<8x64xf32>
    %98 = arith.addf %96, %97 : vector<8x64xf32>
    %99 = math.tanh %98 : vector<8x64xf32>
    %100 = arith.mulf %95, %99 : vector<8x64xf32>
    %101 = vector.shape_cast %82 : vector<8x1xi1> to vector<8x1xi1>
    %102 = vector.broadcast %101 : vector<8x1xi1> to vector<8x64xi1>
    %103 = arith.select %102, %100, %71 : vector<8x64xi1>, vector<8x64xf32>
    %104 = vector.shape_cast %82 : vector<8x1xi1> to vector<8x1xi1>
    %105 = vector.broadcast %104 : vector<8x1xi1> to vector<8x64xi1>
    %106 = arith.select %105, %98, %74 : vector<8x64xi1>, vector<8x64xf32>
    %cst_25 = arith.constant 0.000000e+00 : f32
    %107 = vector.shape_cast %82 : vector<8x1xi1> to vector<8x1xi1>
    %108 = vector.broadcast %107 : vector<8x1xi1> to vector<8x64xi1>
    %109 = vector.broadcast %cst_25 : f32 to vector<8x64xf32>
    %110 = arith.select %108, %100, %109 : vector<8x64xi1>, vector<8x64xf32>
    %c16 = arith.constant 16 : index
    %c0_26 = arith.constant 0 : index
    %111 = vector.load %arg16[%c16, %c0_26] : memref<64x64xf32, #tpu.memory_space<vmem>>, vector<8x64xf32>
    tpu.vector_store %arg16[%c16, %c0_26], %110 {strides = array<i32>} : memref<64x64xf32, #tpu.memory_space<vmem>>, vector<8x64xf32>,
    %112 = vector.extract_strided_slice %11 {offsets = [24, 0], sizes = [8, 256], strides = [1, 1]} : vector<64x512xf32> to vector<8x256xf32>
    %113 = vector.extract_strided_slice %4 {offsets = [3, 0, 0], sizes = [1, 8, 1], strides = [1, 1, 1]} : vector<8x8x1xi1> to vector<1x8x1xi1>
    %114 = vector.shape_cast %113 : vector<1x8x1xi1> to vector<8x1xi1>
    %cst_27 = arith.constant dense<0.000000e+00> : vector<8x256xf32>
    %115 = tpu.matmul %103, %12, %cst_27 {dimension_numbers = #tpu.dot_dimension_numbers<[1], [0], [0], [1], [0, 0, 1, 1], [], []>} : vector<8x64xf32>, vector<64x256xf32>, vector<8x256xf32> -> vector<8x256xf32>
    %116 = arith.addf %112, %115 : vector<8x256xf32>
    %117 = vector.extract_strided_slice %116 {offsets = [0, 0], sizes = [8, 192], strides = [1, 1]} : vector<8x256xf32> to vector<8x192xf32>
    %118 = arith.negf %117 : vector<8x192xf32>
    %119 = math.exp %118 : vector<8x192xf32>
    %cst_28 = arith.constant 1.000000e+00 : f32
    %120 = vector.broadcast %cst_28 : f32 to vector<8x192xf32>
    %121 = arith.addf %120, %119 : vector<8x192xf32>
    %122 = arith.divf %120, %121 : vector<8x192xf32>
    %123 = vector.extract_strided_slice %116 {offsets = [0, 192], sizes = [8, 64], strides = [1, 1]} : vector<8x256xf32> to vector<8x64xf32>
    %124 = math.tanh %123 : vector<8x64xf32>
    %125 = vector.extract_strided_slice %122 {offsets = [0, 0], sizes = [8, 64], strides = [1, 1]} : vector<8x192xf32> to vector<8x64xf32>
    %126 = vector.extract_strided_slice %122 {offsets = [0, 64], sizes = [8, 64], strides = [1, 1]} : vector<8x192xf32> to vector<8x64xf32>
    %127 = vector.extract_strided_slice %122 {offsets = [0, 128], sizes = [8, 64], strides = [1, 1]} : vector<8x192xf32> to vector<8x64xf32>
    %128 = arith.mulf %126, %106 : vector<8x64xf32>
    %129 = arith.mulf %125, %124 : vector<8x64xf32>
    %130 = arith.addf %128, %129 : vector<8x64xf32>
    %131 = math.tanh %130 : vector<8x64xf32>
    %132 = arith.mulf %127, %131 : vector<8x64xf32>
    %133 = vector.shape_cast %114 : vector<8x1xi1> to vector<8x1xi1>
    %134 = vector.broadcast %133 : vector<8x1xi1> to vector<8x64xi1>
    %135 = arith.select %134, %132, %103 : vector<8x64xi1>, vector<8x64xf32>
    %136 = vector.shape_cast %114 : vector<8x1xi1> to vector<8x1xi1>
    %137 = vector.broadcast %136 : vector<8x1xi1> to vector<8x64xi1>
    %138 = arith.select %137, %130, %106 : vector<8x64xi1>, vector<8x64xf32>
    %cst_29 = arith.constant 0.000000e+00 : f32
    %139 = vector.shape_cast %114 : vector<8x1xi1> to vector<8x1xi1>
    %140 = vector.broadcast %139 : vector<8x1xi1> to vector<8x64xi1>
    %141 = vector.broadcast %cst_29 : f32 to vector<8x64xf32>
    %142 = arith.select %140, %132, %141 : vector<8x64xi1>, vector<8x64xf32>
    %c24 = arith.constant 24 : index
    %c0_30 = arith.constant 0 : index
    %143 = vector.load %arg16[%c24, %c0_30] : memref<64x64xf32, #tpu.memory_space<vmem>>, vector<8x64xf32>
    tpu.vector_store %arg16[%c24, %c0_30], %142 {strides = array<i32>} : memref<64x64xf32, #tpu.memory_space<vmem>>, vector<8x64xf32>,
    %144 = vector.extract_strided_slice %11 {offsets = [32, 0], sizes = [8, 256], strides = [1, 1]} : vector<64x512xf32> to vector<8x256xf32>
    %145 = vector.extract_strided_slice %4 {offsets = [4, 0, 0], sizes = [1, 8, 1], strides = [1, 1, 1]} : vector<8x8x1xi1> to vector<1x8x1xi1>
    %146 = vector.shape_cast %145 : vector<1x8x1xi1> to vector<8x1xi1>
    %cst_31 = arith.constant dense<0.000000e+00> : vector<8x256xf32>
    %147 = tpu.matmul %135, %12, %cst_31 {dimension_numbers = #tpu.dot_dimension_numbers<[1], [0], [0], [1], [0, 0, 1, 1], [], []>} : vector<8x64xf32>, vector<64x256xf32>, vector<8x256xf32> -> vector<8x256xf32>
    %148 = arith.addf %144, %147 : vector<8x256xf32>
    %149 = vector.extract_strided_slice %148 {offsets = [0, 0], sizes = [8, 192], strides = [1, 1]} : vector<8x256xf32> to vector<8x192xf32>
    %150 = arith.negf %149 : vector<8x192xf32>
    %151 = math.exp %150 : vector<8x192xf32>
    %cst_32 = arith.constant 1.000000e+00 : f32
    %152 = vector.broadcast %cst_32 : f32 to vector<8x192xf32>
    %153 = arith.addf %152, %151 : vector<8x192xf32>
    %154 = arith.divf %152, %153 : vector<8x192xf32>
    %155 = vector.extract_strided_slice %148 {offsets = [0, 192], sizes = [8, 64], strides = [1, 1]} : vector<8x256xf32> to vector<8x64xf32>
    %156 = math.tanh %155 : vector<8x64xf32>
    %157 = vector.extract_strided_slice %154 {offsets = [0, 0], sizes = [8, 64], strides = [1, 1]} : vector<8x192xf32> to vector<8x64xf32>
    %158 = vector.extract_strided_slice %154 {offsets = [0, 64], sizes = [8, 64], strides = [1, 1]} : vector<8x192xf32> to vector<8x64xf32>
    %159 = vector.extract_strided_slice %154 {offsets = [0, 128], sizes = [8, 64], strides = [1, 1]} : vector<8x192xf32> to vector<8x64xf32>
    %160 = arith.mulf %158, %138 : vector<8x64xf32>
    %161 = arith.mulf %157, %156 : vector<8x64xf32>
    %162 = arith.addf %160, %161 : vector<8x64xf32>
    %163 = math.tanh %162 : vector<8x64xf32>
    %164 = arith.mulf %159, %163 : vector<8x64xf32>
    %165 = vector.shape_cast %146 : vector<8x1xi1> to vector<8x1xi1>
    %166 = vector.broadcast %165 : vector<8x1xi1> to vector<8x64xi1>
    %167 = arith.select %166, %164, %135 : vector<8x64xi1>, vector<8x64xf32>
    %168 = vector.shape_cast %146 : vector<8x1xi1> to vector<8x1xi1>
    %169 = vector.broadcast %168 : vector<8x1xi1> to vector<8x64xi1>
    %170 = arith.select %169, %162, %138 : vector<8x64xi1>, vector<8x64xf32>
    %cst_33 = arith.constant 0.000000e+00 : f32
    %171 = vector.shape_cast %146 : vector<8x1xi1> to vector<8x1xi1>
    %172 = vector.broadcast %171 : vector<8x1xi1> to vector<8x64xi1>
    %173 = vector.broadcast %cst_33 : f32 to vector<8x64xf32>
    %174 = arith.select %172, %164, %173 : vector<8x64xi1>, vector<8x64xf32>
    %c32 = arith.constant 32 : index
    %c0_34 = arith.constant 0 : index
    %175 = vector.load %arg16[%c32, %c0_34] : memref<64x64xf32, #tpu.memory_space<vmem>>, vector<8x64xf32>
    tpu.vector_store %arg16[%c32, %c0_34], %174 {strides = array<i32>} : memref<64x64xf32, #tpu.memory_space<vmem>>, vector<8x64xf32>,
    %176 = vector.extract_strided_slice %11 {offsets = [40, 0], sizes = [8, 256], strides = [1, 1]} : vector<64x512xf32> to vector<8x256xf32>
    %177 = vector.extract_strided_slice %4 {offsets = [5, 0, 0], sizes = [1, 8, 1], strides = [1, 1, 1]} : vector<8x8x1xi1> to vector<1x8x1xi1>
    %178 = vector.shape_cast %177 : vector<1x8x1xi1> to vector<8x1xi1>
    %cst_35 = arith.constant dense<0.000000e+00> : vector<8x256xf32>
    %179 = tpu.matmul %167, %12, %cst_35 {dimension_numbers = #tpu.dot_dimension_numbers<[1], [0], [0], [1], [0, 0, 1, 1], [], []>} : vector<8x64xf32>, vector<64x256xf32>, vector<8x256xf32> -> vector<8x256xf32>
    %180 = arith.addf %176, %179 : vector<8x256xf32>
    %181 = vector.extract_strided_slice %180 {offsets = [0, 0], sizes = [8, 192], strides = [1, 1]} : vector<8x256xf32> to vector<8x192xf32>
    %182 = arith.negf %181 : vector<8x192xf32>
    %183 = math.exp %182 : vector<8x192xf32>
    %cst_36 = arith.constant 1.000000e+00 : f32
    %184 = vector.broadcast %cst_36 : f32 to vector<8x192xf32>
    %185 = arith.addf %184, %183 : vector<8x192xf32>
    %186 = arith.divf %184, %185 : vector<8x192xf32>
    %187 = vector.extract_strided_slice %180 {offsets = [0, 192], sizes = [8, 64], strides = [1, 1]} : vector<8x256xf32> to vector<8x64xf32>
    %188 = math.tanh %187 : vector<8x64xf32>
    %189 = vector.extract_strided_slice %186 {offsets = [0, 0], sizes = [8, 64], strides = [1, 1]} : vector<8x192xf32> to vector<8x64xf32>
    %190 = vector.extract_strided_slice %186 {offsets = [0, 64], sizes = [8, 64], strides = [1, 1]} : vector<8x192xf32> to vector<8x64xf32>
    %191 = vector.extract_strided_slice %186 {offsets = [0, 128], sizes = [8, 64], strides = [1, 1]} : vector<8x192xf32> to vector<8x64xf32>
    %192 = arith.mulf %190, %170 : vector<8x64xf32>
    %193 = arith.mulf %189, %188 : vector<8x64xf32>
    %194 = arith.addf %192, %193 : vector<8x64xf32>
    %195 = math.tanh %194 : vector<8x64xf32>
    %196 = arith.mulf %191, %195 : vector<8x64xf32>
    %197 = vector.shape_cast %178 : vector<8x1xi1> to vector<8x1xi1>
    %198 = vector.broadcast %197 : vector<8x1xi1> to vector<8x64xi1>
    %199 = arith.select %198, %196, %167 : vector<8x64xi1>, vector<8x64xf32>
    %200 = vector.shape_cast %178 : vector<8x1xi1> to vector<8x1xi1>
    %201 = vector.broadcast %200 : vector<8x1xi1> to vector<8x64xi1>
    %202 = arith.select %201, %194, %170 : vector<8x64xi1>, vector<8x64xf32>
    %cst_37 = arith.constant 0.000000e+00 : f32
    %203 = vector.shape_cast %178 : vector<8x1xi1> to vector<8x1xi1>
    %204 = vector.broadcast %203 : vector<8x1xi1> to vector<8x64xi1>
    %205 = vector.broadcast %cst_37 : f32 to vector<8x64xf32>
    %206 = arith.select %204, %196, %205 : vector<8x64xi1>, vector<8x64xf32>
    %c40 = arith.constant 40 : index
    %c0_38 = arith.constant 0 : index
    %207 = vector.load %arg16[%c40, %c0_38] : memref<64x64xf32, #tpu.memory_space<vmem>>, vector<8x64xf32>
    tpu.vector_store %arg16[%c40, %c0_38], %206 {strides = array<i32>} : memref<64x64xf32, #tpu.memory_space<vmem>>, vector<8x64xf32>,
    %208 = vector.extract_strided_slice %11 {offsets = [48, 0], sizes = [8, 256], strides = [1, 1]} : vector<64x512xf32> to vector<8x256xf32>
    %209 = vector.extract_strided_slice %4 {offsets = [6, 0, 0], sizes = [1, 8, 1], strides = [1, 1, 1]} : vector<8x8x1xi1> to vector<1x8x1xi1>
    %210 = vector.shape_cast %209 : vector<1x8x1xi1> to vector<8x1xi1>
    %cst_39 = arith.constant dense<0.000000e+00> : vector<8x256xf32>
    %211 = tpu.matmul %199, %12, %cst_39 {dimension_numbers = #tpu.dot_dimension_numbers<[1], [0], [0], [1], [0, 0, 1, 1], [], []>} : vector<8x64xf32>, vector<64x256xf32>, vector<8x256xf32> -> vector<8x256xf32>
    %212 = arith.addf %208, %211 : vector<8x256xf32>
    %213 = vector.extract_strided_slice %212 {offsets = [0, 0], sizes = [8, 192], strides = [1, 1]} : vector<8x256xf32> to vector<8x192xf32>
    %214 = arith.negf %213 : vector<8x192xf32>
    %215 = math.exp %214 : vector<8x192xf32>
    %cst_40 = arith.constant 1.000000e+00 : f32
    %216 = vector.broadcast %cst_40 : f32 to vector<8x192xf32>
    %217 = arith.addf %216, %215 : vector<8x192xf32>
    %218 = arith.divf %216, %217 : vector<8x192xf32>
    %219 = vector.extract_strided_slice %212 {offsets = [0, 192], sizes = [8, 64], strides = [1, 1]} : vector<8x256xf32> to vector<8x64xf32>
    %220 = math.tanh %219 : vector<8x64xf32>
    %221 = vector.extract_strided_slice %218 {offsets = [0, 0], sizes = [8, 64], strides = [1, 1]} : vector<8x192xf32> to vector<8x64xf32>
    %222 = vector.extract_strided_slice %218 {offsets = [0, 64], sizes = [8, 64], strides = [1, 1]} : vector<8x192xf32> to vector<8x64xf32>
    %223 = vector.extract_strided_slice %218 {offsets = [0, 128], sizes = [8, 64], strides = [1, 1]} : vector<8x192xf32> to vector<8x64xf32>
    %224 = arith.mulf %222, %202 : vector<8x64xf32>
    %225 = arith.mulf %221, %220 : vector<8x64xf32>
    %226 = arith.addf %224, %225 : vector<8x64xf32>
    %227 = math.tanh %226 : vector<8x64xf32>
    %228 = arith.mulf %223, %227 : vector<8x64xf32>
    %229 = vector.shape_cast %210 : vector<8x1xi1> to vector<8x1xi1>
    %230 = vector.broadcast %229 : vector<8x1xi1> to vector<8x64xi1>
    %231 = arith.select %230, %228, %199 : vector<8x64xi1>, vector<8x64xf32>
    %232 = vector.shape_cast %210 : vector<8x1xi1> to vector<8x1xi1>
    %233 = vector.broadcast %232 : vector<8x1xi1> to vector<8x64xi1>
    %234 = arith.select %233, %226, %202 : vector<8x64xi1>, vector<8x64xf32>
    %cst_41 = arith.constant 0.000000e+00 : f32
    %235 = vector.shape_cast %210 : vector<8x1xi1> to vector<8x1xi1>
    %236 = vector.broadcast %235 : vector<8x1xi1> to vector<8x64xi1>
    %237 = vector.broadcast %cst_41 : f32 to vector<8x64xf32>
    %238 = arith.select %236, %228, %237 : vector<8x64xi1>, vector<8x64xf32>
    %c48 = arith.constant 48 : index
    %c0_42 = arith.constant 0 : index
    %239 = vector.load %arg16[%c48, %c0_42] : memref<64x64xf32, #tpu.memory_space<vmem>>, vector<8x64xf32>
    tpu.vector_store %arg16[%c48, %c0_42], %238 {strides = array<i32>} : memref<64x64xf32, #tpu.memory_space<vmem>>, vector<8x64xf32>,
    %240 = vector.extract_strided_slice %11 {offsets = [56, 0], sizes = [8, 256], strides = [1, 1]} : vector<64x512xf32> to vector<8x256xf32>
    %241 = vector.extract_strided_slice %4 {offsets = [7, 0, 0], sizes = [1, 8, 1], strides = [1, 1, 1]} : vector<8x8x1xi1> to vector<1x8x1xi1>
    %242 = vector.shape_cast %241 : vector<1x8x1xi1> to vector<8x1xi1>
    %cst_43 = arith.constant dense<0.000000e+00> : vector<8x256xf32>
    %243 = tpu.matmul %231, %12, %cst_43 {dimension_numbers = #tpu.dot_dimension_numbers<[1], [0], [0], [1], [0, 0, 1, 1], [], []>} : vector<8x64xf32>, vector<64x256xf32>, vector<8x256xf32> -> vector<8x256xf32>
    %244 = arith.addf %240, %243 : vector<8x256xf32>
    %245 = vector.extract_strided_slice %244 {offsets = [0, 0], sizes = [8, 192], strides = [1, 1]} : vector<8x256xf32> to vector<8x192xf32>
    %246 = arith.negf %245 : vector<8x192xf32>
    %247 = math.exp %246 : vector<8x192xf32>
    %cst_44 = arith.constant 1.000000e+00 : f32
    %248 = vector.broadcast %cst_44 : f32 to vector<8x192xf32>
    %249 = arith.addf %248, %247 : vector<8x192xf32>
    %250 = arith.divf %248, %249 : vector<8x192xf32>
    %251 = vector.extract_strided_slice %244 {offsets = [0, 192], sizes = [8, 64], strides = [1, 1]} : vector<8x256xf32> to vector<8x64xf32>
    %252 = math.tanh %251 : vector<8x64xf32>
    %253 = vector.extract_strided_slice %250 {offsets = [0, 0], sizes = [8, 64], strides = [1, 1]} : vector<8x192xf32> to vector<8x64xf32>
    %254 = vector.extract_strided_slice %250 {offsets = [0, 64], sizes = [8, 64], strides = [1, 1]} : vector<8x192xf32> to vector<8x64xf32>
    %255 = vector.extract_strided_slice %250 {offsets = [0, 128], sizes = [8, 64], strides = [1, 1]} : vector<8x192xf32> to vector<8x64xf32>
    %256 = arith.mulf %254, %234 : vector<8x64xf32>
    %257 = arith.mulf %253, %252 : vector<8x64xf32>
    %258 = arith.addf %256, %257 : vector<8x64xf32>
    %259 = math.tanh %258 : vector<8x64xf32>
    %260 = arith.mulf %255, %259 : vector<8x64xf32>
    %cst_45 = arith.constant 0.000000e+00 : f32
    %261 = vector.shape_cast %242 : vector<8x1xi1> to vector<8x1xi1>
    %262 = vector.broadcast %261 : vector<8x1xi1> to vector<8x64xi1>
    %263 = vector.broadcast %cst_45 : f32 to vector<8x64xf32>
    %264 = arith.select %262, %260, %263 : vector<8x64xi1>, vector<8x64xf32>
    %c56 = arith.constant 56 : index
    %c0_46 = arith.constant 0 : index
    %265 = vector.load %arg16[%c56, %c0_46] : memref<64x64xf32, #tpu.memory_space<vmem>>, vector<8x64xf32>
    tpu.vector_store %arg16[%c56, %c0_46], %264 {strides = array<i32>} : memref<64x64xf32, #tpu.memory_space<vmem>>, vector<8x64xf32>,
    %cst_47 = arith.constant 0.000000e+00 : f32
    %266 = vector.broadcast %cst_47 : f32 to vector<8x64xf32>
    %cst_48 = arith.constant 0.000000e+00 : f32
    %267 = vector.broadcast %cst_48 : f32 to vector<8x64xf32>
    %268 = vector.extract_strided_slice %11 {offsets = [56, 256], sizes = [8, 256], strides = [1, 1]} : vector<64x512xf32> to vector<8x256xf32>
    %269 = vector.extract_strided_slice %4 {offsets = [7, 0, 0], sizes = [1, 8, 1], strides = [1, 1, 1]} : vector<8x8x1xi1> to vector<1x8x1xi1>
    %270 = vector.shape_cast %269 : vector<1x8x1xi1> to vector<8x1xi1>
    %cst_49 = arith.constant dense<0.000000e+00> : vector<8x256xf32>
    %271 = tpu.matmul %266, %13, %cst_49 {dimension_numbers = #tpu.dot_dimension_numbers<[1], [0], [0], [1], [0, 0, 1, 1], [], []>} : vector<8x64xf32>, vector<64x256xf32>, vector<8x256xf32> -> vector<8x256xf32>
    %272 = arith.addf %268, %271 : vector<8x256xf32>
    %273 = vector.extract_strided_slice %272 {offsets = [0, 0], sizes = [8, 192], strides = [1, 1]} : vector<8x256xf32> to vector<8x192xf32>
    %274 = arith.negf %273 : vector<8x192xf32>
    %275 = math.exp %274 : vector<8x192xf32>
    %cst_50 = arith.constant 1.000000e+00 : f32
    %276 = vector.broadcast %cst_50 : f32 to vector<8x192xf32>
    %277 = arith.addf %276, %275 : vector<8x192xf32>
    %278 = arith.divf %276, %277 : vector<8x192xf32>
    %279 = vector.extract_strided_slice %272 {offsets = [0, 192], sizes = [8, 64], strides = [1, 1]} : vector<8x256xf32> to vector<8x64xf32>
    %280 = math.tanh %279 : vector<8x64xf32>
    %281 = vector.extract_strided_slice %278 {offsets = [0, 0], sizes = [8, 64], strides = [1, 1]} : vector<8x192xf32> to vector<8x64xf32>
    %282 = vector.extract_strided_slice %278 {offsets = [0, 64], sizes = [8, 64], strides = [1, 1]} : vector<8x192xf32> to vector<8x64xf32>
    %283 = vector.extract_strided_slice %278 {offsets = [0, 128], sizes = [8, 64], strides = [1, 1]} : vector<8x192xf32> to vector<8x64xf32>
    %284 = arith.mulf %282, %267 : vector<8x64xf32>
    %285 = arith.mulf %281, %280 : vector<8x64xf32>
    %286 = arith.addf %284, %285 : vector<8x64xf32>
    %287 = math.tanh %286 : vector<8x64xf32>
    %288 = arith.mulf %283, %287 : vector<8x64xf32>
    %289 = vector.shape_cast %270 : vector<8x1xi1> to vector<8x1xi1>
    %290 = vector.broadcast %289 : vector<8x1xi1> to vector<8x64xi1>
    %291 = arith.select %290, %288, %266 : vector<8x64xi1>, vector<8x64xf32>
    %292 = vector.shape_cast %270 : vector<8x1xi1> to vector<8x1xi1>
    %293 = vector.broadcast %292 : vector<8x1xi1> to vector<8x64xi1>
    %294 = arith.select %293, %286, %267 : vector<8x64xi1>, vector<8x64xf32>
    %cst_51 = arith.constant 0.000000e+00 : f32
    %295 = vector.shape_cast %270 : vector<8x1xi1> to vector<8x1xi1>
    %296 = vector.broadcast %295 : vector<8x1xi1> to vector<8x64xi1>
    %297 = vector.broadcast %cst_51 : f32 to vector<8x64xf32>
    %298 = arith.select %296, %288, %297 : vector<8x64xi1>, vector<8x64xf32>
    %c56_52 = arith.constant 56 : index
    %c0_53 = arith.constant 0 : index
    %299 = vector.load %arg17[%c56_52, %c0_53] : memref<64x64xf32, #tpu.memory_space<vmem>>, vector<8x64xf32>
    tpu.vector_store %arg17[%c56_52, %c0_53], %298 {strides = array<i32>} : memref<64x64xf32, #tpu.memory_space<vmem>>, vector<8x64xf32>,
    %300 = vector.extract_strided_slice %11 {offsets = [48, 256], sizes = [8, 256], strides = [1, 1]} : vector<64x512xf32> to vector<8x256xf32>
    %301 = vector.extract_strided_slice %4 {offsets = [6, 0, 0], sizes = [1, 8, 1], strides = [1, 1, 1]} : vector<8x8x1xi1> to vector<1x8x1xi1>
    %302 = vector.shape_cast %301 : vector<1x8x1xi1> to vector<8x1xi1>
    %cst_54 = arith.constant dense<0.000000e+00> : vector<8x256xf32>
    %303 = tpu.matmul %291, %13, %cst_54 {dimension_numbers = #tpu.dot_dimension_numbers<[1], [0], [0], [1], [0, 0, 1, 1], [], []>} : vector<8x64xf32>, vector<64x256xf32>, vector<8x256xf32> -> vector<8x256xf32>
    %304 = arith.addf %300, %303 : vector<8x256xf32>
    %305 = vector.extract_strided_slice %304 {offsets = [0, 0], sizes = [8, 192], strides = [1, 1]} : vector<8x256xf32> to vector<8x192xf32>
    %306 = arith.negf %305 : vector<8x192xf32>
    %307 = math.exp %306 : vector<8x192xf32>
    %cst_55 = arith.constant 1.000000e+00 : f32
    %308 = vector.broadcast %cst_55 : f32 to vector<8x192xf32>
    %309 = arith.addf %308, %307 : vector<8x192xf32>
    %310 = arith.divf %308, %309 : vector<8x192xf32>
    %311 = vector.extract_strided_slice %304 {offsets = [0, 192], sizes = [8, 64], strides = [1, 1]} : vector<8x256xf32> to vector<8x64xf32>
    %312 = math.tanh %311 : vector<8x64xf32>
    %313 = vector.extract_strided_slice %310 {offsets = [0, 0], sizes = [8, 64], strides = [1, 1]} : vector<8x192xf32> to vector<8x64xf32>
    %314 = vector.extract_strided_slice %310 {offsets = [0, 64], sizes = [8, 64], strides = [1, 1]} : vector<8x192xf32> to vector<8x64xf32>
    %315 = vector.extract_strided_slice %310 {offsets = [0, 128], sizes = [8, 64], strides = [1, 1]} : vector<8x192xf32> to vector<8x64xf32>
    %316 = arith.mulf %314, %294 : vector<8x64xf32>
    %317 = arith.mulf %313, %312 : vector<8x64xf32>
    %318 = arith.addf %316, %317 : vector<8x64xf32>
    %319 = math.tanh %318 : vector<8x64xf32>
    %320 = arith.mulf %315, %319 : vector<8x64xf32>
    %321 = vector.shape_cast %302 : vector<8x1xi1> to vector<8x1xi1>
    %322 = vector.broadcast %321 : vector<8x1xi1> to vector<8x64xi1>
    %323 = arith.select %322, %320, %291 : vector<8x64xi1>, vector<8x64xf32>
    %324 = vector.shape_cast %302 : vector<8x1xi1> to vector<8x1xi1>
    %325 = vector.broadcast %324 : vector<8x1xi1> to vector<8x64xi1>
    %326 = arith.select %325, %318, %294 : vector<8x64xi1>, vector<8x64xf32>
    %cst_56 = arith.constant 0.000000e+00 : f32
    %327 = vector.shape_cast %302 : vector<8x1xi1> to vector<8x1xi1>
    %328 = vector.broadcast %327 : vector<8x1xi1> to vector<8x64xi1>
    %329 = vector.broadcast %cst_56 : f32 to vector<8x64xf32>
    %330 = arith.select %328, %320, %329 : vector<8x64xi1>, vector<8x64xf32>
    %c48_57 = arith.constant 48 : index
    %c0_58 = arith.constant 0 : index
    %331 = vector.load %arg17[%c48_57, %c0_58] : memref<64x64xf32, #tpu.memory_space<vmem>>, vector<8x64xf32>
    tpu.vector_store %arg17[%c48_57, %c0_58], %330 {strides = array<i32>} : memref<64x64xf32, #tpu.memory_space<vmem>>, vector<8x64xf32>,
    %332 = vector.extract_strided_slice %11 {offsets = [40, 256], sizes = [8, 256], strides = [1, 1]} : vector<64x512xf32> to vector<8x256xf32>
    %333 = vector.extract_strided_slice %4 {offsets = [5, 0, 0], sizes = [1, 8, 1], strides = [1, 1, 1]} : vector<8x8x1xi1> to vector<1x8x1xi1>
    %334 = vector.shape_cast %333 : vector<1x8x1xi1> to vector<8x1xi1>
    %cst_59 = arith.constant dense<0.000000e+00> : vector<8x256xf32>
    %335 = tpu.matmul %323, %13, %cst_59 {dimension_numbers = #tpu.dot_dimension_numbers<[1], [0], [0], [1], [0, 0, 1, 1], [], []>} : vector<8x64xf32>, vector<64x256xf32>, vector<8x256xf32> -> vector<8x256xf32>
    %336 = arith.addf %332, %335 : vector<8x256xf32>
    %337 = vector.extract_strided_slice %336 {offsets = [0, 0], sizes = [8, 192], strides = [1, 1]} : vector<8x256xf32> to vector<8x192xf32>
    %338 = arith.negf %337 : vector<8x192xf32>
    %339 = math.exp %338 : vector<8x192xf32>
    %cst_60 = arith.constant 1.000000e+00 : f32
    %340 = vector.broadcast %cst_60 : f32 to vector<8x192xf32>
    %341 = arith.addf %340, %339 : vector<8x192xf32>
    %342 = arith.divf %340, %341 : vector<8x192xf32>
    %343 = vector.extract_strided_slice %336 {offsets = [0, 192], sizes = [8, 64], strides = [1, 1]} : vector<8x256xf32> to vector<8x64xf32>
    %344 = math.tanh %343 : vector<8x64xf32>
    %345 = vector.extract_strided_slice %342 {offsets = [0, 0], sizes = [8, 64], strides = [1, 1]} : vector<8x192xf32> to vector<8x64xf32>
    %346 = vector.extract_strided_slice %342 {offsets = [0, 64], sizes = [8, 64], strides = [1, 1]} : vector<8x192xf32> to vector<8x64xf32>
    %347 = vector.extract_strided_slice %342 {offsets = [0, 128], sizes = [8, 64], strides = [1, 1]} : vector<8x192xf32> to vector<8x64xf32>
    %348 = arith.mulf %346, %326 : vector<8x64xf32>
    %349 = arith.mulf %345, %344 : vector<8x64xf32>
    %350 = arith.addf %348, %349 : vector<8x64xf32>
    %351 = math.tanh %350 : vector<8x64xf32>
    %352 = arith.mulf %347, %351 : vector<8x64xf32>
    %353 = vector.shape_cast %334 : vector<8x1xi1> to vector<8x1xi1>
    %354 = vector.broadcast %353 : vector<8x1xi1> to vector<8x64xi1>
    %355 = arith.select %354, %352, %323 : vector<8x64xi1>, vector<8x64xf32>
    %356 = vector.shape_cast %334 : vector<8x1xi1> to vector<8x1xi1>
    %357 = vector.broadcast %356 : vector<8x1xi1> to vector<8x64xi1>
    %358 = arith.select %357, %350, %326 : vector<8x64xi1>, vector<8x64xf32>
    %cst_61 = arith.constant 0.000000e+00 : f32
    %359 = vector.shape_cast %334 : vector<8x1xi1> to vector<8x1xi1>
    %360 = vector.broadcast %359 : vector<8x1xi1> to vector<8x64xi1>
    %361 = vector.broadcast %cst_61 : f32 to vector<8x64xf32>
    %362 = arith.select %360, %352, %361 : vector<8x64xi1>, vector<8x64xf32>
    %c40_62 = arith.constant 40 : index
    %c0_63 = arith.constant 0 : index
    %363 = vector.load %arg17[%c40_62, %c0_63] : memref<64x64xf32, #tpu.memory_space<vmem>>, vector<8x64xf32>
    tpu.vector_store %arg17[%c40_62, %c0_63], %362 {strides = array<i32>} : memref<64x64xf32, #tpu.memory_space<vmem>>, vector<8x64xf32>,
    %364 = vector.extract_strided_slice %11 {offsets = [32, 256], sizes = [8, 256], strides = [1, 1]} : vector<64x512xf32> to vector<8x256xf32>
    %365 = vector.extract_strided_slice %4 {offsets = [4, 0, 0], sizes = [1, 8, 1], strides = [1, 1, 1]} : vector<8x8x1xi1> to vector<1x8x1xi1>
    %366 = vector.shape_cast %365 : vector<1x8x1xi1> to vector<8x1xi1>
    %cst_64 = arith.constant dense<0.000000e+00> : vector<8x256xf32>
    %367 = tpu.matmul %355, %13, %cst_64 {dimension_numbers = #tpu.dot_dimension_numbers<[1], [0], [0], [1], [0, 0, 1, 1], [], []>} : vector<8x64xf32>, vector<64x256xf32>, vector<8x256xf32> -> vector<8x256xf32>
    %368 = arith.addf %364, %367 : vector<8x256xf32>
    %369 = vector.extract_strided_slice %368 {offsets = [0, 0], sizes = [8, 192], strides = [1, 1]} : vector<8x256xf32> to vector<8x192xf32>
    %370 = arith.negf %369 : vector<8x192xf32>
    %371 = math.exp %370 : vector<8x192xf32>
    %cst_65 = arith.constant 1.000000e+00 : f32
    %372 = vector.broadcast %cst_65 : f32 to vector<8x192xf32>
    %373 = arith.addf %372, %371 : vector<8x192xf32>
    %374 = arith.divf %372, %373 : vector<8x192xf32>
    %375 = vector.extract_strided_slice %368 {offsets = [0, 192], sizes = [8, 64], strides = [1, 1]} : vector<8x256xf32> to vector<8x64xf32>
    %376 = math.tanh %375 : vector<8x64xf32>
    %377 = vector.extract_strided_slice %374 {offsets = [0, 0], sizes = [8, 64], strides = [1, 1]} : vector<8x192xf32> to vector<8x64xf32>
    %378 = vector.extract_strided_slice %374 {offsets = [0, 64], sizes = [8, 64], strides = [1, 1]} : vector<8x192xf32> to vector<8x64xf32>
    %379 = vector.extract_strided_slice %374 {offsets = [0, 128], sizes = [8, 64], strides = [1, 1]} : vector<8x192xf32> to vector<8x64xf32>
    %380 = arith.mulf %378, %358 : vector<8x64xf32>
    %381 = arith.mulf %377, %376 : vector<8x64xf32>
    %382 = arith.addf %380, %381 : vector<8x64xf32>
    %383 = math.tanh %382 : vector<8x64xf32>
    %384 = arith.mulf %379, %383 : vector<8x64xf32>
    %385 = vector.shape_cast %366 : vector<8x1xi1> to vector<8x1xi1>
    %386 = vector.broadcast %385 : vector<8x1xi1> to vector<8x64xi1>
    %387 = arith.select %386, %384, %355 : vector<8x64xi1>, vector<8x64xf32>
    %388 = vector.shape_cast %366 : vector<8x1xi1> to vector<8x1xi1>
    %389 = vector.broadcast %388 : vector<8x1xi1> to vector<8x64xi1>
    %390 = arith.select %389, %382, %358 : vector<8x64xi1>, vector<8x64xf32>
    %cst_66 = arith.constant 0.000000e+00 : f32
    %391 = vector.shape_cast %366 : vector<8x1xi1> to vector<8x1xi1>
    %392 = vector.broadcast %391 : vector<8x1xi1> to vector<8x64xi1>
    %393 = vector.broadcast %cst_66 : f32 to vector<8x64xf32>
    %394 = arith.select %392, %384, %393 : vector<8x64xi1>, vector<8x64xf32>
    %c32_67 = arith.constant 32 : index
    %c0_68 = arith.constant 0 : index
    %395 = vector.load %arg17[%c32_67, %c0_68] : memref<64x64xf32, #tpu.memory_space<vmem>>, vector<8x64xf32>
    tpu.vector_store %arg17[%c32_67, %c0_68], %394 {strides = array<i32>} : memref<64x64xf32, #tpu.memory_space<vmem>>, vector<8x64xf32>,
    %396 = vector.extract_strided_slice %11 {offsets = [24, 256], sizes = [8, 256], strides = [1, 1]} : vector<64x512xf32> to vector<8x256xf32>
    %397 = vector.extract_strided_slice %4 {offsets = [3, 0, 0], sizes = [1, 8, 1], strides = [1, 1, 1]} : vector<8x8x1xi1> to vector<1x8x1xi1>
    %398 = vector.shape_cast %397 : vector<1x8x1xi1> to vector<8x1xi1>
    %cst_69 = arith.constant dense<0.000000e+00> : vector<8x256xf32>
    %399 = tpu.matmul %387, %13, %cst_69 {dimension_numbers = #tpu.dot_dimension_numbers<[1], [0], [0], [1], [0, 0, 1, 1], [], []>} : vector<8x64xf32>, vector<64x256xf32>, vector<8x256xf32> -> vector<8x256xf32>
    %400 = arith.addf %396, %399 : vector<8x256xf32>
    %401 = vector.extract_strided_slice %400 {offsets = [0, 0], sizes = [8, 192], strides = [1, 1]} : vector<8x256xf32> to vector<8x192xf32>
    %402 = arith.negf %401 : vector<8x192xf32>
    %403 = math.exp %402 : vector<8x192xf32>
    %cst_70 = arith.constant 1.000000e+00 : f32
    %404 = vector.broadcast %cst_70 : f32 to vector<8x192xf32>
    %405 = arith.addf %404, %403 : vector<8x192xf32>
    %406 = arith.divf %404, %405 : vector<8x192xf32>
    %407 = vector.extract_strided_slice %400 {offsets = [0, 192], sizes = [8, 64], strides = [1, 1]} : vector<8x256xf32> to vector<8x64xf32>
    %408 = math.tanh %407 : vector<8x64xf32>
    %409 = vector.extract_strided_slice %406 {offsets = [0, 0], sizes = [8, 64], strides = [1, 1]} : vector<8x192xf32> to vector<8x64xf32>
    %410 = vector.extract_strided_slice %406 {offsets = [0, 64], sizes = [8, 64], strides = [1, 1]} : vector<8x192xf32> to vector<8x64xf32>
    %411 = vector.extract_strided_slice %406 {offsets = [0, 128], sizes = [8, 64], strides = [1, 1]} : vector<8x192xf32> to vector<8x64xf32>
    %412 = arith.mulf %410, %390 : vector<8x64xf32>
    %413 = arith.mulf %409, %408 : vector<8x64xf32>
    %414 = arith.addf %412, %413 : vector<8x64xf32>
    %415 = math.tanh %414 : vector<8x64xf32>
    %416 = arith.mulf %411, %415 : vector<8x64xf32>
    %417 = vector.shape_cast %398 : vector<8x1xi1> to vector<8x1xi1>
    %418 = vector.broadcast %417 : vector<8x1xi1> to vector<8x64xi1>
    %419 = arith.select %418, %416, %387 : vector<8x64xi1>, vector<8x64xf32>
    %420 = vector.shape_cast %398 : vector<8x1xi1> to vector<8x1xi1>
    %421 = vector.broadcast %420 : vector<8x1xi1> to vector<8x64xi1>
    %422 = arith.select %421, %414, %390 : vector<8x64xi1>, vector<8x64xf32>
    %cst_71 = arith.constant 0.000000e+00 : f32
    %423 = vector.shape_cast %398 : vector<8x1xi1> to vector<8x1xi1>
    %424 = vector.broadcast %423 : vector<8x1xi1> to vector<8x64xi1>
    %425 = vector.broadcast %cst_71 : f32 to vector<8x64xf32>
    %426 = arith.select %424, %416, %425 : vector<8x64xi1>, vector<8x64xf32>
    %c24_72 = arith.constant 24 : index
    %c0_73 = arith.constant 0 : index
    %427 = vector.load %arg17[%c24_72, %c0_73] : memref<64x64xf32, #tpu.memory_space<vmem>>, vector<8x64xf32>
    tpu.vector_store %arg17[%c24_72, %c0_73], %426 {strides = array<i32>} : memref<64x64xf32, #tpu.memory_space<vmem>>, vector<8x64xf32>,
    %428 = vector.extract_strided_slice %11 {offsets = [16, 256], sizes = [8, 256], strides = [1, 1]} : vector<64x512xf32> to vector<8x256xf32>
    %429 = vector.extract_strided_slice %4 {offsets = [2, 0, 0], sizes = [1, 8, 1], strides = [1, 1, 1]} : vector<8x8x1xi1> to vector<1x8x1xi1>
    %430 = vector.shape_cast %429 : vector<1x8x1xi1> to vector<8x1xi1>
    %cst_74 = arith.constant dense<0.000000e+00> : vector<8x256xf32>
    %431 = tpu.matmul %419, %13, %cst_74 {dimension_numbers = #tpu.dot_dimension_numbers<[1], [0], [0], [1], [0, 0, 1, 1], [], []>} : vector<8x64xf32>, vector<64x256xf32>, vector<8x256xf32> -> vector<8x256xf32>
    %432 = arith.addf %428, %431 : vector<8x256xf32>
    %433 = vector.extract_strided_slice %432 {offsets = [0, 0], sizes = [8, 192], strides = [1, 1]} : vector<8x256xf32> to vector<8x192xf32>
    %434 = arith.negf %433 : vector<8x192xf32>
    %435 = math.exp %434 : vector<8x192xf32>
    %cst_75 = arith.constant 1.000000e+00 : f32
    %436 = vector.broadcast %cst_75 : f32 to vector<8x192xf32>
    %437 = arith.addf %436, %435 : vector<8x192xf32>
    %438 = arith.divf %436, %437 : vector<8x192xf32>
    %439 = vector.extract_strided_slice %432 {offsets = [0, 192], sizes = [8, 64], strides = [1, 1]} : vector<8x256xf32> to vector<8x64xf32>
    %440 = math.tanh %439 : vector<8x64xf32>
    %441 = vector.extract_strided_slice %438 {offsets = [0, 0], sizes = [8, 64], strides = [1, 1]} : vector<8x192xf32> to vector<8x64xf32>
    %442 = vector.extract_strided_slice %438 {offsets = [0, 64], sizes = [8, 64], strides = [1, 1]} : vector<8x192xf32> to vector<8x64xf32>
    %443 = vector.extract_strided_slice %438 {offsets = [0, 128], sizes = [8, 64], strides = [1, 1]} : vector<8x192xf32> to vector<8x64xf32>
    %444 = arith.mulf %442, %422 : vector<8x64xf32>
    %445 = arith.mulf %441, %440 : vector<8x64xf32>
    %446 = arith.addf %444, %445 : vector<8x64xf32>
    %447 = math.tanh %446 : vector<8x64xf32>
    %448 = arith.mulf %443, %447 : vector<8x64xf32>
    %449 = vector.shape_cast %430 : vector<8x1xi1> to vector<8x1xi1>
    %450 = vector.broadcast %449 : vector<8x1xi1> to vector<8x64xi1>
    %451 = arith.select %450, %448, %419 : vector<8x64xi1>, vector<8x64xf32>
    %452 = vector.shape_cast %430 : vector<8x1xi1> to vector<8x1xi1>
    %453 = vector.broadcast %452 : vector<8x1xi1> to vector<8x64xi1>
    %454 = arith.select %453, %446, %422 : vector<8x64xi1>, vector<8x64xf32>
    %cst_76 = arith.constant 0.000000e+00 : f32
    %455 = vector.shape_cast %430 : vector<8x1xi1> to vector<8x1xi1>
    %456 = vector.broadcast %455 : vector<8x1xi1> to vector<8x64xi1>
    %457 = vector.broadcast %cst_76 : f32 to vector<8x64xf32>
    %458 = arith.select %456, %448, %457 : vector<8x64xi1>, vector<8x64xf32>
    %c16_77 = arith.constant 16 : index
    %c0_78 = arith.constant 0 : index
    %459 = vector.load %arg17[%c16_77, %c0_78] : memref<64x64xf32, #tpu.memory_space<vmem>>, vector<8x64xf32>
    tpu.vector_store %arg17[%c16_77, %c0_78], %458 {strides = array<i32>} : memref<64x64xf32, #tpu.memory_space<vmem>>, vector<8x64xf32>,
    %460 = vector.extract_strided_slice %11 {offsets = [8, 256], sizes = [8, 256], strides = [1, 1]} : vector<64x512xf32> to vector<8x256xf32>
    %461 = vector.extract_strided_slice %4 {offsets = [1, 0, 0], sizes = [1, 8, 1], strides = [1, 1, 1]} : vector<8x8x1xi1> to vector<1x8x1xi1>
    %462 = vector.shape_cast %461 : vector<1x8x1xi1> to vector<8x1xi1>
    %cst_79 = arith.constant dense<0.000000e+00> : vector<8x256xf32>
    %463 = tpu.matmul %451, %13, %cst_79 {dimension_numbers = #tpu.dot_dimension_numbers<[1], [0], [0], [1], [0, 0, 1, 1], [], []>} : vector<8x64xf32>, vector<64x256xf32>, vector<8x256xf32> -> vector<8x256xf32>
    %464 = arith.addf %460, %463 : vector<8x256xf32>
    %465 = vector.extract_strided_slice %464 {offsets = [0, 0], sizes = [8, 192], strides = [1, 1]} : vector<8x256xf32> to vector<8x192xf32>
    %466 = arith.negf %465 : vector<8x192xf32>
    %467 = math.exp %466 : vector<8x192xf32>
    %cst_80 = arith.constant 1.000000e+00 : f32
    %468 = vector.broadcast %cst_80 : f32 to vector<8x192xf32>
    %469 = arith.addf %468, %467 : vector<8x192xf32>
    %470 = arith.divf %468, %469 : vector<8x192xf32>
    %471 = vector.extract_strided_slice %464 {offsets = [0, 192], sizes = [8, 64], strides = [1, 1]} : vector<8x256xf32> to vector<8x64xf32>
    %472 = math.tanh %471 : vector<8x64xf32>
    %473 = vector.extract_strided_slice %470 {offsets = [0, 0], sizes = [8, 64], strides = [1, 1]} : vector<8x192xf32> to vector<8x64xf32>
    %474 = vector.extract_strided_slice %470 {offsets = [0, 64], sizes = [8, 64], strides = [1, 1]} : vector<8x192xf32> to vector<8x64xf32>
    %475 = vector.extract_strided_slice %470 {offsets = [0, 128], sizes = [8, 64], strides = [1, 1]} : vector<8x192xf32> to vector<8x64xf32>
    %476 = arith.mulf %474, %454 : vector<8x64xf32>
    %477 = arith.mulf %473, %472 : vector<8x64xf32>
    %478 = arith.addf %476, %477 : vector<8x64xf32>
    %479 = math.tanh %478 : vector<8x64xf32>
    %480 = arith.mulf %475, %479 : vector<8x64xf32>
    %481 = vector.shape_cast %462 : vector<8x1xi1> to vector<8x1xi1>
    %482 = vector.broadcast %481 : vector<8x1xi1> to vector<8x64xi1>
    %483 = arith.select %482, %480, %451 : vector<8x64xi1>, vector<8x64xf32>
    %484 = vector.shape_cast %462 : vector<8x1xi1> to vector<8x1xi1>
    %485 = vector.broadcast %484 : vector<8x1xi1> to vector<8x64xi1>
    %486 = arith.select %485, %478, %454 : vector<8x64xi1>, vector<8x64xf32>
    %cst_81 = arith.constant 0.000000e+00 : f32
    %487 = vector.shape_cast %462 : vector<8x1xi1> to vector<8x1xi1>
    %488 = vector.broadcast %487 : vector<8x1xi1> to vector<8x64xi1>
    %489 = vector.broadcast %cst_81 : f32 to vector<8x64xf32>
    %490 = arith.select %488, %480, %489 : vector<8x64xi1>, vector<8x64xf32>
    %c8_82 = arith.constant 8 : index
    %c0_83 = arith.constant 0 : index
    %491 = vector.load %arg17[%c8_82, %c0_83] : memref<64x64xf32, #tpu.memory_space<vmem>>, vector<8x64xf32>
    tpu.vector_store %arg17[%c8_82, %c0_83], %490 {strides = array<i32>} : memref<64x64xf32, #tpu.memory_space<vmem>>, vector<8x64xf32>,
    %492 = vector.extract_strided_slice %11 {offsets = [0, 256], sizes = [8, 256], strides = [1, 1]} : vector<64x512xf32> to vector<8x256xf32>
    %493 = vector.extract_strided_slice %4 {offsets = [0, 0, 0], sizes = [1, 8, 1], strides = [1, 1, 1]} : vector<8x8x1xi1> to vector<1x8x1xi1>
    %494 = vector.shape_cast %493 : vector<1x8x1xi1> to vector<8x1xi1>
    %cst_84 = arith.constant dense<0.000000e+00> : vector<8x256xf32>
    %495 = tpu.matmul %483, %13, %cst_84 {dimension_numbers = #tpu.dot_dimension_numbers<[1], [0], [0], [1], [0, 0, 1, 1], [], []>} : vector<8x64xf32>, vector<64x256xf32>, vector<8x256xf32> -> vector<8x256xf32>
    %496 = arith.addf %492, %495 : vector<8x256xf32>
    %497 = vector.extract_strided_slice %496 {offsets = [0, 0], sizes = [8, 192], strides = [1, 1]} : vector<8x256xf32> to vector<8x192xf32>
    %498 = arith.negf %497 : vector<8x192xf32>
    %499 = math.exp %498 : vector<8x192xf32>
    %cst_85 = arith.constant 1.000000e+00 : f32
    %500 = vector.broadcast %cst_85 : f32 to vector<8x192xf32>
    %501 = arith.addf %500, %499 : vector<8x192xf32>
    %502 = arith.divf %500, %501 : vector<8x192xf32>
    %503 = vector.extract_strided_slice %496 {offsets = [0, 192], sizes = [8, 64], strides = [1, 1]} : vector<8x256xf32> to vector<8x64xf32>
    %504 = math.tanh %503 : vector<8x64xf32>
    %505 = vector.extract_strided_slice %502 {offsets = [0, 0], sizes = [8, 64], strides = [1, 1]} : vector<8x192xf32> to vector<8x64xf32>
    %506 = vector.extract_strided_slice %502 {offsets = [0, 64], sizes = [8, 64], strides = [1, 1]} : vector<8x192xf32> to vector<8x64xf32>
    %507 = vector.extract_strided_slice %502 {offsets = [0, 128], sizes = [8, 64], strides = [1, 1]} : vector<8x192xf32> to vector<8x64xf32>
    %508 = arith.mulf %506, %486 : vector<8x64xf32>
    %509 = arith.mulf %505, %504 : vector<8x64xf32>
    %510 = arith.addf %508, %509 : vector<8x64xf32>
    %511 = math.tanh %510 : vector<8x64xf32>
    %512 = arith.mulf %507, %511 : vector<8x64xf32>
    %cst_86 = arith.constant 0.000000e+00 : f32
    %513 = vector.shape_cast %494 : vector<8x1xi1> to vector<8x1xi1>
    %514 = vector.broadcast %513 : vector<8x1xi1> to vector<8x64xi1>
    %515 = vector.broadcast %cst_86 : f32 to vector<8x64xf32>
    %516 = arith.select %514, %512, %515 : vector<8x64xi1>, vector<8x64xf32>
    %c0_87 = arith.constant 0 : index
    %c0_88 = arith.constant 0 : index
    %517 = vector.load %arg17[%c0_87, %c0_88] : memref<64x64xf32, #tpu.memory_space<vmem>>, vector<8x64xf32>
    tpu.vector_store %arg17[%c0_87, %c0_88], %516 {strides = array<i32>} : memref<64x64xf32, #tpu.memory_space<vmem>>, vector<8x64xf32>,
    %c0_89 = arith.constant 0 : index
    %c0_90 = arith.constant 0 : index
    %518 = vector.load %arg16[%c0_89, %c0_90] : memref<64x64xf32, #tpu.memory_space<vmem>>, vector<64x64xf32>
    %c0_91 = arith.constant 0 : index
    %c0_92 = arith.constant 0 : index
    %519 = vector.load %arg7[%c0_91, %c0_92] : memref<64x256xf32, #tpu.memory_space<vmem>>, vector<64x256xf32>
    %cst_93 = arith.constant dense<0.000000e+00> : vector<64x256xf32>
    %520 = tpu.matmul %518, %519, %cst_93 {dimension_numbers = #tpu.dot_dimension_numbers<[1], [0], [0], [1], [0, 0, 1, 1], [], []>} : vector<64x64xf32>, vector<64x256xf32>, vector<64x256xf32> -> vector<64x256xf32>
    %c0_94 = arith.constant 0 : index
    %c0_95 = arith.constant 0 : index
    %521 = vector.load %arg17[%c0_94, %c0_95] : memref<64x64xf32, #tpu.memory_space<vmem>>, vector<64x64xf32>
    %c0_96 = arith.constant 0 : index
    %c0_97 = arith.constant 0 : index
    %522 = vector.load %arg8[%c0_96, %c0_97] : memref<64x256xf32, #tpu.memory_space<vmem>>, vector<64x256xf32>
    %cst_98 = arith.constant dense<0.000000e+00> : vector<64x256xf32>
    %523 = tpu.matmul %521, %522, %cst_98 {dimension_numbers = #tpu.dot_dimension_numbers<[1], [0], [0], [1], [0, 0, 1, 1], [], []>} : vector<64x64xf32>, vector<64x256xf32>, vector<64x256xf32> -> vector<64x256xf32>
    %524 = arith.addf %520, %523 : vector<64x256xf32>
    %525 = vector.extract_strided_slice %524 {offsets = [0, 0], sizes = [64, 128], strides = [1, 1]} : vector<64x256xf32> to vector<64x128xf32>
    %526 = vector.shape_cast %525 : vector<64x128xf32> to vector<8x8x128xf32>
    %527 = vector.extract_strided_slice %524 {offsets = [0, 128], sizes = [64, 128], strides = [1, 1]} : vector<64x256xf32> to vector<64x128xf32>
    %528 = math.tanh %527 : vector<64x128xf32>
    %c0_99 = arith.constant 0 : index
    %c0_100 = arith.constant 0 : index
    %529 = vector.load %arg9[%c0_99, %c0_100] : memref<128x2xf32, #tpu.memory_space<vmem>>, vector<128x2xf32>
    %cst_101 = arith.constant dense<0.000000e+00> : vector<64x2xf32>
    %530 = tpu.matmul %528, %529, %cst_101 {dimension_numbers = #tpu.dot_dimension_numbers<[1], [0], [0], [1], [0, 0, 1, 1], [], []>} : vector<64x128xf32>, vector<128x2xf32>, vector<64x2xf32> -> vector<64x2xf32>
    %cst_102 = arith.constant 0.333333343 : f32
    %531 = vector.broadcast %cst_102 : f32 to vector<64x2xf32>
    %532 = arith.mulf %530, %531 : vector<64x2xf32>
    %533 = vector.shape_cast %532 : vector<64x2xf32> to vector<8x8x2xf32>
    %cst_103 = arith.constant -1.000000e+09 : f32
    %534 = vector.shape_cast %4 : vector<8x8x1xi1> to vector<8x8x1xi1>
    %535 = vector.broadcast %534 : vector<8x8x1xi1> to vector<8x8x2xi1>
    %536 = vector.broadcast %cst_103 : f32 to vector<8x8x2xf32>
    %537 = arith.select %535, %533, %536 : vector<8x8x2xi1>, vector<8x8x2xf32>
    %cst_104 = arith.constant dense<0xFF800000> : vector<8x2xf32>
    %538 = vector.multi_reduction <maximumf>, %537, %cst_104 [0] : vector<8x8x2xf32> to vector<8x2xf32>
    %539 = vector.shape_cast %538 : vector<8x2xf32> to vector<1x8x2xf32>
    %540 = vector.broadcast %539 : vector<1x8x2xf32> to vector<8x8x2xf32>
    %541 = arith.subf %537, %540 : vector<8x8x2xf32>
    %542 = math.exp %541 : vector<8x8x2xf32>
    %cst_105 = arith.constant dense<0.000000e+00> : vector<8x2xf32>
    %543 = vector.multi_reduction <add>, %542, %cst_105 [0] : vector<8x8x2xf32> to vector<8x2xf32>
    %544 = vector.shape_cast %543 : vector<8x2xf32> to vector<1x8x2xf32>
    %545 = tpu.reciprocal %544 {approx = true} : vector<1x8x2xf32> -> vector<1x8x2xf32>
    %546 = vector.broadcast %545 : vector<1x8x2xf32> to vector<8x8x2xf32>
    %547 = arith.mulf %542, %546 : vector<8x8x2xf32>
    %548 = vector.extract_strided_slice %547 {offsets = [0, 0, 0], sizes = [8, 8, 1], strides = [1, 1, 1]} : vector<8x8x2xf32> to vector<8x8x1xf32>
    %549 = vector.broadcast %548 : vector<8x8x1xf32> to vector<8x8x128xf32>
    %550 = arith.mulf %549, %526 : vector<8x8x128xf32>
    %cst_106 = arith.constant dense<0.000000e+00> : vector<8x128xf32>
    %551 = vector.multi_reduction <add>, %550, %cst_106 [0] : vector<8x8x128xf32> to vector<8x128xf32>
    %552 = vector.extract_strided_slice %547 {offsets = [0, 0, 1], sizes = [8, 8, 1], strides = [1, 1, 1]} : vector<8x8x2xf32> to vector<8x8x1xf32>
    %553 = vector.broadcast %552 : vector<8x8x1xf32> to vector<8x8x128xf32>
    %554 = arith.mulf %553, %526 : vector<8x8x128xf32>
    %cst_107 = arith.constant dense<0.000000e+00> : vector<8x128xf32>
    %555 = vector.multi_reduction <add>, %554, %cst_107 [0] : vector<8x8x128xf32> to vector<8x128xf32>
    %c0_108 = arith.constant 0 : index
    %c0_109 = arith.constant 0 : index
    %556 = vector.load %arg10[%c0_108, %c0_109] : memref<128x512xf32, #tpu.memory_space<vmem>>, vector<128x512xf32>
    %cst_110 = arith.constant dense<0.000000e+00> : vector<8x512xf32>
    %557 = tpu.matmul %551, %556, %cst_110 {dimension_numbers = #tpu.dot_dimension_numbers<[1], [0], [0], [1], [0, 0, 1, 1], [], []>} : vector<8x128xf32>, vector<128x512xf32>, vector<8x512xf32> -> vector<8x512xf32>
    %c0_111 = arith.constant 0 : index
    %c0_112 = arith.constant 0 : index
    %558 = vector.load %arg11[%c0_111, %c0_112] : memref<128x512xf32, #tpu.memory_space<vmem>>, vector<128x512xf32>
    %cst_113 = arith.constant dense<0.000000e+00> : vector<8x512xf32>
    %559 = tpu.matmul %555, %558, %cst_113 {dimension_numbers = #tpu.dot_dimension_numbers<[1], [0], [0], [1], [0, 0, 1, 1], [], []>} : vector<8x128xf32>, vector<128x512xf32>, vector<8x512xf32> -> vector<8x512xf32>
    %560 = arith.addf %557, %559 : vector<8x512xf32>
    %c0_114 = arith.constant 0 : index
    %c0_115 = arith.constant 0 : index
    %561 = vector.load %arg12[%c0_114, %c0_115] : memref<1x512xf32, #tpu.memory_space<vmem>>, vector<1x512xf32>
    %562 = vector.broadcast %561 : vector<1x512xf32> to vector<8x512xf32>
    %563 = arith.addf %560, %562 : vector<8x512xf32>
    %c0_116 = arith.constant 0 : index
    %c0_117 = arith.constant 0 : index
    %564 = vector.load %arg13[%c0_116, %c0_117] : memref<512x3xf32, #tpu.memory_space<vmem>>, vector<512x3xf32>
    %cst_118 = arith.constant dense<0.000000e+00> : vector<8x3xf32>
    %565 = tpu.matmul %563, %564, %cst_118 {dimension_numbers = #tpu.dot_dimension_numbers<[1], [0], [0], [1], [0, 0, 1, 1], [], []>} : vector<8x512xf32>, vector<512x3xf32>, vector<8x3xf32> -> vector<8x3xf32>
    %c0_119 = arith.constant 0 : index
    %c0_120 = arith.constant 0 : index
    %566 = vector.load %arg14[%c0_119, %c0_120] : memref<1x3xf32, #tpu.memory_space<vmem>>, vector<1x3xf32>
    %567 = vector.broadcast %566 : vector<1x3xf32> to vector<8x3xf32>
    %568 = arith.addf %565, %567 : vector<8x3xf32>
    %c0_121 = arith.constant 0 : index
    %c0_122 = arith.constant 0 : index
    %569 = vector.load %arg15[%c0_121, %c0_122] : memref<8x3xf32, #tpu.memory_space<vmem>>, vector<8x3xf32>
    tpu.vector_store %arg15[%c0_121, %c0_122], %568 {strides = array<i32>} : memref<8x3xf32, #tpu.memory_space<vmem>>, vector<8x3xf32>,
    return
  }
  func.func @transform_0(%arg0: i32) -> (i32, i32, i32) {
    %c0_i32 = arith.constant 0 : i32
    %c0_i32_0 = arith.constant 0 : i32
    %c0_i32_1 = arith.constant 0 : i32
    return %c0_i32, %arg0, %c0_i32_0 : i32, i32, i32
  }
  func.func @transform_1(%arg0: i32) -> (i32, i32) {
    %c0_i32 = arith.constant 0 : i32
    %c0_i32_0 = arith.constant 0 : i32
    return %arg0, %c0_i32 : i32, i32
  }
  func.func @transform_2(%arg0: i32) -> (i32, i32) {
    %c0_i32 = arith.constant 0 : i32
    %c0_i32_0 = arith.constant 0 : i32
    %c0_i32_1 = arith.constant 0 : i32
    return %c0_i32, %c0_i32_0 : i32, i32
  }
  func.func @transform_3(%arg0: i32) -> (i32, i32) {
    %c0_i32 = arith.constant 0 : i32
    %c0_i32_0 = arith.constant 0 : i32
    %c0_i32_1 = arith.constant 0 : i32
    return %c0_i32, %c0_i32_0 : i32, i32
  }
  func.func @transform_4(%arg0: i32) -> (i32, i32) {
    %c0_i32 = arith.constant 0 : i32
    %c0_i32_0 = arith.constant 0 : i32
    %c0_i32_1 = arith.constant 0 : i32
    return %c0_i32, %c0_i32_0 : i32, i32
  }
  func.func @transform_5(%arg0: i32) -> (i32, i32) {
    %c0_i32 = arith.constant 0 : i32
    %c0_i32_0 = arith.constant 0 : i32
    %c0_i32_1 = arith.constant 0 : i32
    return %c0_i32, %c0_i32_0 : i32, i32
  }
  func.func @transform_6(%arg0: i32) -> (i32, i32) {
    %c0_i32 = arith.constant 0 : i32
    %c0_i32_0 = arith.constant 0 : i32
    %c0_i32_1 = arith.constant 0 : i32
    return %c0_i32, %c0_i32_0 : i32, i32
  }
  func.func @transform_7(%arg0: i32) -> (i32, i32) {
    %c0_i32 = arith.constant 0 : i32
    %c0_i32_0 = arith.constant 0 : i32
    %c0_i32_1 = arith.constant 0 : i32
    return %c0_i32, %c0_i32_0 : i32, i32
  }
  func.func @transform_8(%arg0: i32) -> (i32, i32) {
    %c0_i32 = arith.constant 0 : i32
    %c0_i32_0 = arith.constant 0 : i32
    %c0_i32_1 = arith.constant 0 : i32
    return %c0_i32, %c0_i32_0 : i32, i32
  }
  func.func @transform_9(%arg0: i32) -> (i32, i32) {
    %c0_i32 = arith.constant 0 : i32
    %c0_i32_0 = arith.constant 0 : i32
    %c0_i32_1 = arith.constant 0 : i32
    return %c0_i32, %c0_i32_0 : i32, i32
  }
  func.func @transform_10(%arg0: i32) -> (i32, i32) {
    %c0_i32 = arith.constant 0 : i32
    %c0_i32_0 = arith.constant 0 : i32
    %c0_i32_1 = arith.constant 0 : i32
    return %c0_i32, %c0_i32_0 : i32, i32
  }
  func.func @transform_11(%arg0: i32) -> (i32, i32) {
    %c0_i32 = arith.constant 0 : i32
    %c0_i32_0 = arith.constant 0 : i32
    %c0_i32_1 = arith.constant 0 : i32
    return %c0_i32, %c0_i32_0 : i32, i32
  }
  func.func @transform_12(%arg0: i32) -> (i32, i32) {
    %c0_i32 = arith.constant 0 : i32
    %c0_i32_0 = arith.constant 0 : i32
    %c0_i32_1 = arith.constant 0 : i32
    return %c0_i32, %c0_i32_0 : i32, i32
  }
  func.func @transform_13(%arg0: i32) -> (i32, i32) {
    %c0_i32 = arith.constant 0 : i32
    %c0_i32_0 = arith.constant 0 : i32
    %c0_i32_1 = arith.constant 0 : i32
    return %c0_i32, %c0_i32_0 : i32, i32
  }
  func.func @transform_14(%arg0: i32) -> (i32, i32) {
    %c0_i32 = arith.constant 0 : i32
    %c0_i32_0 = arith.constant 0 : i32
    return %arg0, %c0_i32 : i32, i32
  }
}

</mosaic_0001>

<bundles_post_ra>
// kernel: tpu_custom_call.1
= control target key start
LH: loop header
LB: loop body
LE: loop exit
PB: predicated region body
PF: predicated region fallthrough
CT: control target
= control target key end

     0   :  { %s7160_s0 = inlined_call_operand.vmem [shape: f32[8,16,32], index: 0, kind: input, shape index: {}]   ;;  %s7161_s1 = inlined_call_operand.vmem [shape: s32[16,1], index: 1, kind: input, shape index: {}]   ;;  %s7162_s2 = inlined_call_operand.hbm [shape: f32[32,512], index: 2, kind: input, shape index: {}]   ;;  %s7163_s3 = inlined_call_operand.vmem [shape: f32[1,512], index: 3, kind: input, shape index: {}]   ;;  %s7164_s4 = inlined_call_operand.hbm [shape: f32[64,256], index: 4, kind: input, shape index: {}]   ;;  %s7165_s5 = inlined_call_operand.hbm [shape: f32[64,256], index: 5, kind: input, shape index: {}]   ;;  %s7166_s6 = inlined_call_operand.hbm [shape: f32[64,256], index: 6, kind: input, shape index: {}]   ;;  %s7167_s7 = inlined_call_operand.hbm [shape: f32[64,256], index: 7, kind: input, shape index: {}]   ;;  %s7168_s8 = inlined_call_operand.vmem [shape: f32[128,2], index: 8, kind: input, shape index: {}]   ;;  %s7169_s9 = inlined_call_operand.vmem [shape: f32[128,512], index: 9, kind: input, shape index: {}]   ;;  %s7170_s10 = inlined_call_operand.hbm [shape: f32[128,512], index: 10, kind: input, shape index: {}]   ;;  %s7171_s11 = inlined_call_operand.vmem [shape: f32[1,512], index: 11, kind: input, shape index: {}]   ;;  %s7172_s12 = inlined_call_operand.vmem [shape: f32[512,3], index: 12, kind: input, shape index: {}]   ;;  %s7173_s13 = inlined_call_operand.vmem [shape: f32[1,3], index: 13, kind: input, shape index: {}]   ;;  %s7174_s14 = inlined_call_operand.vmem [shape: f32[16,3], index: 14, kind: output, shape index: {}]  }
   0x1   :  { %7186 = sst [smem:[#allocation21_spill]] %s7164_s4 }
   0x2   :  { %7187 = sst [smem:[#allocation22_spill]] %s7166_s6 }
   0x3   :  { %7188 = sst [smem:[#allocation23_spill]] %s7168_s8 }
   0x4   :  { %7189 = sst [smem:[#allocation24_spill]] %s7169_s9 }
   0x5   :  { %7190 = sst [smem:[#allocation25_spill]] %s7171_s11 }
   0x6   :  { %7191 = sst [smem:[#allocation26_spill]] %s7172_s12 }
   0x7   :  { %7192 = sst [smem:[#allocation27_spill]] %s7173_s13 }
   0x8   :  { %7193 = sst [smem:[#allocation28_spill]] %s7174_s14 }
   0x9   :  { %19 = vsyncpa [#allocation6], 0 }
   0xa   :  { %20 = vsyncpa [#allocation8], 0 }
   0xb   :  { %21 = vsyncpa [#allocation11], 0 }
   0xc   :  { %22 = vsyncpa [#allocation14], 0  ;;  %s5658_s29 = smov 0   ;;  %s5660_s30 = smov 0  }
   0xd   :  { %s5662_s15 = smov 0  }
   0xe LB: > { %s5674_s16 = sadd.s32 4294967295, %s5567_s15   ;;  %s5677_s17 = sadd.s32 1, %s5567_s15   ;;  %s5567_s15 = sphi %s5662_s15, %s7221_s15   ;;  %s5563_s30 = sphi %s5660_s30, %s7224_s30   ;;  %s5559_s29 = sphi %s5658_s29, %s7223_s29  }
   0xf   : > { %7194 = sst [smem:[#allocation19_spill]] %s5677_s17  ;;  %s32_s18 = ssub.s32 %s5567_s15, %s5677_s17 }
  0x10   : > { %s35_s19 = sadd.s32 1, %s5563_s30  ;;  %p33_p0 = scmp.eq.s32.totalorder %s32_s18, 0 }
  0x11   : > { %p42_p1 = scmp.ne.s32.totalorder %s5563_s30, %s5559_s29  ;;  %p43_p2 = scmp.eq.s32.totalorder %s5567_s15, 0 }
  0x12   : > { %p4180_p3 = scmp.ge.s32.totalorder %s5567_s15, 1  ;;  %p363_p5 = scmp.lt.s32.totalorder %s5567_s15, 3 }
  0x13   : > { %s5687_s20 = scalar_select %p33_p0, %s5563_s30, %s35_s19  }
  0x14   : > { %p5689_p4 = por %p43_p2, %p42_p1  ;;  %p7177_p6 = scmp.eq.s32.totalorder %s5674_s16, 0 }
  0x15   : > { %7195 = sst [smem:[#allocation20_spill]] %s5687_s20  ;;  %p5695_p7 = pnand %p4180_p3, %p363_p5 }
  0x16   : > { %s7196_s21 = scalar_select %p5689_p4, 1, 0 }
  0x17   : > { %s7197_s22 = scalar_select %p5695_p7, 1, 0 }
  0x18   : > { %s5569_s23 = smov [#allocation7]   ;;  %p5059_p8 = pneg %p5695_p7 }
  0x19   : > { %s391_s24 = sshll.u32 %s5569_s23, 4  ;;  %s5570_s26 = smov [#allocation10]   ;;  %s5701_s24 = int_to_ptr.vmem [resolvable:$true] %s391_s24 }
  0x1a   : > { %p5705_p9 = pnand %p7177_p6, %p5059_p8  ;;  %s417_s27 = sshll.u32 %s5570_s26, 4  ;;  %s5709_s27 = int_to_ptr.vmem [resolvable:$true] %s417_s27 }
  0x1b   : > { %s5571_s28 = smov [#allocation5]   ;;  %s7199_s4 = sld [smem:[#allocation21_spill]] }
  0x1c   : > { %s5711_s18 = sshll.u32 %s5571_s28, 4  ;;  %p5721_p11 = pneg %p5705_p9  ;;  %s376_s18 = int_to_ptr.vmem [resolvable:$true] %s5711_s18 }
  0x21   : > { %s5361_s23 = scalar_lea.hbm %s7199_s4, 2048 }
  0x22   : > { %p5362_p10 = scmp.ne.s32.totalorder %s7199_s4, %s5361_s23  ;;  %p5368_p0 = scmp.lt.u32.totalorder %s5361_s23, %s7199_s4 }
  0x24   : > { %p5364_p12 = pnand %p5721_p11, %p5362_p10 }
  0x26   : > { %p5365_p13 = pneg %p5364_p12 }
  0x28   : > { %p5370_p1 = pnand %p5368_p0, %p5365_p13 }
  0x2a   : > { %5373 = shalt.err (!%p5370_p1)
}
  0x2b   : > { %s5374_s14 = scalar_lea.vmem %s5701_s24, 2048  ;;  %p5382_p8 = scmp.lt.s32.totalorder %s5701_s24, %s5701_s24 }
  0x2c   : > { %p5375_p2 = scmp.ne.s32.totalorder %s5701_s24, %s5374_s14  ;;  %p5383_p6 = scmp.lt.s32.totalorder %s5374_s14, %s5374_s14 }
  0x2e   : > { %p5377_p3 = pnand %p5375_p2, %p5721_p11  ;;  %p5384_p10 = por %p5383_p6, %p5382_p8 }
  0x30   : > { %p5378_p5 = pneg %p5377_p3 }
  0x32   : > { %p5385_p12 = pnand %p5384_p10, %p5378_p5 }
  0x34   : > { %5388 = shalt.err (!%p5385_p12)
}
  0x35   : > { %s7182_s17 = smov 256   ;;  %s7184_s20 = smov 16  }
  0x36   : > { %5065 = dma.hbm_to_vmem [thread:$0]  (!%p5705_p9), %s7199_s4, 2048, %s5701_s24, [#allocation8], %s7182_s17, %s7182_s17, %s7184_s20  }
  0x37   : > { %s7201_s6 = sld [smem:[#allocation22_spill]] }
  0x3d   : > { %s5389_s14 = scalar_lea.hbm %s7201_s6, 2048 }
  0x3e   : > { %p5390_p6 = scmp.ne.s32.totalorder %s7201_s6, %s5389_s14  ;;  %p5396_p1 = scmp.lt.u32.totalorder %s5389_s14, %s7201_s6 }
  0x40   : > { %p5392_p13 = pnand %p5390_p6, %p5721_p11 }
  0x42   : > { %p5393_p0 = pneg %p5392_p13 }
  0x44   : > { %p5398_p2 = pnand %p5396_p1, %p5393_p0 }
  0x46   : > { %5401 = shalt.err (!%p5398_p2)
}
  0x47   : > { %s5402_s24 = scalar_lea.vmem %s5709_s27, 2048  ;;  %p5410_p10 = scmp.lt.s32.totalorder %s5709_s27, %s5709_s27 }
  0x48   : > { %p5403_p3 = scmp.ne.s32.totalorder %s5709_s27, %s5402_s24  ;;  %p5411_p12 = scmp.lt.s32.totalorder %s5402_s24, %s5402_s24 }
  0x4a   : > { %p5405_p5 = pnand %p5403_p3, %p5721_p11  ;;  %p5412_p6 = por %p5411_p12, %p5410_p10 }
  0x4c   : > { %p5406_p8 = pneg %p5405_p5 }
  0x4e   : > { %p5413_p13 = pnand %p5412_p6, %p5406_p8 }
  0x50   : > { %5416 = shalt.err (!%p5413_p13)
}
  0x51   : > { %5071 = dma.hbm_to_vmem [thread:$0]  (!%p5705_p9), %s7201_s6, 2048, %s5709_s27, [#allocation11], %s7182_s17, %s7182_s17, %s7184_s20  }
  0x52   : > { %s5417_s19 = scalar_lea.hbm %s7162_s2, 2048 }
  0x53   : > { %p5418_p0 = scmp.ne.s32.totalorder %s7162_s2, %s5417_s19  ;;  %p5424_p3 = scmp.lt.u32.totalorder %s5417_s19, %s7162_s2 }
  0x55   : > { %p5420_p1 = pnand %p5418_p0, %p5721_p11 }
  0x57   : > { %p5421_p2 = pneg %p5420_p1 }
  0x59   : > { %p5426_p5 = pnand %p5424_p3, %p5421_p2 }
  0x5b   : > { %5429 = shalt.err (!%p5426_p5)
}
  0x5c   : > { %s5430_s24 = scalar_lea.vmem %s376_s18, 2048  ;;  %p5438_p6 = scmp.lt.s32.totalorder %s376_s18, %s376_s18 }
  0x5d   : > { %p5431_p8 = scmp.ne.s32.totalorder %s376_s18, %s5430_s24  ;;  %p5439_p13 = scmp.lt.s32.totalorder %s5430_s24, %s5430_s24 }
  0x5f   : > { %p5433_p10 = pnand %p5431_p8, %p5721_p11  ;;  %p5440_p7 = por %p5439_p13, %p5438_p6 }
  0x61   : > { %p5434_p12 = pneg %p5433_p10 }
  0x63   : > { %p5441_p4 = pnand %p5440_p7, %p5434_p12 }
  0x65   : > { %5444 = shalt.err (!%p5441_p4)
}
  0x66   : > { %s5574_s27 = smov 512   ;;  %s5575_s8 = smov 32  }
  0x67   : > { %5062 = dma.hbm_to_vmem [thread:$0]  (!%p5705_p9), %s7162_s2, 2048, %s376_s18, [#allocation6], %s5574_s27, %s5574_s27, %s5575_s8  }
  0x68   : > { %s5576_s12 = smov [#allocation9]   ;;  %s5577_s23 = smov [#allocation12]  }
  0x69   : > { %s404_s19 = sshll.u32 %s5576_s12, 4  ;;  %s430_s26 = sshll.u32 %s5577_s23, 4  ;;  %s405_s19 = int_to_ptr.vmem [resolvable:$true] %s404_s19  ;;  %s431_s26 = int_to_ptr.vmem [resolvable:$true] %s430_s26 }
  0x6a   : > { %s5445_s24 = scalar_lea.hbm %s7165_s5, 2048 }
  0x6b   : > { %p5446_p4 = scmp.ne.s32.totalorder %s7165_s5, %s5445_s24  ;;  %p5452_p1 = scmp.lt.u32.totalorder %s5445_s24, %s7165_s5 }
  0x6d   : > { %p5448_p7 = pnand %p5446_p4, %p5721_p11 }
  0x6f   : > { %p5449_p0 = pneg %p5448_p7 }
  0x71   : > { %p5454_p2 = pnand %p5452_p1, %p5449_p0 }
  0x73   : > { %5457 = shalt.err (!%p5454_p2)
}
  0x74   : > { %s5458_s18 = scalar_lea.vmem %s405_s19, 2048  ;;  %p5466_p10 = scmp.lt.s32.totalorder %s405_s19, %s405_s19 }
  0x75   : > { %p5459_p3 = scmp.ne.s32.totalorder %s405_s19, %s5458_s18  ;;  %p5467_p12 = scmp.lt.s32.totalorder %s5458_s18, %s5458_s18 }
  0x77   : > { %p5461_p5 = pnand %p5459_p3, %p5721_p11  ;;  %p5468_p6 = por %p5467_p12, %p5466_p10 }
  0x79   : > { %p5462_p8 = pneg %p5461_p5 }
  0x7b   : > { %p5469_p13 = pnand %p5468_p6, %p5462_p8 }
  0x7d   : > { %5472 = shalt.err (!%p5469_p13)
}
  0x7e   : > { %s7202_s17 = smov 16   ;;  %s7203_s20 = smov 256  }
  0x7f   : > { %5068 = dma.hbm_to_vmem [thread:$0]  (!%p5705_p9), %s7165_s5, 2048, %s405_s19, [#allocation8], %s7203_s20, %s7203_s20, %s7202_s17  }
  0x80   : > { %s5473_s12 = scalar_lea.hbm %s7167_s7, 2048 }
  0x81   : > { %p5474_p4 = scmp.ne.s32.totalorder %s7167_s7, %s5473_s12  ;;  %p5480_p1 = scmp.lt.u32.totalorder %s5473_s12, %s7167_s7 }
  0x83   : > { %p5476_p7 = pnand %p5474_p4, %p5721_p11 }
  0x85   : > { %p5477_p0 = pneg %p5476_p7 }
  0x87   : > { %p5482_p2 = pnand %p5480_p1, %p5477_p0 }
  0x89   : > { %5485 = shalt.err (!%p5482_p2)
}
  0x8a   : > { %s5486_s18 = scalar_lea.vmem %s431_s26, 2048  ;;  %p5494_p10 = scmp.lt.s32.totalorder %s431_s26, %s431_s26 }
  0x8b   : > { %p5487_p3 = scmp.ne.s32.totalorder %s431_s26, %s5486_s18  ;;  %p5495_p12 = scmp.lt.s32.totalorder %s5486_s18, %s5486_s18 }
  0x8d   : > { %p5489_p5 = pnand %p5487_p3, %p5721_p11  ;;  %p5496_p6 = por %p5495_p12, %p5494_p10 }
  0x8f   : > { %p5490_p8 = pneg %p5489_p5 }
  0x91   : > { %p5497_p13 = pnand %p5496_p6, %p5490_p8 }
  0x93   : > { %5500 = shalt.err (!%p5497_p13)
}
  0x94   : > { %5074 = dma.hbm_to_vmem [thread:$0]  (!%p5705_p9), %s7167_s7, 2048, %s431_s26, [#allocation11], %s7203_s20, %s7203_s20, %s7202_s17  }
  0x95   : > { %s5578_s6 = smov [#allocation13]   ;;  %s5501_s23 = scalar_lea.hbm %s7170_s10, 8192 }
  0x96   : > { %s449_s9 = sshll.u32 %s5578_s6, 4  ;;  %p5502_p4 = scmp.ne.s32.totalorder %s7170_s10, %s5501_s23  ;;  %s450_s9 = int_to_ptr.vmem [resolvable:$true] %s449_s9 }
  0x97   : > { %p5508_p1 = scmp.lt.u32.totalorder %s5501_s23, %s7170_s10 }
  0x98   : > { %p5504_p7 = pnand %p5502_p4, %p5721_p11 }
  0x9a   : > { %p5505_p0 = pneg %p5504_p7 }
  0x9c   : > { %p5510_p2 = pnand %p5508_p1, %p5505_p0 }
  0x9e   : > { %5513 = shalt.err (!%p5510_p2)
}
  0x9f   : > { %s5514_s26 = scalar_lea.vmem %s450_s9, 8192  ;;  %p5522_p10 = scmp.lt.s32.totalorder %s450_s9, %s450_s9 }
  0xa0   : > { %p5515_p3 = scmp.ne.s32.totalorder %s450_s9, %s5514_s26  ;;  %p5523_p12 = scmp.lt.s32.totalorder %s5514_s26, %s5514_s26 }
  0xa2   : > { %p5517_p5 = pnand %p5515_p3, %p5721_p11  ;;  %p5524_p6 = por %p5523_p12, %p5522_p10 }
  0xa4   : > { %p5518_p8 = pneg %p5517_p5 }
  0xa6   : > { %p5525_p13 = pnand %p5524_p6, %p5518_p8 }
  0xa8   : > { %5528 = shalt.err (!%p5525_p13)
}
  0xa9   : > { %5077 = dma.hbm_to_vmem [thread:$0]  (!%p5705_p9), %s7170_s10, 8192, %s450_s9, [#allocation14], %s5574_s27, %s5574_s27, %s5575_s8  }
  0xaa   : > { %p4187_p4 = scmp.ge.s32.totalorder %s5567_s15, 2 }
  0xab   : > { %p7204_p11 = scmp.ne.s32.totalorder (!%p4187_p4), %s7196_s21, 0 }
  0xac   : > { %468 = sbr.rel (%p4187_p4) target bundleno = 187 (0xbb), region = 64 }
  0xb3   : > { %471 = sbr.rel (!%p7204_p11) target bundleno = 187 (0xbb), region = 68  ;;  %s473_s13 = sand.u32 (%p7204_p11), 1, %s5563_s30  }
  0xb4   : > { %s4189_s19 = sshll.u32 (%p7204_p11), %s5567_s15, 3  ;;  %s4188_s4 = sshll.u32 (%p7204_p11), %s473_s13, 6 }
  0xb5   : > { %s477_s11 = scalar_lea.vmem (%p7204_p11), %s7160_s0, %s4189_s19  ;;  %s475_s12 = scalar_lea.vmem (%p7204_p11), [#allocation4], %s4188_s4 }
  0xb6   : > { %v519_v0 = vld [vmem:[%s477_s11] sm:$0xff] (%p7204_p11)  ;;  %v521_v1 = vld [vmem:[%s477_s11 + $0x10] sm:$0xff] (%p7204_p11) }
  0xb7   : > { %v523_v2 = vld [vmem:[%s477_s11 + $0x20] sm:$0xff] (%p7204_p11)  ;;  %520 = vst [vmem:[%s475_s12] sm:$0xff] (%p7204_p11), %v519_v0  ;;  %522 = vst [vmem:[%s475_s12 + $0x8] sm:$0xff] (%p7204_p11), %v521_v1  ;;  %v525_v3 = vld [vmem:[%s477_s11 + $0x30] sm:$0xff] (%p7204_p11) }
  0xb8   : > { %524 = vst [vmem:[%s475_s12 + $0x10] sm:$0xff] (%p7204_p11), %v523_v2  ;;  %v527_v4 = vld [vmem:[%s477_s11 + $0x40] sm:$0xff] (%p7204_p11)  ;;  %v529_v5 = vld [vmem:[%s477_s11 + $0x50] sm:$0xff] (%p7204_p11)  ;;  %526 = vst [vmem:[%s475_s12 + $0x18] sm:$0xff] (%p7204_p11), %v525_v3 }
  0xb9   : > { %528 = vst [vmem:[%s475_s12 + $0x20] sm:$0xff] (%p7204_p11), %v527_v4  ;;  %530 = vst [vmem:[%s475_s12 + $0x28] sm:$0xff] (%p7204_p11), %v529_v5  ;;  %v531_v6 = vld [vmem:[%s477_s11 + $0x60] sm:$0xff] (%p7204_p11)  ;;  %v533_v7 = vld [vmem:[%s477_s11 + $0x70] sm:$0xff] (%p7204_p11) }
  0xba   : > { %532 = vst [vmem:[%s475_s12 + $0x30] sm:$0xff] %v531_v6  ;;  %534 = vst [vmem:[%s475_s12 + $0x38] sm:$0xff] %v533_v7 }
  0xbb PF: > { %p7205_p9 = scmp.ne.s32.totalorder %s7197_s22, 0 }
  0xbc   : > { %s553_s15 = sand.u32 (!%p7205_p9), 1, %s5559_s29   ;;  %p7206_p7 = scmp.eq.s32.totalorder (!%p7205_p9), %s5674_s16, 0 }
  0xbd   : > { %550 = sbr.rel (%p7205_p9) target bundleno = 6151 (0x1807), region = 110  ;;  %s4191_s21 = sshll.u32 (!%p7205_p9), %s553_s15, 6 }
  0xbe   : > { %s5867_s27 = scalar_lea.vmem (!%p7205_p9), [#allocation4], %s4191_s21 }
  0xc4   : > { %5542 = dma.done.wait (%p7206_p7), [#allocation6], 2048   ;;  %p7207_p0 = pmov %p7206_p7 }
  0xc6   : > { %5544 = vsyncadd (%p7207_p0), [#allocation6], 4294965248  ;;  %p7208_p1 = pmov %p7207_p0 }
  0xc7   : > { %p7209_p2 = pmov %p7207_p0 }
  0xc8   : > { %5546 = dma.done.wait (%p7208_p1), [#allocation8], 4096  }
  0xc9   : > { %5548 = vsyncadd (%p7209_p2), [#allocation8], 4294963200  ;;  %p7210_p3 = pmov %p7207_p0 }
  0xca   : > { %p7211_p5 = pmov %p7207_p0 }
  0xcb   : > { %5550 = dma.done.wait (%p7210_p3), [#allocation11], 4096  }
  0xcc   : > { %5552 = vsyncadd (%p7211_p5), [#allocation11], 4294963200  ;;  %p7212_p8 = pmov %p7207_p0 }
  0xcd   : > { %p7213_p10 = pmov %p7207_p0 }
  0xce   : > { %5554 = dma.done.wait (%p7212_p8), [#allocation14], 8192  }
  0xcf   : > { %5556 = vsyncadd (%p7213_p10), [#allocation14], 4294959104  ;;  %v5579_v8 = vmov 0.0   ;;  %v651_v9 = vld [vmem:[#allocation5 + $0x8] sm:$0xff]  ;;  %v650_v11 = vld [vmem:[#allocation5] sm:$0xff]  ;;  %vm688_vm0 = vcmask 261120  }
  0xd0   : > { %813 = vmatprep.mubr.f32.mxu1 %v5579_v8  ;;  %777 = vmatprep.mubr.f32.mxu0 %v5579_v8  ;;  %v655_v10 = vld [vmem:[#allocation5 + $0x28] sm:$0xff]  ;;  %v654_v13 = vld [vmem:[#allocation5 + $0x20] sm:$0xff]  ;;  %v653_v20 = vld [vmem:[#allocation5 + $0x18] sm:$0xff]  ;;  %p625_p12 = scmp.lt.s32.totalorder %s5674_s16, 1  ;;  %s5581_s14 = smov 64   ;;  %vm971_vm3 = vcmask 523264  }
  0xd1   : > { %v4419_v12 = vpack.c.bf16 %v655_v10, %v651_v9  ;;  %v659_v14 = vld [vmem:[#allocation5 + $0x48] sm:$0xff]  ;;  %v4421_v16 = vpack.c.bf16 %v654_v13, %v650_v11  ;;  %v658_v18 = vld [vmem:[#allocation5 + $0x40] sm:$0xff]  ;;  %v657_v21 = vld [vmem:[#allocation5 + $0x38] sm:$0xff]  ;;  %s7214_s26 = sld [smem:[#allocation23_spill]]  ;;  %s7215_s29 = sld [smem:[#allocation24_spill]] }
  0xd2   : > { %v663_v15 = vld [vmem:[#allocation5 + $0x68] sm:$0xff]  ;;  %v662_v19 = vld [vmem:[#allocation5 + $0x60] sm:$0xff]  ;;  %v4427_v23 = vpack.c.bf16 %v657_v21, %v653_v20  ;;  %v652_v24 = vld [vmem:[#allocation5 + $0x10] sm:$0xff]  ;;  %s7226_s16 = smov (!%p625_p12, %s5674_s16), 1  ;;  %s7217_s12 = sld [smem:[#allocation26_spill]] }
  0xd3   : > { %v4423_v17 = vpack.c.bf16 %v663_v15, %v659_v14  ;;  %4947 = vmatprep.subr.bf16.mxu1 %v4419_v12  ;;  %4420 = vmatprep.subr.bf16.mxu0 %v4419_v12  ;;  %v4425_v22 = vpack.c.bf16 %v662_v19, %v658_v18  ;;  %v656_v25 = vld [vmem:[#allocation5 + $0x30] sm:$0xff]  ;;  %v661_v26 = vld [vmem:[#allocation5 + $0x58] sm:$0xff]  ;;  %v642_v33 = vld [vmem:[%s5867_s27] sm:$0xff]  ;;  %s4198_s8 = sshll.u32 %s7226_s16, 3  ;;  %s7219_s23 = sld [smem:[#allocation27_spill]] }
  0xd4   : > { %4949 = vmatpush1.bf16.msra.mxu1 %v4421_v16  ;;  %4422 = vmatpush1.bf16.msra.mxu0 %v4421_v16  ;;  %v665_v27 = vld [vmem:[#allocation5 + $0x78] sm:$0xff]  ;;  %v5888_v28 = vld [vmem:[%s5867_s27 + $0x30] sm:$0xff]  ;;  %v4429_v29 = vpack.c.bf16 %v656_v25, %v652_v24  ;;  %v956_v34 = vld [vmem:[#allocation9 + $0x8] sm:$0xff]  ;;  %s628_s28 = scalar_lea.vmem %s7161_s1, %s4198_s8  ;;  %s7220_s24 = sld [smem:[#allocation28_spill]] }
  0xd5   : > { %4948 = vmatprep.subr.bf16.mxu1 %v4423_v17  ;;  %4424 = vmatprep.subr.bf16.mxu0 %v4423_v17  ;;  %v4431_v30 = vpack.c.bf16 %v665_v27, %v661_v26  ;;  %v660_v31 = vld [vmem:[#allocation5 + $0x50] sm:$0xff]  ;;  %v958_v35 = vld [vmem:[#allocation9 + $0x18] sm:$0xff]  ;;  %v955_v38 = vld [vmem:[#allocation9] sm:$0xff]  ;;  %v5580_v26 = vmov 0  }
  0xd6   : > { %v664_v32 = vld [vmem:[#allocation5 + $0x70] sm:$0xff]  ;;  %v5894_v36 = vld [vmem:[%s5867_s27 + $0x38] sm:$0xff]  ;;  %v940_v39 = vld [vmem:[#allocation7 + $0x8] sm:$0xff]  ;;  %v5898_v41 = vpack.c.bf16 %v958_v35, %v956_v34  ;;  %5128 = vset.pattern.permute.xlu0 %v5580_v26  ;;  %5129 = vset.pattern.permute.xlu1 %v5580_v26 }
  0xd7   : > { %v4433_v37 = vpack.c.bf16 %v664_v32, %v660_v31  ;;  %v942_v40 = vld [vmem:[#allocation7 + $0x18] sm:$0xff]  ;;  %v957_v42 = vld [vmem:[#allocation9 + $0x10] sm:$0xff]  ;;  %v643_v43 = vld [vmem:[%s5867_s27 + $0x8] sm:$0xff]  ;;  %s7216_s22 = smov %s7215_s29 }
  0xd8   : > { %4950 = vmatpush1.bf16.msra.mxu1 %v4425_v22  ;;  %4426 = vmatpush1.bf16.msra.mxu0 %v4425_v22  ;;  %v960_v44 = vld [vmem:[#allocation9 + $0x28] sm:$0xff]  ;;  %v962_v45 = vld [vmem:[#allocation9 + $0x38] sm:$0xff]  ;;  %v5902_v46 = vpack.c.bf16 %v942_v40, %v940_v39  ;;  %v939_v47 = vld [vmem:[#allocation7] sm:$0xff]  ;;  %v5908_v51 = vpack.c.bf16 %v957_v42, %v955_v38 }
  0xd9   : > { %4428 = vmatprep.subr.bf16.mxu1 %v4427_v23  ;;  %v941_v48 = vld [vmem:[#allocation7 + $0x10] sm:$0xff]  ;;  %v944_v49 = vld [vmem:[#allocation7 + $0x28] sm:$0xff]  ;;  %v946_v50 = vld [vmem:[#allocation7 + $0x38] sm:$0xff]  ;;  %v5912_v53 = vpack.c.bf16 %v962_v45, %v960_v44 }
  0xda   : > { %v644_v52 = vld [vmem:[%s5867_s27 + $0x10] sm:$0xff]  ;;  %v959_v54 = vld [vmem:[#allocation9 + $0x20] sm:$0xff]  ;;  %v964_v56 = vld [vmem:[#allocation9 + $0x48] sm:$0xff]  ;;  %v5915_v57 = vpack.c.bf16 %v941_v48, %v939_v47  ;;  %4436 = vmatprep.subr.bf16.mxu0 %v5902_v46  ;;  %v5918_v59 = vpack.c.bf16 %v946_v50, %v944_v49  ;;  %s632_s18 = scalar_lea.vmem %s7220_s24, %s4198_s8 }
  0xdb   : > { %4206 = vmatmul.mubr.msk.f32.vlgmr.msra.gmra.mrb[0].mxu1 %vm688_vm0, %v5888_v28  ;;  %4200 = vmatmul.mubr.msk.f32.vlgmr.msra.gmra.mrb[0].mxu0 %vm688_vm0, %v642_v33  ;;  %v961_v55 = vld [vmem:[#allocation9 + $0x30] sm:$0xff]  ;;  %v966_v58 = vld [vmem:[#allocation9 + $0x58] sm:$0xff]  ;;  %v943_v60 = vld [vmem:[#allocation7 + $0x20] sm:$0xff] }
  0xdc   : > { %4430 = vmatpush1.bf16.msra.mxu1 %v4429_v29  ;;  %819 = vmatprep.mubr.f32.mxu1 %v5579_v8  ;;  %v945_v61 = vld [vmem:[#allocation7 + $0x30] sm:$0xff]  ;;  %v948_v62 = vld [vmem:[#allocation7 + $0x48] sm:$0xff]  ;;  %v950_v63 = vld [vmem:[#allocation7 + $0x58] sm:$0xff]  ;;  %v5924_v0 = vpack.c.bf16 %v961_v55, %v959_v54  ;;  %v5928_v2 = vpack.c.bf16 %v966_v58, %v964_v56 }
  0xdd   : > { %4432 = vmatprep.subr.bf16.mxu1 %v4431_v30  ;;  %783 = vmatprep.mubr.f32.mxu0 %v5579_v8  ;;  %v645_v1 = vld [vmem:[%s5867_s27 + $0x18] sm:$0xff]  ;;  %v963_v3 = vld [vmem:[#allocation9 + $0x40] sm:$0xff]  ;;  %v965_v4 = vld [vmem:[#allocation9 + $0x50] sm:$0xff]  ;;  %v5931_v6 = vpack.c.bf16 %v945_v61, %v943_v60  ;;  %v5935_v9 = vpack.c.bf16 %v950_v63, %v948_v62 }
  0xde   : > { %4438 = vmatpush1.bf16.msra.mxu0 %v5915_v57  ;;  %v968_v5 = vld [vmem:[#allocation9 + $0x68] sm:$0xff]  ;;  %v970_v7 = vld [vmem:[#allocation9 + $0x78] sm:$0xff]  ;;  %v947_v10 = vld [vmem:[#allocation7 + $0x40] sm:$0xff]  ;;  %v5941_v14 = vpack.c.bf16 %v965_v4, %v963_v3 }
  0xdf   : > { %4207 = vmatmul.mubr.msk.f32.gmra.mrb[2].mxu1 %vm688_vm0, %v5894_v36  ;;  %4201 = vmatmul.mubr.msk.f32.gmra.mrb[2].mxu0 %vm688_vm0, %v643_v43  ;;  %v949_v11 = vld [vmem:[#allocation7 + $0x50] sm:$0xff]  ;;  %v952_v12 = vld [vmem:[#allocation7 + $0x68] sm:$0xff]  ;;  %v954_v13 = vld [vmem:[#allocation7 + $0x78] sm:$0xff]  ;;  %v5944_v15 = vpack.c.bf16 %v970_v7, %v968_v5 }
  0xe0   : > { %4434 = vmatpush1.bf16.msra.mxu1 %v4433_v37  ;;  %890 = vmatprep.mubr.f32.mxu1 %v5579_v8  ;;  %v967_v16 = vld [vmem:[#allocation9 + $0x60] sm:$0xff]  ;;  %v969_v17 = vld [vmem:[#allocation9 + $0x70] sm:$0xff]  ;;  %v5947_v18 = vpack.c.bf16 %v949_v11, %v947_v10  ;;  %v5952_v20 = vpack.c.bf16 %v954_v13, %v952_v12  ;;  %v647_v25 = vld [vmem:[%s5867_s27 + $0x28] sm:$0xff] }
  0xe1   : > { %4564 = vmatprep.subr.bf16.mxu1 %v5898_v41  ;;  %789 = vmatprep.mubr.f32.mxu0 %v5579_v8  ;;  %v646_v19 = vld [vmem:[%s5867_s27 + $0x20] sm:$0xff]  ;;  %v953_v22 = vld [vmem:[#allocation7 + $0x70] sm:$0xff]  ;;  %v5958_v23 = vpack.c.bf16 %v969_v17, %v967_v16  ;;  %s7218_s27 = sld [smem:[#allocation25_spill]] }
  0xe2   : > { %4440 = vmatprep.subr.bf16.mxu0 %v5918_v59  ;;  %v951_v21 = vld [vmem:[#allocation7 + $0x60] sm:$0xff] }
  0xe3   : > { %4208 = vmatmul.mubr.msk.f32.vlgmr.msra.gmra.mrb[4].mxu1 %vm688_vm0, %v642_v33  ;;  %4202 = vmatmul.mubr.msk.f32.gmra.mrb[4].mxu0 %vm688_vm0, %v644_v52  ;;  %v5962_v24 = vpack.c.bf16 %v953_v22, %v951_v21  ;;  %v668_v33 = vlaneseq  ;;  %v666_v37 = vld [vmem:[%s7163_s3] sm:$0xf] }
  0xe4   : > { %4566 = vmatpush1.bf16.msra.mxu1 %v5908_v51  ;;  %896 = vmatprep.mubr.f32.mxu1 %v5579_v8  ;;  %v6042_v47 = vld [vmem:[%s628_s28] sm:$0xff] }
  0xe5   : > { %4568 = vmatprep.subr.bf16.mxu1 %v5912_v53  ;;  %795 = vmatprep.mubr.f32.mxu0 %v5579_v8  ;;  %v6015_v34 = vshrl.u32 %v668_v33, 7  ;;  %vm641_vm1 = vcmp.gt.s32.totalorder %v6042_v47, 7  ;;  %vm634_vm2 = vcmp.gt.s32.totalorder %v6042_v47, 0  ;;  %vm640_vm6 = vcmp.gt.s32.totalorder %v6042_v47, 6 }
  0xe6   : > { %4442 = vmatpush1.bf16.msra.mxu0 %v5931_v6  ;;  %v1882_v49 = vsel %vm641_vm1, 1, %v5580_v26  ;;  %vm635_vm7 = vcmp.gt.s32.totalorder %v6042_v47, 1  ;;  %vm639_vm10 = vcmp.gt.s32.totalorder %v6042_v47, 5  ;;  %vm636_vm11 = vcmp.gt.s32.totalorder %v6042_v47, 2 }
  0xe7   : > { %4209 = vmatmul.mubr.msk.f32.gmra.mrb[6].mxu1 %vm688_vm0, %v643_v43  ;;  %4203 = vmatmul.mubr.msk.f32.gmra.mrb[6].mxu0 %vm688_vm0, %v645_v1  ;;  %v682_v35 = vsub.s32 3, %v6015_v34  ;;  %v678_v50 = vsub.s32 2, %v6015_v34  ;;  %v670_v54 = vsub.s32 0, %v6015_v34  ;;  %vm638_vm14 = vcmp.gt.s32.totalorder %v6042_v47, 4 }
  0xe8   : > { %902 = vmatprep.mubr.f32.mxu1 %v5579_v8  ;;  %4570 = vmatpush1.bf16.msra.mxu1 %v5924_v0  ;;  %vm637_vm15 = vcmp.gt.s32.totalorder %v6042_v47, 3 }
  0xe9   : > { %4572 = vmatprep.subr.bf16.mxu1 %v5928_v2  ;;  %801 = vmatprep.mubr.f32.mxu0 %v5579_v8  ;;  %v6024_v38 = vrot.slane %v666_v37, %v682_v35  ;;  %v6057_v56 = vrot.slane %v666_v37, %v670_v54 }
  0xea   : > { %4444 = vmatprep.subr.bf16.mxu0 %v5935_v9 }
  0xeb   : > { %4210 = vmatmul.mubr.msk.f32.gmra.mrb[8].mxu1 %vm688_vm0, %v644_v52  ;;  %4204 = vmatmul.mubr.msk.f32.gmra.mrb[8].mxu0 %vm688_vm0, %v646_v19  ;;  %v6051_v52 = vrot.slane %v666_v37, %v678_v50 }
  0xec   : > { %908 = vmatprep.mubr.f32.mxu1 %v5579_v8  ;;  %4574 = vmatpush1.bf16.msra.mxu1 %v5941_v14 }
  0xed   : > { %4576 = vmatprep.subr.bf16.mxu1 %v5944_v15  ;;  %4446 = vmatpush1.bf16.msra.mxu0 %v5947_v18 }
  0xee   : > { %807 = vmatprep.mubr.f32.mxu0 %v5579_v8  ;;  %4448 = vmatprep.subr.bf16.mxu0 %v5952_v20 }
  0xef   : > { %4211 = vmatmul.mubr.msk.f32.gmra.mrb[10].mxu1 %vm688_vm0, %v645_v1  ;;  %4205 = vmatmul.mubr.msk.f32.gmra.mrb[10].mxu0 %vm688_vm0, %v647_v25 }
  0xf0   : > { %914 = vmatprep.mubr.f32.mxu1 %v5579_v8  ;;  %4578 = vmatpush1.bf16.msra.mxu1 %v5958_v23 }
  0xf1   : > { %4450 = vmatpush1.bf16.msra.mxu0 %v5962_v24  ;;  %1039 = vmatprep.mubr.f32.mxu0 %v5579_v8 }
  0xf2   : > { %4580 = vmatprep.subr.bf16.mxu1 %v5898_v41  ;;  %4452 = vmatprep.subr.bf16.mxu0 %v5902_v46 }
  0xf3   : > { %4212 = vmatmul.mubr.msk.f32.gmra.mrb[12].mxu1 %vm688_vm0, %v646_v19 }
  0xf4   : > { %920 = vmatprep.mubr.f32.mxu1 %v5579_v8  ;;  %1040 = vmatmul.mubr.f32.vlgmr.msra.gmra.mrb[0].mxu0 %v5579_v8 }
  0xf5   : > { %4454 = vmatpush1.bf16.msra.mxu0 %v5915_v57  ;;  %1153 = vmatprep.mubr.f32.mxu0 %v5579_v8 }
  0xf6   : > { %4456 = vmatprep.subr.bf16.mxu0 %v5918_v59 }
  0xf7   : > { %4213 = vmatmul.mubr.msk.f32.gmra.mrb[14].mxu1 %vm688_vm0, %v647_v25 }
  0xf8   : > { %926 = vmatprep.mubr.f32.mxu1 %v5579_v8 }
  0xf9   : > { %4458 = vmatpush1.bf16.msra.mxu0 %v5931_v6 }
  0xfa   : > { %4460 = vmatprep.subr.bf16.mxu0 %v5935_v9 }
  0xfb   : > { %4214 = vmatmul.mubr.msk.f32.gmra.mrb[16].mxu1 %vm688_vm0, %v5888_v28 }
  0xfc   : > { %932 = vmatprep.mubr.f32.mxu1 %v5579_v8 }
  0xfd   : > { %4462 = vmatpush1.bf16.msra.mxu0 %v5947_v18 }
  0xfe   : > { %4464 = vmatprep.subr.bf16.mxu0 %v5952_v20 }
  0xff   : > { %4215 = vmatmul.mubr.msk.f32.gmra.mrb[18].mxu1 %vm688_vm0, %v5894_v36  ;;  %v674_v36 = vsub.s32 1, %v6015_v34  ;;  %v4278_v34 = vld [vmem:[%s7219_s23] ss:$0 sm:$0xff] }
 0x100   : > { %1953 = vmatprep.mubr.f32.mxu1 %v5579_v8 }
 0x101   : > { %4466 = vmatpush1.bf16.msra.mxu0 %v5962_v24  ;;  %v6028_v39 = vrot.slane %v666_v37, %v674_v36 }
 0x102   : > { %4468 = vmatprep.subr.bf16.mxu0 %v5902_v46 }
 0x107   : > { %1954 = vmatmul.mubr.f32.vlgmr.msra.gmra.mrb[18].mxu1 %v5579_v8 }
 0x108   : > { %4582 = vmatpush1.bf16.msra.mxu1 %v5908_v51  ;;  %2062 = vmatprep.mubr.f32.mxu1 %v5579_v8 }
 0x109   : > { %4584 = vmatprep.subr.bf16.mxu1 %v5912_v53 }
 0x10c   : > { %4586 = vmatpush1.bf16.msra.mxu1 %v5924_v0 }
 0x10d   : > { %4588 = vmatprep.subr.bf16.mxu1 %v5928_v2 }
 0x110   : > { %4590 = vmatpush1.bf16.msra.mxu1 %v5941_v14 }
 0x111   : > { %4592 = vmatprep.subr.bf16.mxu1 %v5944_v15 }
 0x114   : > { %4594 = vmatpush1.bf16.msra.mxu1 %v5958_v23 }
 0x115   : > { %4596 = vmatprep.subr.bf16.mxu1 %v5898_v41 }
 0x1ae   : > { %v6007_v27 = vpop.f32.mrb[0].mxu1 }
 0x1af   : > { %v6009_v28 = vpop.f32.mrb[1].mxu1 }
 0x1b2   : > { %v6011_v29 = vpop.f32.mrb[2].mxu1 }
 0x1b3   : > { %v6013_v30 = vpop.f32.mrb[3].mxu1 }
 0x1c7   : > { %v1041_v31 = vpop.f32.mrb[0].mxu0 }
 0x1c8   : > { %v1043_v32 = vpop.f32.mrb[1].mxu0  ;;  %v4951_v60 = vadd.f32 %v1041_v31, %v6057_v56  ;;  %v1078_v31 = vsel %vm634_vm2, 1, %v5580_v26  ;;  %vm3230_vm2 = vcmask 15360  }
 0x1c9   : > { %v4952_v44 = vadd.f32 %v1043_v32, %v6028_v39 }
 0x1ca   : > { %v4216_v61 = vmul.f32 -1.442695, %v4951_v60 }
 0x1da   : > { %v1955_v40 = vpop.f32.mrb[18].mxu1 }
 0x1db   : > { %v1957_v42 = vpop.f32.mrb[19].mxu1  ;;  %v4985_v55 = vadd.f32 %v1955_v40, %v6051_v52  ;;  %v4217_v40 = vmul.f32 -1.442695, %v4952_v44 }
 0x1dc   : > { %v4986_v43 = vadd.f32 %v1957_v42, %v6024_v38 }
 0x1dd   : > { %v4239_v58 = vmul.f32 -1.442695, %v4985_v55 }
 0x1de   : > { %5135 = vtanh.f32 %v4986_v43  ;;  %v4240_v33 = vmul.f32 -1.442695, %v4986_v43 }
 0x1df   : > { %5137 = vtanh.f32 %v4952_v44 }
 0x1e0   : > { %5139 = vpow2.f32 %v4239_v58 }
 0x1e1   : > { %5141 = vpow2.f32 %v4216_v61 }
 0x1e8   : > { %v5136_v45 = vpop.eup %5135 }
 0x1e9   : > { %1977 = vrot.lane.b32.xlu0 %v5136_v45, %s5581_s14  ;;  %v5138_v48 = vpop.eup %5137 }
 0x1ea   : > { %v5140_v62 = vpop.eup %5139 }
 0x1eb   : > { %v1968_v63 = vadd.f32 1.0, %v5140_v62  ;;  %v5142_v1 = vpop.eup %5141 }
 0x1ec   : > { %v1054_v3 = vadd.f32 1.0, %v5142_v1 }
 0x1ed   : > { %1063 = vrot.lane.b32.xlu0 %v5138_v48, %s5581_s14  ;;  %5143 = vrcp.f32 %v1968_v63 }
 0x1ee   : > { %5145 = vrcp.f32 %v1054_v3 }
 0x1f1   : > { %1884 = vperm.xlu0 %5128, %v1882_v49  }
 0x1f7   : > { %v5144_v4 = vpop.eup %5143 }
 0x1f8   : > { %v5146_v10 = vpop.eup %5145  ;;  %v1975_v13 = vmul.f32 0.0, %v5144_v4 }
 0x1f9   : > { %v1061_v19 = vmul.f32 0.0, %v5146_v10 }
 0x25b   : > { %v1978_v5 = vpop.permute.xlu0 %1977 }
 0x25c   : > { %v1980_v7 = vmul.f32 %v5144_v4, %v1978_v5 }
 0x25e   : > { %1982 = vrot.lane.b32.xlu1 %v1980_v7, %s5581_s14 }
 0x25f   : > { %v1064_v11 = vpop.permute.xlu0 %1063 }
 0x260   : > { %v1066_v12 = vmul.f32 %v5146_v10, %v1064_v11 }
 0x262   : > { %1068 = vrot.lane.b32.xlu1 %v1066_v12, %s5581_s14 }
 0x270   : > { %v6072_v48 = vpop.permute.xlu0 %1884 }
 0x271   : > { %vm1886_vm4 = vcmp.eq.s32.totalorder %v6072_v48, 1 }
 0x2d0   : > { %v1983_v16 = vpop.permute.xlu1 %1982 }
 0x2d1   : > { %v6062_v17 = vadd.f32 %v1983_v16, %v1975_v13 }
 0x2d3   : > { %5147 = vtanh.f32 %v6062_v17 }
 0x2d4   : > { %v1069_v21 = vpop.permute.xlu1 %1068 }
 0x2d5   : > { %v6065_v22 = vadd.f32 %v1069_v21, %v1061_v19 }
 0x2d7   : > { %5149 = vtanh.f32 %v6065_v22 }
 0x2d8   : > { %5151 = vpow2.f32 %v4240_v33 }
 0x2d9   : > { %5153 = vpow2.f32 %v4217_v40 }
 0x2dd   : > { %v5148_v25 = vpop.eup %5147 }
 0x2de   : > { %1988 = vrot.lane.b32.xlu1 %v5148_v25, %s5581_s14 }
 0x2e1   : > { %v5150_v32 = vpop.eup %5149 }
 0x2e2   : > { %1074 = vrot.lane.b32.xlu0 %v5150_v32, %s5581_s14  ;;  %1080 = vperm.xlu1 %5129, %v1078_v31   ;;  %v5152_v37 = vpop.eup %5151 }
 0x2e3   : > { %v1969_v42 = vadd.f32 1.0, %v5152_v37  ;;  %v5154_v45 = vpop.eup %5153 }
 0x2e4   : > { %v1055_v60 = vadd.f32 1.0, %v5154_v45 }
 0x2e5   : > { %5155 = vrcp.f32 %v1969_v42 }
 0x2e6   : > { %5157 = vrcp.f32 %v1055_v60 }
 0x2ef   : > { %v5156_v49 = vpop.eup %5155 }
 0x2f0   : > { %v5158_v44 = vpop.eup %5157 }
 0x350   : > { %v1989_v55 = vpop.permute.xlu1 %1988 }
 0x351   : > { %v1991_v58 = vmul.f32 %v5156_v49, %v1989_v55  ;;  %v1767_v49 = vsel %vm640_vm6, 1, %v5580_v26  ;;  %v1192_v55 = vsel %vm635_vm7, 1, %v5580_v26 }
 0x353   : > { %v6077_v61 = vsel %vm1886_vm4, %v1991_v58, 0.0 }
 0x354   : > { %1994 = vst.msk [vmem:[#allocation3 + $0x38] sm:$0xff] %vm971_vm3, %v6077_v61  ;;  %4241 = vmatmul.mubr.msk.f32.vlgmr.msra.gmra.mrb[16].mxu1 %vm971_vm3, %v6077_v61  ;;  %v1075_v43 = vpop.permute.xlu0 %1074 }
 0x355   : > { %4598 = vmatpush1.bf16.msra.mxu1 %v5908_v51  ;;  %2172 = vmatprep.mubr.f32.mxu1 %v5579_v8  ;;  %v1077_v62 = vmul.f32 %v5158_v44, %v1075_v43  ;;  %v6127_v44 = vsel %vm1886_vm4, %v6062_v17, 0.0 }
 0x356   : > { %4600 = vmatprep.subr.bf16.mxu1 %v5912_v53 }
 0x359   : > { %4602 = vmatpush1.bf16.msra.mxu1 %v5924_v0 }
 0x35a   : > { %4604 = vmatprep.subr.bf16.mxu1 %v5928_v2 }
 0x35d   : > { %4606 = vmatpush1.bf16.msra.mxu1 %v5941_v14 }
 0x35e   : > { %4608 = vmatprep.subr.bf16.mxu1 %v5944_v15 }
 0x361   : > { %v6090_v63 = vpop.permute.xlu1 %1080  ;;  %4610 = vmatpush1.bf16.msra.mxu1 %v5958_v23 }
 0x362   : > { %vm1082_vm5 = vcmp.eq.s32.totalorder %v6090_v63, 1  ;;  %4612 = vmatprep.subr.bf16.mxu1 %v5898_v41 }
 0x363   : > { %v6097_v1 = vsel %vm1082_vm5, %v1077_v62, 0.0 }
 0x364   : > { %1085 = vst.msk [vmem:[#allocation2] sm:$0xff] %vm971_vm3, %v6097_v1  ;;  %4218 = vmatmul.mubr.msk.f32.vlgmr.msra.gmra.mrb[2].mxu0 %vm971_vm3, %v6097_v1 }
 0x365   : > { %4470 = vmatpush1.bf16.msra.mxu0 %v5915_v57  ;;  %1268 = vmatprep.mubr.f32.mxu0 %v5579_v8 }
 0x366   : > { %4472 = vmatprep.subr.bf16.mxu0 %v5918_v59 }
 0x369   : > { %4474 = vmatpush1.bf16.msra.mxu0 %v5931_v6 }
 0x36a   : > { %4476 = vmatprep.subr.bf16.mxu0 %v5935_v9 }
 0x36d   : > { %4478 = vmatpush1.bf16.msra.mxu0 %v5947_v18 }
 0x36e   : > { %4480 = vmatprep.subr.bf16.mxu0 %v5952_v20 }
 0x371   : > { %4482 = vmatpush1.bf16.msra.mxu0 %v5962_v24 }
 0x372   : > { %4484 = vmatprep.subr.bf16.mxu0 %v5902_v46 }
 0x427   : > { %v2064_v3 = vpop.f32.mrb[16].mxu1 }
 0x428   : > { %v2066_v4 = vpop.f32.mrb[17].mxu1  ;;  %v4983_v16 = vadd.f32 %v2064_v3, %v6051_v52 }
 0x429   : > { %v4984_v5 = vadd.f32 %v2066_v4, %v6024_v38 }
 0x42a   : > { %v4242_v19 = vmul.f32 -1.442695, %v4983_v16 }
 0x42b   : > { %5159 = vtanh.f32 %v4984_v5 }
 0x435   : > { %v5160_v7 = vpop.eup %5159 }
 0x436   : > { %2086 = vrot.lane.b32.xlu1 %v5160_v7, %s5581_s14 }
 0x437   : > { %v1155_v10 = vpop.f32.mrb[2].mxu0 }
 0x438   : > { %v1157_v11 = vpop.f32.mrb[3].mxu0  ;;  %v4953_v21 = vadd.f32 %v1155_v10, %v6057_v56  ;;  %v6137_v10 = vsel %vm1082_vm5, %v6065_v22, 0.0 }
 0x439   : > { %v4954_v12 = vadd.f32 %v1157_v11, %v6028_v39 }
 0x43a   : > { %v4219_v31 = vmul.f32 -1.442695, %v4953_v21 }
 0x43b   : > { %5161 = vtanh.f32 %v4954_v12 }
 0x43c   : > { %5163 = vpow2.f32 %v4242_v19  ;;  %v4243_v19 = vmul.f32 -1.442695, %v4984_v5 }
 0x43d   : > { %5165 = vpow2.f32 %v4219_v31 }
 0x445   : > { %v5162_v13 = vpop.eup %5161 }
 0x446   : > { %1177 = vrot.lane.b32.xlu0 %v5162_v13, %s5581_s14  ;;  %v5164_v25 = vpop.eup %5163 }
 0x447   : > { %v2077_v32 = vadd.f32 1.0, %v5164_v25  ;;  %v5166_v33 = vpop.eup %5165  ;;  %v4220_v25 = vmul.f32 -1.442695, %v4954_v12 }
 0x448   : > { %v1168_v45 = vadd.f32 1.0, %v5166_v33 }
 0x449   : > { %5167 = vrcp.f32 %v2077_v32 }
 0x44a   : > { %5169 = vrcp.f32 %v1168_v45 }
 0x453   : > { %v5168_v37 = vpop.eup %5167 }
 0x454   : > { %v5170_v58 = vpop.eup %5169  ;;  %v2084_v62 = vmul.f32 %v5168_v37, %v6127_v44 }
 0x455   : > { %v1175_v11 = vmul.f32 %v5170_v58, %v6137_v10 }
 0x4a8   : > { %v2087_v40 = vpop.permute.xlu1 %2086 }
 0x4a9   : > { %v2089_v42 = vmul.f32 %v5168_v37, %v2087_v40 }
 0x4ab   : > { %2091 = vrot.lane.b32.xlu1 %v2089_v42, %s5581_s14 }
 0x4af   : > { %1769 = vperm.xlu1 %5129, %v1767_v49  }
 0x4b3   : > { %1194 = vperm.xlu1 %5129, %v1192_v55  }
 0x4b8   : > { %v1178_v60 = vpop.permute.xlu0 %1177 }
 0x4b9   : > { %v1180_v43 = vmul.f32 %v5170_v58, %v1178_v60 }
 0x4bb   : > { %1182 = vrot.lane.b32.xlu0 %v1180_v43, %s5581_s14 }
 0x51d   : > { %v2092_v3 = vpop.permute.xlu1 %2091 }
 0x51e   : > { %v6130_v4 = vadd.f32 %v2092_v3, %v2084_v62 }
 0x520   : > { %5171 = vtanh.f32 %v6130_v4 }
 0x52a   : > { %v5172_v7 = vpop.eup %5171 }
 0x52b   : > { %2097 = vrot.lane.b32.xlu0 %v5172_v7, %s5581_s14 }
 0x52d   : > { %v1183_v13 = vpop.permute.xlu0 %1182 }
 0x52e   : > { %v6140_v17 = vadd.f32 %v1183_v13, %v1175_v11  ;;  %v6144_v22 = vpop.permute.xlu1 %1769 }
 0x52f   : > { %vm1771_vm8 = vcmp.eq.s32.totalorder %v6144_v22, 1 }
 0x530   : > { %5173 = vtanh.f32 %v6140_v17 }
 0x531   : > { %5175 = vpow2.f32 %v4243_v19 }
 0x532   : > { %5177 = vpow2.f32 %v4220_v25 }
 0x53a   : > { %v5174_v16 = vpop.eup %5173 }
 0x53b   : > { %1188 = vrot.lane.b32.xlu0 %v5174_v16, %s5581_s14  ;;  %v5176_v21 = vpop.eup %5175 }
 0x53c   : > { %v2078_v31 = vadd.f32 1.0, %v5176_v21  ;;  %v5178_v32 = vpop.eup %5177 }
 0x53d   : > { %v1169_v42 = vadd.f32 1.0, %v5178_v32 }
 0x53e   : > { %5179 = vrcp.f32 %v2078_v31 }
 0x53f   : > { %5181 = vrcp.f32 %v1169_v42 }
 0x548   : > { %v5180_v33 = vpop.eup %5179 }
 0x549   : > { %v5182_v12 = vpop.eup %5181 }
 0x59d   : > { %v2098_v37 = vpop.permute.xlu0 %2097 }
 0x59e   : > { %v2100_v40 = vmul.f32 %v5180_v33, %v2098_v37 }
 0x5a0   : > { %v6150_v45 = vsel %vm1771_vm8, %v2100_v40, %v6077_v61  ;;  %v2103_v5 = vsel %vm1771_vm8, %v2100_v40, 0.0  ;;  %v6164_v61 = vpop.permute.xlu1 %1194 }
 0x5a1   : > { %2104 = vst.msk [vmem:[#allocation3 + $0x30] sm:$0xff] %vm971_vm3, %v2103_v5  ;;  %4244 = vmatmul.mubr.msk.f32.vlgmr.msra.gmra.mrb[14].mxu1 %vm971_vm3, %v6150_v45  ;;  %vm1196_vm9 = vcmp.eq.s32.totalorder %v6164_v61, 1 }
 0x5a2   : > { %4614 = vmatpush1.bf16.msra.mxu1 %v5908_v51  ;;  %2282 = vmatprep.mubr.f32.mxu1 %v5579_v8 }
 0x5a3   : > { %4616 = vmatprep.subr.bf16.mxu1 %v5912_v53 }
 0x5a6   : > { %4618 = vmatpush1.bf16.msra.mxu1 %v5924_v0 }
 0x5a7   : > { %4620 = vmatprep.subr.bf16.mxu1 %v5928_v2 }
 0x5aa   : > { %4622 = vmatpush1.bf16.msra.mxu1 %v5941_v14 }
 0x5ab   : > { %4624 = vmatprep.subr.bf16.mxu1 %v5944_v15 }
 0x5ad   : > { %v1189_v49 = vpop.permute.xlu0 %1188 }
 0x5ae   : > { %v1191_v55 = vmul.f32 %v5182_v12, %v1189_v49  ;;  %4626 = vmatpush1.bf16.msra.mxu1 %v5958_v23  ;;  %v1652_v49 = vsel %vm639_vm10, 1, %v5580_v26 }
 0x5af   : > { %4628 = vmatprep.subr.bf16.mxu1 %v5898_v41 }
 0x5b0   : > { %v6172_v58 = vsel %vm1196_vm9, %v1191_v55, %v6097_v1  ;;  %v1199_v60 = vsel %vm1196_vm9, %v1191_v55, 0.0  ;;  %v1307_v55 = vsel %vm636_vm11, 1, %v5580_v26 }
 0x5b1   : > { %1200 = vst.msk [vmem:[#allocation2 + $0x8] sm:$0xff] %vm971_vm3, %v1199_v60  ;;  %4221 = vmatmul.mubr.msk.f32.vlgmr.msra.gmra.mrb[4].mxu0 %vm971_vm3, %v6172_v58 }
 0x5b2   : > { %4486 = vmatpush1.bf16.msra.mxu0 %v5915_v57  ;;  %1383 = vmatprep.mubr.f32.mxu0 %v5579_v8 }
 0x5b3   : > { %4488 = vmatprep.subr.bf16.mxu0 %v5918_v59 }
 0x5b6   : > { %4490 = vmatpush1.bf16.msra.mxu0 %v5931_v6 }
 0x5b7   : > { %4492 = vmatprep.subr.bf16.mxu0 %v5935_v9 }
 0x5ba   : > { %4494 = vmatpush1.bf16.msra.mxu0 %v5947_v18 }
 0x5bb   : > { %4496 = vmatprep.subr.bf16.mxu0 %v5952_v20 }
 0x5be   : > { %4498 = vmatpush1.bf16.msra.mxu0 %v5962_v24 }
 0x5bf   : > { %4500 = vmatprep.subr.bf16.mxu0 %v5902_v46 }
 0x674   : > { %v2174_v1 = vpop.f32.mrb[14].mxu1 }
 0x675   : > { %v2176_v43 = vpop.f32.mrb[15].mxu1  ;;  %v4981_v19 = vadd.f32 %v2174_v1, %v6051_v52 }
 0x676   : > { %v4982_v62 = vadd.f32 %v2176_v43, %v6024_v38 }
 0x677   : > { %v4245_v21 = vmul.f32 -1.442695, %v4981_v19 }
 0x678   : > { %5183 = vtanh.f32 %v4982_v62 }
 0x682   : > { %v5184_v3 = vpop.eup %5183 }
 0x683   : > { %2196 = vrot.lane.b32.xlu1 %v5184_v3, %s5581_s14  ;;  %v6204_v3 = vsel %vm1771_vm8, %v6130_v4, %v6127_v44 }
 0x684   : > { %v1270_v7 = vpop.f32.mrb[4].mxu0 }
 0x685   : > { %v1272_v11 = vpop.f32.mrb[5].mxu0  ;;  %v4955_v25 = vadd.f32 %v1270_v7, %v6057_v56 }
 0x686   : > { %v4956_v13 = vadd.f32 %v1272_v11, %v6028_v39 }
 0x687   : > { %v4222_v32 = vmul.f32 -1.442695, %v4955_v25 }
 0x688   : > { %5185 = vtanh.f32 %v4956_v13 }
 0x689   : > { %5187 = vpow2.f32 %v4245_v21  ;;  %v6215_v21 = vsel %vm1196_vm9, %v6140_v17, %v6137_v10 }
 0x68a   : > { %5189 = vpow2.f32 %v4222_v32  ;;  %v4246_v32 = vmul.f32 -1.442695, %v4982_v62 }
 0x692   : > { %v5186_v16 = vpop.eup %5185 }
 0x693   : > { %1292 = vrot.lane.b32.xlu0 %v5186_v16, %s5581_s14  ;;  %v5188_v31 = vpop.eup %5187 }
 0x694   : > { %v2187_v33 = vadd.f32 1.0, %v5188_v31  ;;  %v5190_v37 = vpop.eup %5189 }
 0x695   : > { %v1283_v12 = vadd.f32 1.0, %v5190_v37  ;;  %v4223_v37 = vmul.f32 -1.442695, %v4956_v13 }
 0x696   : > { %5191 = vrcp.f32 %v2187_v33 }
 0x697   : > { %5193 = vrcp.f32 %v1283_v12 }
 0x6a0   : > { %v5192_v40 = vpop.eup %5191 }
 0x6a1   : > { %v5194_v60 = vpop.eup %5193  ;;  %v2194_v7 = vmul.f32 %v5192_v40, %v6204_v3 }
 0x6a2   : > { %v1290_v25 = vmul.f32 %v5194_v60, %v6215_v21 }
 0x6f5   : > { %v2197_v42 = vpop.permute.xlu1 %2196 }
 0x6f6   : > { %v2199_v5 = vmul.f32 %v5192_v40, %v2197_v42 }
 0x6f8   : > { %2201 = vrot.lane.b32.xlu1 %v2199_v5, %s5581_s14 }
 0x6fc   : > { %1654 = vperm.xlu1 %5129, %v1652_v49  }
 0x700   : > { %1309 = vperm.xlu1 %5129, %v1307_v55  }
 0x705   : > { %v1293_v1 = vpop.permute.xlu0 %1292 }
 0x706   : > { %v1295_v43 = vmul.f32 %v5194_v60, %v1293_v1 }
 0x708   : > { %1297 = vrot.lane.b32.xlu0 %v1295_v43, %s5581_s14 }
 0x76a   : > { %v2202_v11 = vpop.permute.xlu1 %2201 }
 0x76b   : > { %v6207_v16 = vadd.f32 %v2202_v11, %v2194_v7 }
 0x76d   : > { %5195 = vtanh.f32 %v6207_v16 }
 0x777   : > { %v5196_v19 = vpop.eup %5195 }
 0x778   : > { %2207 = vrot.lane.b32.xlu0 %v5196_v19, %s5581_s14 }
 0x77a   : > { %v1298_v44 = vpop.permute.xlu0 %1297 }
 0x77b   : > { %v6218_v4 = vadd.f32 %v1298_v44, %v1290_v25  ;;  %v6222_v10 = vpop.permute.xlu1 %1654 }
 0x77c   : > { %vm1656_vm12 = vcmp.eq.s32.totalorder %v6222_v10, 1 }
 0x77d   : > { %5197 = vtanh.f32 %v6218_v4 }
 0x77e   : > { %5199 = vpow2.f32 %v4246_v32 }
 0x77f   : > { %5201 = vpow2.f32 %v4223_v37 }
 0x787   : > { %v5198_v31 = vpop.eup %5197 }
 0x788   : > { %1303 = vrot.lane.b32.xlu0 %v5198_v31, %s5581_s14  ;;  %v5200_v33 = vpop.eup %5199 }
 0x789   : > { %v2188_v40 = vadd.f32 1.0, %v5200_v33  ;;  %v5202_v42 = vpop.eup %5201 }
 0x78a   : > { %v1284_v49 = vadd.f32 1.0, %v5202_v42 }
 0x78b   : > { %5203 = vrcp.f32 %v2188_v40 }
 0x78c   : > { %5205 = vrcp.f32 %v1284_v49 }
 0x795   : > { %v5204_v17 = vpop.eup %5203 }
 0x796   : > { %v5206_v13 = vpop.eup %5205 }
 0x7ea   : > { %v2208_v5 = vpop.permute.xlu0 %2207 }
 0x7eb   : > { %v2210_v12 = vmul.f32 %v5204_v17, %v2208_v5 }
 0x7ed   : > { %v6228_v55 = vsel %vm1656_vm12, %v2210_v12, %v6150_v45  ;;  %v2213_v62 = vsel %vm1656_vm12, %v2210_v12, 0.0  ;;  %v6242_v45 = vpop.permute.xlu1 %1309 }
 0x7ee   : > { %2214 = vst.msk [vmem:[#allocation3 + $0x28] sm:$0xff] %vm971_vm3, %v2213_v62  ;;  %4247 = vmatmul.mubr.msk.f32.vlgmr.msra.gmra.mrb[12].mxu1 %vm971_vm3, %v6228_v55  ;;  %vm1311_vm13 = vcmp.eq.s32.totalorder %v6242_v45, 1 }
 0x7ef   : > { %4630 = vmatpush1.bf16.msra.mxu1 %v5908_v51  ;;  %2392 = vmatprep.mubr.f32.mxu1 %v5579_v8 }
 0x7f0   : > { %4632 = vmatprep.subr.bf16.mxu1 %v5912_v53 }
 0x7f3   : > { %4634 = vmatpush1.bf16.msra.mxu1 %v5924_v0 }
 0x7f4   : > { %4636 = vmatprep.subr.bf16.mxu1 %v5928_v2 }
 0x7f7   : > { %4638 = vmatpush1.bf16.msra.mxu1 %v5941_v14 }
 0x7f8   : > { %4640 = vmatprep.subr.bf16.mxu1 %v5944_v15 }
 0x7fa   : > { %v1304_v60 = vpop.permute.xlu0 %1303 }
 0x7fb   : > { %v1306_v1 = vmul.f32 %v5206_v13, %v1304_v60  ;;  %4642 = vmatpush1.bf16.msra.mxu1 %v5958_v23 }
 0x7fc   : > { %4644 = vmatprep.subr.bf16.mxu1 %v5898_v41 }
 0x7fd   : > { %v6250_v43 = vsel %vm1311_vm13, %v1306_v1, %v6172_v58  ;;  %v1314_v7 = vsel %vm1311_vm13, %v1306_v1, 0.0 }
 0x7fe   : > { %1315 = vst.msk [vmem:[#allocation2 + $0x10] sm:$0xff] %vm971_vm3, %v1314_v7  ;;  %4224 = vmatmul.mubr.msk.f32.vlgmr.msra.gmra.mrb[6].mxu0 %vm971_vm3, %v6250_v43  ;;  %v1537_v7 = vsel %vm638_vm14, 1, %v5580_v26 }
 0x7ff   : > { %4502 = vmatpush1.bf16.msra.mxu0 %v5915_v57  ;;  %1498 = vmatprep.mubr.f32.mxu0 %v5579_v8 }
 0x800   : > { %4504 = vmatprep.subr.bf16.mxu0 %v5918_v59 }
 0x803   : > { %4506 = vmatpush1.bf16.msra.mxu0 %v5931_v6 }
 0x804   : > { %4508 = vmatprep.subr.bf16.mxu0 %v5935_v9 }
 0x807   : > { %4510 = vmatpush1.bf16.msra.mxu0 %v5947_v18 }
 0x808   : > { %4512 = vmatprep.subr.bf16.mxu0 %v5952_v20 }
 0x80b   : > { %4514 = vmatpush1.bf16.msra.mxu0 %v5962_v24 }
 0x80c   : > { %4516 = vmatprep.subr.bf16.mxu0 %v5902_v46 }
 0x8c1   : > { %v2284_v58 = vpop.f32.mrb[12].mxu1 }
 0x8c2   : > { %v2286_v11 = vpop.f32.mrb[13].mxu1  ;;  %v4979_v37 = vadd.f32 %v2284_v58, %v6051_v52  ;;  %v1422_v58 = vsel %vm637_vm15, 1, %v5580_v26 }
 0x8c3   : > { %v4980_v19 = vadd.f32 %v2286_v11, %v6024_v38 }
 0x8c4   : > { %v4248_v40 = vmul.f32 -1.442695, %v4979_v37 }
 0x8c5   : > { %5207 = vtanh.f32 %v4980_v19 }
 0x8cf   : > { %v5208_v25 = vpop.eup %5207 }
 0x8d0   : > { %2306 = vrot.lane.b32.xlu1 %v5208_v25, %s5581_s14 }
 0x8d1   : > { %v1385_v44 = vpop.f32.mrb[6].mxu0 }
 0x8d2   : > { %v1387_v31 = vpop.f32.mrb[7].mxu0  ;;  %v4957_v42 = vadd.f32 %v1385_v44, %v6057_v56 }
 0x8d3   : > { %v4958_v32 = vadd.f32 %v1387_v31, %v6028_v39  ;;  %v6282_v31 = vsel %vm1656_vm12, %v6207_v16, %v6204_v3 }
 0x8d4   : > { %v4225_v5 = vmul.f32 -1.442695, %v4957_v42  ;;  %v6293_v42 = vsel %vm1311_vm13, %v6218_v4, %v6215_v21 }
 0x8d5   : > { %5209 = vtanh.f32 %v4958_v32 }
 0x8d6   : > { %5211 = vpow2.f32 %v4248_v40 }
 0x8d7   : > { %5213 = vpow2.f32 %v4225_v5 }
 0x8df   : > { %v5210_v33 = vpop.eup %5209 }
 0x8e0   : > { %1407 = vrot.lane.b32.xlu0 %v5210_v33, %s5581_s14  ;;  %v5212_v17 = vpop.eup %5211 }
 0x8e1   : > { %v2297_v12 = vadd.f32 1.0, %v5212_v17  ;;  %v5214_v49 = vpop.eup %5213 }
 0x8e2   : > { %v1398_v1 = vadd.f32 1.0, %v5214_v49 }
 0x8e3   : > { %5215 = vrcp.f32 %v2297_v12  ;;  %v4249_v12 = vmul.f32 -1.442695, %v4980_v19 }
 0x8e4   : > { %5217 = vrcp.f32 %v1398_v1 }
 0x8ed   : > { %v5216_v62 = vpop.eup %5215 }
 0x8ee   : > { %v5218_v11 = vpop.eup %5217  ;;  %v2304_v33 = vmul.f32 %v5216_v62, %v6282_v31 }
 0x8ef   : > { %v1405_v17 = vmul.f32 %v5218_v11, %v6293_v42 }
 0x942   : > { %v2307_v13 = vpop.permute.xlu1 %2306 }
 0x943   : > { %v2309_v60 = vmul.f32 %v5216_v62, %v2307_v13  ;;  %v4226_v62 = vmul.f32 -1.442695, %v4958_v32 }
 0x945   : > { %2311 = vrot.lane.b32.xlu1 %v2309_v60, %s5581_s14 }
 0x949   : > { %1539 = vperm.xlu1 %5129, %v1537_v7  }
 0x94d   : > { %1424 = vperm.xlu1 %5129, %v1422_v58  }
 0x952   : > { %v1408_v25 = vpop.permute.xlu0 %1407 }
 0x953   : > { %v1410_v44 = vmul.f32 %v5218_v11, %v1408_v25 }
 0x955   : > { %1412 = vrot.lane.b32.xlu0 %v1410_v44, %s5581_s14 }
 0x9b7   : > { %v2312_v37 = vpop.permute.xlu1 %2311 }
 0x9b8   : > { %v6285_v47 = vadd.f32 %v2312_v37, %v2304_v33 }
 0x9ba   : > { %5219 = vtanh.f32 %v6285_v47 }
 0x9c4   : > { %v5220_v40 = vpop.eup %5219 }
 0x9c5   : > { %2317 = vrot.lane.b32.xlu0 %v5220_v40, %s5581_s14 }
 0x9c7   : > { %v1413_v3 = vpop.permute.xlu0 %1412 }
 0x9c8   : > { %v6296_v16 = vadd.f32 %v1413_v3, %v1405_v17  ;;  %v6300_v21 = vpop.permute.xlu1 %1539 }
 0x9c9   : > { %vm1541_vm0 = vcmp.eq.s32.totalorder %v6300_v21, 1 }
 0x9ca   : > { %5221 = vtanh.f32 %v6296_v16 }
 0x9cb   : > { %5223 = vpow2.f32 %v4249_v12 }
 0x9cc   : > { %5225 = vpow2.f32 %v4226_v62 }
 0x9d4   : > { %v5222_v5 = vpop.eup %5221 }
 0x9d5   : > { %1418 = vrot.lane.b32.xlu0 %v5222_v5, %s5581_s14  ;;  %v5224_v49 = vpop.eup %5223 }
 0x9d6   : > { %v2298_v13 = vadd.f32 1.0, %v5224_v49  ;;  %v5226_v60 = vpop.eup %5225 }
 0x9d7   : > { %v1399_v58 = vadd.f32 1.0, %v5226_v60 }
 0x9d8   : > { %5227 = vrcp.f32 %v2298_v13 }
 0x9d9   : > { %5229 = vrcp.f32 %v1399_v58 }
 0x9e2   : > { %v5228_v4 = vpop.eup %5227 }
 0x9e3   : > { %v5230_v32 = vpop.eup %5229 }
 0xa37   : > { %v2318_v1 = vpop.permute.xlu0 %2317 }
 0xa38   : > { %v2320_v7 = vmul.f32 %v5228_v4, %v2318_v1 }
 0xa3a   : > { %v6306_v11 = vsel %vm1541_vm0, %v2320_v7, %v6228_v55  ;;  %v2323_v19 = vsel %vm1541_vm0, %v2320_v7, 0.0  ;;  %v6320_v55 = vpop.permute.xlu1 %1424 }
 0xa3b   : > { %2324 = vst.msk [vmem:[#allocation3 + $0x20] sm:$0xff] %vm971_vm3, %v2323_v19  ;;  %4250 = vmatmul.mubr.msk.f32.vlgmr.msra.gmra.mrb[10].mxu1 %vm971_vm3, %v6306_v11  ;;  %vm1426_vm1 = vcmp.eq.s32.totalorder %v6320_v55, 1 }
 0xa3c   : > { %4646 = vmatpush1.bf16.msra.mxu1 %v5908_v51  ;;  %2502 = vmatprep.mubr.f32.mxu1 %v5579_v8 }
 0xa3d   : > { %4648 = vmatprep.subr.bf16.mxu1 %v5912_v53 }
 0xa40   : > { %4650 = vmatpush1.bf16.msra.mxu1 %v5924_v0 }
 0xa41   : > { %4652 = vmatprep.subr.bf16.mxu1 %v5928_v2 }
 0xa44   : > { %4654 = vmatpush1.bf16.msra.mxu1 %v5941_v14 }
 0xa45   : > { %4656 = vmatprep.subr.bf16.mxu1 %v5944_v15 }
 0xa47   : > { %v1419_v25 = vpop.permute.xlu0 %1418 }
 0xa48   : > { %v1421_v44 = vmul.f32 %v5230_v32, %v1419_v25  ;;  %4658 = vmatpush1.bf16.msra.mxu1 %v5958_v23 }
 0xa49   : > { %4660 = vmatprep.subr.bf16.mxu1 %v5898_v41 }
 0xa4a   : > { %v6328_v33 = vsel %vm1426_vm1, %v1421_v44, %v6250_v43  ;;  %v1429_v37 = vsel %vm1426_vm1, %v1421_v44, 0.0 }
 0xa4b   : > { %1430 = vst.msk [vmem:[#allocation2 + $0x18] sm:$0xff] %vm971_vm3, %v1429_v37  ;;  %4227 = vmatmul.mubr.msk.f32.vlgmr.msra.gmra.mrb[8].mxu0 %vm971_vm3, %v6328_v33 }
 0xa4c   : > { %4518 = vmatpush1.bf16.msra.mxu0 %v5915_v57  ;;  %1613 = vmatprep.mubr.f32.mxu0 %v5579_v8 }
 0xa4d   : > { %4520 = vmatprep.subr.bf16.mxu0 %v5918_v59 }
 0xa50   : > { %4522 = vmatpush1.bf16.msra.mxu0 %v5931_v6 }
 0xa51   : > { %4524 = vmatprep.subr.bf16.mxu0 %v5935_v9 }
 0xa54   : > { %4526 = vmatpush1.bf16.msra.mxu0 %v5947_v18 }
 0xa55   : > { %4528 = vmatprep.subr.bf16.mxu0 %v5952_v20 }
 0xa58   : > { %4530 = vmatpush1.bf16.msra.mxu0 %v5962_v24 }
 0xa59   : > { %4532 = vmatprep.subr.bf16.mxu0 %v5902_v46 }
 0xb0e   : > { %v2394_v43 = vpop.f32.mrb[10].mxu1 }
 0xb0f   : > { %v2396_v40 = vpop.f32.mrb[11].mxu1  ;;  %v4977_v13 = vadd.f32 %v2394_v43, %v6051_v52 }
 0xb10   : > { %v4978_v17 = vadd.f32 %v2396_v40, %v6024_v38 }
 0xb11   : > { %v4251_v60 = vmul.f32 -1.442695, %v4977_v13 }
 0xb12   : > { %5231 = vtanh.f32 %v4978_v17 }
 0xb1c   : > { %v5232_v3 = vpop.eup %5231 }
 0xb1d   : > { %2416 = vrot.lane.b32.xlu1 %v5232_v3, %s5581_s14 }
 0xb1e   : > { %v1500_v5 = vpop.f32.mrb[8].mxu0 }
 0xb1f   : > { %v1502_v12 = vpop.f32.mrb[9].mxu0  ;;  %v4959_v4 = vadd.f32 %v1500_v5, %v6057_v56  ;;  %v6356_v5 = vsel %vm1541_vm0, %v6285_v47, %v6282_v31 }
 0xb20   : > { %v4960_v49 = vadd.f32 %v1502_v12, %v6028_v39 }
 0xb21   : > { %v4228_v7 = vmul.f32 -1.442695, %v4959_v4  ;;  %v6367_v4 = vsel %vm1426_vm1, %v6296_v16, %v6293_v42 }
 0xb22   : > { %5233 = vtanh.f32 %v4960_v49 }
 0xb23   : > { %5235 = vpow2.f32 %v4251_v60 }
 0xb24   : > { %5237 = vpow2.f32 %v4228_v7 }
 0xb2c   : > { %v5234_v62 = vpop.eup %5233 }
 0xb2d   : > { %1522 = vrot.lane.b32.xlu0 %v5234_v62, %s5581_s14  ;;  %v5236_v1 = vpop.eup %5235 }
 0xb2e   : > { %v2407_v58 = vadd.f32 1.0, %v5236_v1  ;;  %v5238_v19 = vpop.eup %5237 }
 0xb2f   : > { %v1513_v37 = vadd.f32 1.0, %v5238_v19 }
 0xb30   : > { %5239 = vrcp.f32 %v2407_v58  ;;  %v4252_v58 = vmul.f32 -1.442695, %v4978_v17 }
 0xb31   : > { %5241 = vrcp.f32 %v1513_v37 }
 0xb3a   : > { %v5240_v32 = vpop.eup %5239 }
 0xb3b   : > { %v5242_v40 = vpop.eup %5241  ;;  %v2414_v12 = vmul.f32 %v5240_v32, %v6356_v5 }
 0xb3c   : > { %v1520_v1 = vmul.f32 %v5242_v40, %v6367_v4 }
 0xb8f   : > { %v2417_v25 = vpop.permute.xlu1 %2416 }
 0xb90   : > { %v2419_v44 = vmul.f32 %v5240_v32, %v2417_v25  ;;  %v4229_v32 = vmul.f32 -1.442695, %v4960_v49 }
 0xb92   : > { %2421 = vrot.lane.b32.xlu1 %v2419_v44, %s5581_s14 }
 0xb9f   : > { %v1523_v3 = vpop.permute.xlu0 %1522 }
 0xba0   : > { %v1525_v43 = vmul.f32 %v5242_v40, %v1523_v3 }
 0xba2   : > { %1527 = vrot.lane.b32.xlu0 %v1525_v43, %s5581_s14 }
 0xc04   : > { %v2422_v62 = vpop.permute.xlu1 %2421 }
 0xc05   : > { %v6359_v13 = vadd.f32 %v2422_v62, %v2414_v12 }
 0xc07   : > { %5243 = vtanh.f32 %v6359_v13 }
 0xc11   : > { %v5244_v60 = vpop.eup %5243 }
 0xc12   : > { %2427 = vrot.lane.b32.xlu1 %v5244_v60, %s5581_s14 }
 0xc14   : > { %v1528_v31 = vpop.permute.xlu0 %1527 }
 0xc15   : > { %v6370_v47 = vadd.f32 %v1528_v31, %v1520_v1 }
 0xc17   : > { %5245 = vtanh.f32 %v6370_v47 }
 0xc18   : > { %5247 = vpow2.f32 %v4252_v58 }
 0xc19   : > { %5249 = vpow2.f32 %v4229_v32 }
 0xc21   : > { %v5246_v7 = vpop.eup %5245 }
 0xc22   : > { %1533 = vrot.lane.b32.xlu0 %v5246_v7, %s5581_s14  ;;  %v5248_v19 = vpop.eup %5247 }
 0xc23   : > { %v2408_v25 = vadd.f32 1.0, %v5248_v19  ;;  %v5250_v44 = vpop.eup %5249 }
 0xc24   : > { %v1514_v40 = vadd.f32 1.0, %v5250_v44 }
 0xc25   : > { %5251 = vrcp.f32 %v2408_v25 }
 0xc26   : > { %5253 = vrcp.f32 %v1514_v40 }
 0xc2f   : > { %v5252_v42 = vpop.eup %5251 }
 0xc84   : > { %v2428_v16 = vpop.permute.xlu1 %2427 }
 0xc85   : > { %v2430_v37 = vmul.f32 %v5252_v42, %v2428_v16 }
 0xc87   : > { %v6377_v3 = vsel %vm1426_vm1, %v2430_v37, %v6306_v11  ;;  %v2433_v43 = vsel %vm1426_vm1, %v2430_v37, 0.0  ;;  %v5254_v11 = vpop.eup %5253 }
 0xc88   : > { %2434 = vst.msk [vmem:[#allocation3 + $0x18] sm:$0xff] %vm971_vm3, %v2433_v43  ;;  %4253 = vmatmul.mubr.msk.f32.vlgmr.msra.gmra.mrb[8].mxu1 %vm971_vm3, %v6377_v3 }
 0xc89   : > { %4662 = vmatpush1.bf16.msra.mxu1 %v5908_v51  ;;  %2612 = vmatprep.mubr.f32.mxu1 %v5579_v8 }
 0xc8a   : > { %4664 = vmatprep.subr.bf16.mxu1 %v5912_v53 }
 0xc8d   : > { %4666 = vmatpush1.bf16.msra.mxu1 %v5924_v0 }
 0xc8e   : > { %4668 = vmatprep.subr.bf16.mxu1 %v5928_v2 }
 0xc91   : > { %4670 = vmatpush1.bf16.msra.mxu1 %v5941_v14 }
 0xc92   : > { %4672 = vmatprep.subr.bf16.mxu1 %v5944_v15 }
 0xc94   : > { %v1534_v17 = vpop.permute.xlu0 %1533 }
 0xc95   : > { %v1536_v49 = vmul.f32 %v5254_v11, %v1534_v17  ;;  %4674 = vmatpush1.bf16.msra.mxu1 %v5958_v23 }
 0xc96   : > { %4676 = vmatprep.subr.bf16.mxu1 %v5898_v41 }
 0xc97   : > { %v6396_v12 = vsel %vm1541_vm0, %v1536_v49, %v6328_v33  ;;  %v1544_v62 = vsel %vm1541_vm0, %v1536_v49, 0.0 }
 0xc98   : > { %1545 = vst.msk [vmem:[#allocation2 + $0x20] sm:$0xff] %vm971_vm3, %v1544_v62  ;;  %4230 = vmatmul.mubr.msk.f32.vlgmr.msra.gmra.mrb[10].mxu0 %vm971_vm3, %v6396_v12 }
 0xc99   : > { %4534 = vmatpush1.bf16.msra.mxu0 %v5915_v57  ;;  %1728 = vmatprep.mubr.f32.mxu0 %v5579_v8 }
 0xc9a   : > { %4536 = vmatprep.subr.bf16.mxu0 %v5918_v59 }
 0xc9d   : > { %4538 = vmatpush1.bf16.msra.mxu0 %v5931_v6 }
 0xc9e   : > { %4540 = vmatprep.subr.bf16.mxu0 %v5935_v9 }
 0xca1   : > { %4542 = vmatpush1.bf16.msra.mxu0 %v5947_v18 }
 0xca2   : > { %4544 = vmatprep.subr.bf16.mxu0 %v5952_v20 }
 0xca5   : > { %4546 = vmatpush1.bf16.msra.mxu0 %v5962_v24 }
 0xca6   : > { %4548 = vmatprep.subr.bf16.mxu0 %v5902_v46 }
 0xd5b   : > { %v2504_v41 = vpop.f32.mrb[8].mxu1 }
 0xd5c   : > { %v2506_v33 = vpop.f32.mrb[9].mxu1  ;;  %v4975_v32 = vadd.f32 %v2504_v41, %v6051_v52 }
 0xd5d   : > { %v4976_v60 = vadd.f32 %v2506_v33, %v6024_v38  ;;  %v6424_v33 = vsel %vm1426_vm1, %v6359_v13, %v6356_v5 }
 0xd5e   : > { %v4254_v25 = vmul.f32 -1.442695, %v4975_v32  ;;  %v6435_v32 = vsel %vm1541_vm0, %v6370_v47, %v6367_v4 }
 0xd5f   : > { %5255 = vtanh.f32 %v4976_v60 }
 0xd69   : > { %v5256_v1 = vpop.eup %5255 }
 0xd6a   : > { %2526 = vrot.lane.b32.xlu1 %v5256_v1, %s5581_s14 }
 0xd6b   : > { %v1615_v31 = vpop.f32.mrb[10].mxu0 }
 0xd6c   : > { %v1617_v7 = vpop.f32.mrb[11].mxu0  ;;  %v4961_v46 = vadd.f32 %v1615_v31, %v6057_v56 }
 0xd6d   : > { %v4962_v58 = vadd.f32 %v1617_v7, %v6028_v39 }
 0xd6e   : > { %v4231_v42 = vmul.f32 -1.442695, %v4961_v46 }
 0xd6f   : > { %5257 = vtanh.f32 %v4962_v58 }
 0xd70   : > { %5259 = vpow2.f32 %v4254_v25 }
 0xd71   : > { %5261 = vpow2.f32 %v4231_v42 }
 0xd79   : > { %v5258_v19 = vpop.eup %5257 }
 0xd7a   : > { %1637 = vrot.lane.b32.xlu0 %v5258_v19, %s5581_s14  ;;  %v5260_v44 = vpop.eup %5259 }
 0xd7b   : > { %v2517_v16 = vadd.f32 1.0, %v5260_v44  ;;  %v5262_v37 = vpop.eup %5261  ;;  %v4255_v44 = vmul.f32 -1.442695, %v4976_v60 }
 0xd7c   : > { %v1628_v17 = vadd.f32 1.0, %v5262_v37 }
 0xd7d   : > { %5263 = vrcp.f32 %v2517_v16  ;;  %v4232_v16 = vmul.f32 -1.442695, %v4962_v58 }
 0xd7e   : > { %5265 = vrcp.f32 %v1628_v17 }
 0xd87   : > { %v5264_v40 = vpop.eup %5263 }
 0xd88   : > { %v5266_v49 = vpop.eup %5265  ;;  %v2524_v1 = vmul.f32 %v5264_v40, %v6424_v33 }
 0xd89   : > { %v1635_v25 = vmul.f32 %v5266_v49, %v6435_v32 }
 0xddc   : > { %v2527_v43 = vpop.permute.xlu1 %2526 }
 0xddd   : > { %v2529_v11 = vmul.f32 %v5264_v40, %v2527_v43 }
 0xddf   : > { %2531 = vrot.lane.b32.xlu1 %v2529_v11, %s5581_s14 }
 0xdec   : > { %v1638_v62 = vpop.permute.xlu0 %1637 }
 0xded   : > { %v1640_v41 = vmul.f32 %v5266_v49, %v1638_v62 }
 0xdef   : > { %1642 = vrot.lane.b32.xlu0 %v1640_v41, %s5581_s14 }
 0xe51   : > { %v2532_v31 = vpop.permute.xlu1 %2531 }
 0xe52   : > { %v6427_v7 = vadd.f32 %v2532_v31, %v2524_v1 }
 0xe54   : > { %5267 = vtanh.f32 %v6427_v7 }
 0xe5e   : > { %v5268_v19 = vpop.eup %5267 }
 0xe5f   : > { %2537 = vrot.lane.b32.xlu1 %v5268_v19, %s5581_s14 }
 0xe61   : > { %v1643_v5 = vpop.permute.xlu0 %1642 }
 0xe62   : > { %v6438_v13 = vadd.f32 %v1643_v5, %v1635_v25 }
 0xe64   : > { %5269 = vtanh.f32 %v6438_v13 }
 0xe65   : > { %5271 = vpow2.f32 %v4255_v44 }
 0xe66   : > { %5273 = vpow2.f32 %v4232_v16 }
 0xe6e   : > { %v5270_v46 = vpop.eup %5269 }
 0xe6f   : > { %1648 = vrot.lane.b32.xlu0 %v5270_v46, %s5581_s14  ;;  %v5272_v42 = vpop.eup %5271 }
 0xe70   : > { %v2518_v37 = vadd.f32 1.0, %v5272_v42  ;;  %v5274_v40 = vpop.eup %5273  ;;  %v6492_v42 = vsel %vm1311_vm13, %v6427_v7, %v6424_v33 }
 0xe71   : > { %v1629_v11 = vadd.f32 1.0, %v5274_v40 }
 0xe72   : > { %5275 = vrcp.f32 %v2518_v37 }
 0xe73   : > { %5277 = vrcp.f32 %v1629_v11 }
 0xe7c   : > { %v5276_v4 = vpop.eup %5275 }
 0xed1   : > { %v2538_v47 = vpop.permute.xlu1 %2537 }
 0xed2   : > { %v2540_v43 = vmul.f32 %v5276_v4, %v2538_v47  ;;  %v6503_v47 = vsel %vm1656_vm12, %v6438_v13, %v6435_v32 }
 0xed4   : > { %v6445_v17 = vsel %vm1311_vm13, %v2540_v43, %v6377_v3  ;;  %v2543_v49 = vsel %vm1311_vm13, %v2540_v43, 0.0  ;;  %v5278_v3 = vpop.eup %5277 }
 0xed5   : > { %2544 = vst.msk [vmem:[#allocation3 + $0x10] sm:$0xff] %vm971_vm3, %v2543_v49  ;;  %4256 = vmatmul.mubr.msk.f32.vlgmr.msra.gmra.mrb[6].mxu1 %vm971_vm3, %v6445_v17 }
 0xed6   : > { %4678 = vmatpush1.bf16.msra.mxu1 %v5908_v51  ;;  %2722 = vmatprep.mubr.f32.mxu1 %v5579_v8 }
 0xed7   : > { %4680 = vmatprep.subr.bf16.mxu1 %v5912_v53 }
 0xeda   : > { %4682 = vmatpush1.bf16.msra.mxu1 %v5924_v0 }
 0xedb   : > { %4684 = vmatprep.subr.bf16.mxu1 %v5928_v2 }
 0xede   : > { %4686 = vmatpush1.bf16.msra.mxu1 %v5941_v14 }
 0xedf   : > { %4688 = vmatprep.subr.bf16.mxu1 %v5944_v15  ;;  %v816_v15 = vadd.f32 %v6007_v27, %v6057_v56 }
 0xee1   : > { %v1649_v60 = vpop.permute.xlu0 %1648 }
 0xee2   : > { %v1651_v58 = vmul.f32 %v5278_v3, %v1649_v60  ;;  %4690 = vmatpush1.bf16.msra.mxu1 %v5958_v23 }
 0xee4   : > { %v6463_v51 = vsel %vm1656_vm12, %v1651_v58, %v6396_v12  ;;  %v1659_v53 = vsel %vm1656_vm12, %v1651_v58, 0.0 }
 0xee5   : > { %1660 = vst.msk [vmem:[#allocation2 + $0x28] sm:$0xff] %vm971_vm3, %v1659_v53  ;;  %4233 = vmatmul.mubr.msk.f32.vlgmr.msra.gmra.mrb[12].mxu0 %vm971_vm3, %v6463_v51 }
 0xee6   : > { %4550 = vmatpush1.bf16.msra.mxu0 %v5915_v57  ;;  %1843 = vmatprep.mubr.f32.mxu0 %v5579_v8 }
 0xee7   : > { %4552 = vmatprep.subr.bf16.mxu0 %v5918_v59  ;;  %v818_v59 = vadd.f32 %v6009_v28, %v6028_v39 }
 0xeea   : > { %4554 = vmatpush1.bf16.msra.mxu0 %v5931_v6 }
 0xeeb   : > { %4556 = vmatprep.subr.bf16.mxu0 %v5935_v9 }
 0xeee   : > { %4558 = vmatpush1.bf16.msra.mxu0 %v5947_v18 }
 0xeef   : > { %4560 = vmatprep.subr.bf16.mxu0 %v5952_v20 }
 0xef2   : > { %4562 = vmatpush1.bf16.msra.mxu0 %v5962_v24 }
 0xfa8   : > { %v2614_v0 = vpop.f32.mrb[6].mxu1 }
 0xfa9   : > { %v2616_v2 = vpop.f32.mrb[7].mxu1  ;;  %v4973_v24 = vadd.f32 %v2614_v0, %v6051_v52 }
 0xfaa   : > { %v4974_v14 = vadd.f32 %v2616_v2, %v6024_v38 }
 0xfab   : > { %v4257_v12 = vmul.f32 -1.442695, %v4973_v24 }
 0xfac   : > { %5279 = vtanh.f32 %v4974_v14  ;;  %v4258_v49 = vmul.f32 -1.442695, %v4974_v14 }
 0xfb6   : > { %v5280_v57 = vpop.eup %5279 }
 0xfb7   : > { %2636 = vrot.lane.b32.xlu1 %v5280_v57, %s5581_s14 }
 0xfb8   : > { %v1730_v6 = vpop.f32.mrb[12].mxu0 }
 0xfb9   : > { %v1735_v9 = vadd.f32 %v1730_v6, %v816_v15  ;;  %v1732_v18 = vpop.f32.mrb[13].mxu0 }
 0xfba   : > { %v1736_v20 = vadd.f32 %v1732_v18, %v818_v59 }
 0xfbb   : > { %v4234_v41 = vmul.f32 -1.442695, %v1735_v9 }
 0xfbc   : > { %5281 = vtanh.f32 %v1736_v20  ;;  %v4235_v60 = vmul.f32 -1.442695, %v1736_v20 }
 0xfbd   : > { %5283 = vpow2.f32 %v4257_v12  ;;  %v824_v12 = vadd.f32 %v6013_v30, %v6028_v39 }
 0xfbe   : > { %5285 = vpow2.f32 %v4234_v41 }
 0xfc6   : > { %v5282_v23 = vpop.eup %5281 }
 0xfc7   : > { %1752 = vrot.lane.b32.xlu0 %v5282_v23, %s5581_s14  ;;  %v5284_v62 = vpop.eup %5283 }
 0xfc8   : > { %v2627_v27 = vadd.f32 1.0, %v5284_v62  ;;  %v5286_v1 = vpop.eup %5285 }
 0xfc9   : > { %v1743_v25 = vadd.f32 1.0, %v5286_v1 }
 0xfca   : > { %5287 = vrcp.f32 %v2627_v27 }
 0xfcb   : > { %5289 = vrcp.f32 %v1743_v25 }
 0xfd4   : > { %v5288_v31 = vpop.eup %5287 }
 0xfd5   : > { %v5290_v5 = vpop.eup %5289  ;;  %v2634_v16 = vmul.f32 %v5288_v31, %v6492_v42 }
 0xfd6   : > { %v1750_v43 = vmul.f32 %v5290_v5, %v6503_v47 }
0x1029   : > { %v2637_v28 = vpop.permute.xlu1 %2636 }
0x102a   : > { %v2639_v19 = vmul.f32 %v5288_v31, %v2637_v28 }
0x102c   : > { %2641 = vrot.lane.b32.xlu1 %v2639_v19, %s5581_s14 }
0x1039   : > { %v1753_v46 = vpop.permute.xlu0 %1752 }
0x103a   : > { %v1755_v44 = vmul.f32 %v5290_v5, %v1753_v46 }
0x103c   : > { %1757 = vrot.lane.b32.xlu0 %v1755_v44, %s5581_s14 }
0x109e   : > { %v2642_v37 = vpop.permute.xlu1 %2641 }
0x109f   : > { %v6495_v40 = vadd.f32 %v2642_v37, %v2634_v16 }
0x10a1   : > { %5291 = vtanh.f32 %v6495_v40 }
0x10ab   : > { %v5292_v4 = vpop.eup %5291 }
0x10ac   : > { %2647 = vrot.lane.b32.xlu1 %v5292_v4, %s5581_s14  ;;  %v2798_v4 = vld [vmem:[#allocation12 + $0x18] sm:$0xff] }
0x10ae   : > { %v1758_v33 = vpop.permute.xlu0 %1757 }
0x10af   : > { %v6506_v7 = vadd.f32 %v1758_v33, %v1750_v43  ;;  %v2795_v43 = vld [vmem:[#allocation12] sm:$0xff] }
0x10b1   : > { %5293 = vtanh.f32 %v6506_v7 }
0x10b2   : > { %5295 = vpow2.f32 %v4258_v49  ;;  %v2800_v49 = vld [vmem:[#allocation12 + $0x28] sm:$0xff] }
0x10b3   : > { %5297 = vpow2.f32 %v4235_v60 }
0x10bb   : > { %v5294_v11 = vpop.eup %5293 }
0x10bc   : > { %1763 = vrot.lane.b32.xlu0 %v5294_v11, %s5581_s14  ;;  %v5296_v3 = vpop.eup %5295  ;;  %v2797_v11 = vld [vmem:[#allocation12 + $0x10] sm:$0xff] }
0x10bd   : > { %v2628_v58 = vadd.f32 1.0, %v5296_v3  ;;  %v5298_v53 = vpop.eup %5297  ;;  %v2802_v3 = vld [vmem:[#allocation12 + $0x38] sm:$0xff]  ;;  %v4693_v60 = vpack.c.bf16 %v2797_v11, %v2795_v43 }
0x10be   : > { %v1744_v2 = vadd.f32 1.0, %v5298_v53  ;;  %v2652_v53 = vsel %vm1196_vm9, %v6495_v40, %v6492_v42  ;;  %v2809_v40 = vld [vmem:[#allocation12 + $0x70] sm:$0xff] }
0x10bf   : > { %5299 = vrcp.f32 %v2628_v58  ;;  %v4695_v58 = vpack.c.bf16 %v2802_v3, %v2800_v49 }
0x10c0   : > { %5301 = vrcp.f32 %v1744_v2 }
0x10c9   : > { %v5300_v32 = vpop.eup %5299 }
0x10ca   : > { %v5302_v14 = vpop.eup %5301 }
0x111e   : > { %v2648_v13 = vpop.permute.xlu1 %2647 }
0x111f   : > { %v2650_v0 = vmul.f32 %v5300_v32, %v2648_v13  ;;  %v2799_v32 = vld [vmem:[#allocation12 + $0x20] sm:$0xff]  ;;  %v2801_v13 = vld [vmem:[#allocation12 + $0x30] sm:$0xff] }
0x1120   : > { %v4697_v2 = vpack.c.bf16 %v2801_v13, %v2799_v32 }
0x1121   : > { %v2651_v57 = vsel %vm1196_vm9, %v2650_v0, %v6445_v17  ;;  %v2653_v15 = vsel %vm1196_vm9, %v2650_v0, 0.0 }
0x1122   : > { %2654 = vst.msk [vmem:[#allocation3 + $0x8] sm:$0xff] %vm971_vm3, %v2653_v15  ;;  %4259 = vmatmul.mubr.msk.f32.vlgmr.msra.gmra.mrb[4].mxu1 %vm971_vm3, %v2651_v57 }
0x112e   : > { %v1764_v59 = vpop.permute.xlu0 %1763 }
0x112f   : > { %v1766_v6 = vmul.f32 %v5302_v14, %v1764_v59  ;;  %v2804_v14 = vld [vmem:[#allocation12 + $0x48] sm:$0xff]  ;;  %v2806_v59 = vld [vmem:[#allocation12 + $0x58] sm:$0xff] }
0x1131   : > { %v1772_v9 = vsel %vm1771_vm8, %v1766_v6, %v6463_v51  ;;  %v1774_v18 = vsel %vm1771_vm8, %v1766_v6, 0.0  ;;  %v822_v51 = vadd.f32 %v6011_v29, %v6057_v56  ;;  %v4699_v6 = vpack.c.bf16 %v2806_v59, %v2804_v14  ;;  %v2775_v14 = vld [vmem:[#allocation10 + $0x20] sm:$0xff]  ;;  %v2777_v59 = vld [vmem:[#allocation10 + $0x30] sm:$0xff] }
0x1132   : > { %1775 = vst.msk [vmem:[#allocation2 + $0x30] sm:$0xff] %vm971_vm3, %v1774_v18  ;;  %4236 = vmatmul.mubr.msk.f32.vlgmr.msra.gmra.mrb[14].mxu0 %vm971_vm3, %v1772_v9  ;;  %v2803_v9 = vld [vmem:[#allocation12 + $0x40] sm:$0xff]  ;;  %v2805_v18 = vld [vmem:[#allocation12 + $0x50] sm:$0xff] }
0x1133   : > { %2899 = vmatprep.mubr.f32.mxu0 %v5579_v8 }
0x11f5   : > { %v2724_v17 = vpop.f32.mrb[4].mxu1 }
0x11f6   : > { %v2726_v20 = vpop.f32.mrb[5].mxu1  ;;  %v4971_v31 = vadd.f32 %v2724_v17, %v6051_v52  ;;  %v2796_v52 = vld [vmem:[#allocation12 + $0x8] sm:$0xff]  ;;  %v4701_v17 = vpack.c.bf16 %v2805_v18, %v2803_v9  ;;  %v2782_v18 = vld [vmem:[#allocation10 + $0x58] sm:$0xff] }
0x11f7   : > { %v6526_v23 = vadd.f32 %v2726_v20, %v6024_v38  ;;  %v4691_v33 = vpack.c.bf16 %v2798_v4, %v2796_v52  ;;  %v2808_v20 = vld [vmem:[#allocation12 + $0x68] sm:$0xff]  ;;  %v3100_v52 = vld [vmem:[%s7214_s26 + $0x38] sm:$0xff] }
0x11f8   : > { %v4260_v28 = vmul.f32 -1.442695, %v4971_v31  ;;  %v1773_v31 = vsel %vm1771_vm8, %v6506_v7, %v6503_v47  ;;  %v3095_v47 = vld [vmem:[%s7214_s26 + $0x10] sm:$0xff]  ;;  %v2780_v9 = vld [vmem:[#allocation10 + $0x48] sm:$0xff] }
0x11f9   : > { %5303 = vtanh.f32 %v6526_v23  ;;  %4692 = vmatprep.subr.bf16.mxu0 %v4691_v33  ;;  %v4261_v43 = vmul.f32 -1.442695, %v6526_v23  ;;  %v2773_v23 = vld [vmem:[#allocation10 + $0x10] sm:$0xff] }
0x11fa   : > { %4694 = vmatpush1.bf16.msra.mxu0 %v4693_v60 }
0x11fb   : > { %4696 = vmatprep.subr.bf16.mxu0 %v4695_v58 }
0x11fe   : > { %4698 = vmatpush1.bf16.msra.mxu0 %v4697_v2  ;;  %v2776_v2 = vld [vmem:[#allocation10 + $0x28] sm:$0xff] }
0x11ff   : > { %4700 = vmatprep.subr.bf16.mxu0 %v4699_v6 }
0x1202   : > { %4702 = vmatpush1.bf16.msra.mxu0 %v4701_v17  ;;  %v4713_v17 = vpack.c.bf16 %v2777_v59, %v2775_v14 }
0x1203   : > { %v5304_v24 = vpop.eup %5303 }
0x1204   : > { %2746 = vrot.lane.b32.xlu1 %v5304_v24, %s5581_s14  ;;  %v2810_v24 = vld [vmem:[#allocation12 + $0x78] sm:$0xff] }
0x1205   : > { %v1845_v62 = vpop.f32.mrb[14].mxu0  ;;  %v4703_v42 = vpack.c.bf16 %v2810_v24, %v2808_v20  ;;  %v4715_v20 = vpack.c.bf16 %v2782_v18, %v2780_v9  ;;  %v2779_v24 = vld [vmem:[#allocation10 + $0x40] sm:$0xff] }
0x1206   : > { %v1850_v41 = vadd.f32 %v1845_v62, %v822_v51  ;;  %v1847_v27 = vpop.f32.mrb[15].mxu0  ;;  %v2807_v51 = vld [vmem:[#allocation12 + $0x60] sm:$0xff]  ;;  %v2772_v62 = vld [vmem:[#allocation10 + $0x8] sm:$0xff] }
0x1207   : > { %v6534_v1 = vadd.f32 %v1847_v27, %v824_v12  ;;  %v4705_v12 = vpack.c.bf16 %v2809_v40, %v2807_v51  ;;  %4704 = vmatprep.subr.bf16.mxu0 %v4703_v42  ;;  %v2781_v51 = vld [vmem:[#allocation10 + $0x50] sm:$0xff]  ;;  %v2788_v42 = vld [vmem:[#allocation3 + $0x8] sm:$0xff] }
0x1208   : > { %v4237_v56 = vmul.f32 -1.442695, %v1850_v41  ;;  %v2774_v41 = vld [vmem:[#allocation10 + $0x18] sm:$0xff]  ;;  %v2784_v40 = vld [vmem:[#allocation10 + $0x68] sm:$0xff] }
0x1209   : > { %5305 = vtanh.f32 %v6534_v1  ;;  %4706 = vmatpush1.bf16.msra.mxu0 %v4705_v12  ;;  %v4238_v11 = vmul.f32 -1.442695, %v6534_v1  ;;  %v2786_v12 = vld [vmem:[#allocation10 + $0x78] sm:$0xff] }
0x120a   : > { %5307 = vpow2.f32 %v4260_v28 }
0x120b   : > { %5309 = vpow2.f32 %v4237_v56 }
0x1213   : > { %v5306_v38 = vpop.eup %5305 }
0x1214   : > { %1867 = vrot.lane.b32.xlu0 %v5306_v38, %s5581_s14  ;;  %v5308_v29 = vpop.eup %5307  ;;  %v4707_v38 = vpack.c.bf16 %v2774_v41, %v2772_v62 }
0x1215   : > { %v2737_v19 = vadd.f32 1.0, %v5308_v29  ;;  %v5310_v30 = vpop.eup %5309 }
0x1216   : > { %v1858_v46 = vadd.f32 1.0, %v5310_v30  ;;  %4708 = vmatprep.subr.bf16.mxu0 %v4707_v38  ;;  %v3093_v30 = vld [vmem:[%s7214_s26] sm:$0xff]  ;;  %v4717_v38 = vpack.c.bf16 %v2781_v51, %v2779_v24 }
0x1217   : > { %5311 = vrcp.f32 %v2737_v19 }
0x1218   : > { %5313 = vrcp.f32 %v1858_v46  ;;  %v3097_v46 = vld [vmem:[%s7214_s26 + $0x20] sm:$0xff] }
0x1221   : > { %v5312_v39 = vpop.eup %5311 }
0x1222   : > { %v5314_v44 = vpop.eup %5313  ;;  %v2744_v0 = vmul.f32 %v5312_v39, %v2652_v53 }
0x1223   : > { %v1865_v28 = vmul.f32 %v5314_v44, %v1773_v31  ;;  %v4719_v31 = vpack.c.bf16 %v2786_v12, %v2784_v40 }
0x1276   : > { %v2747_v25 = vpop.permute.xlu1 %2746 }
0x1277   : > { %v2749_v5 = vmul.f32 %v5312_v39, %v2747_v25  ;;  %v3094_v39 = vld [vmem:[%s7214_s26 + $0x8] sm:$0xff]  ;;  %v3096_v25 = vld [vmem:[%s7214_s26 + $0x18] sm:$0xff] }
0x1278   : > { %v4723_v7 = vpack.c.bf16 %v3094_v39, %v3093_v30  ;;  %v2790_v39 = vld [vmem:[#allocation3 + $0x18] sm:$0xff] }
0x1279   : > { %2751 = vrot.lane.b32.xlu1 %v2749_v5, %s5581_s14  ;;  %v4727_v5 = vpack.c.bf16 %v3096_v25, %v3095_v47  ;;  %v2791_v47 = vld [vmem:[#allocation3 + $0x20] sm:$0xff]  ;;  %v2793_v25 = vld [vmem:[#allocation3 + $0x30] sm:$0xff] }
0x127a   : > { %4724 = vmatprep.subr.bf16.mxu1 %v4723_v7 }
0x127b   : > { %4726 = vmatpush3.bf16.msra.mxu1 %v4723_v7  ;;  %v2792_v7 = vld [vmem:[#allocation3 + $0x28] sm:$0xff] }
0x127c   : > { %4728 = vmatprep.subr.bf16.mxu1 %v4727_v5 }
0x127f   : > { %4730 = vmatpush3.bf16.msra.mxu1 %v4727_v5  ;;  %v2794_v5 = vld [vmem:[#allocation3 + $0x38] sm:$0xff] }
0x1286   : > { %v1868_v16 = vpop.permute.xlu0 %1867 }
0x1287   : > { %v1870_v37 = vmul.f32 %v5314_v44, %v1868_v16  ;;  %v3098_v44 = vld [vmem:[%s7214_s26 + $0x28] sm:$0xff] }
0x1288   : > { %v4731_v16 = vpack.c.bf16 %v3098_v44, %v3097_v46  ;;  %v2763_v46 = vld [vmem:[#allocation2] sm:$0xff]  ;;  %v2764_v44 = vld [vmem:[#allocation2 + $0x8] sm:$0xff] }
0x1289   : > { %1872 = vrot.lane.b32.xlu0 %v1870_v37, %s5581_s14  ;;  %v3099_v37 = vld [vmem:[%s7214_s26 + $0x30] sm:$0xff] }
0x128a   : > { %4732 = vmatprep.subr.bf16.mxu1 %v4731_v16  ;;  %v4735_v4 = vpack.c.bf16 %v3100_v52, %v3099_v37  ;;  %v2766_v37 = vld [vmem:[#allocation2 + $0x18] sm:$0xff]  ;;  %v2767_v52 = vld [vmem:[#allocation2 + $0x20] sm:$0xff] }
0x128b   : > { %4734 = vmatpush3.bf16.msra.mxu1 %v4731_v16  ;;  %v2765_v16 = vld [vmem:[#allocation2 + $0x10] sm:$0xff] }
0x128c   : > { %4736 = vmatprep.subr.bf16.mxu1 %v4735_v4 }
0x128f   : > { %4738 = vmatpush3.bf16.msra.mxu1 %v4735_v4  ;;  %v2768_v4 = vld [vmem:[#allocation2 + $0x28] sm:$0xff] }
0x12eb   : > { %v2752_v57 = vpop.permute.xlu1 %2751 }
0x12ec   : > { %v2754_v15 = vadd.f32 %v2752_v57, %v2744_v0  ;;  %v2771_v0 = vld [vmem:[#allocation10] sm:$0xff]  ;;  %v2778_v57 = vld [vmem:[#allocation10 + $0x38] sm:$0xff] }
0x12ed   : > { %v4711_v1 = vpack.c.bf16 %v2778_v57, %v2776_v2  ;;  %v3108_v2 = vld [vmem:[%s7214_s26 + $0x78] sm:$0xff] }
0x12ee   : > { %5315 = vtanh.f32 %v2754_v15  ;;  %v4709_v15 = vpack.c.bf16 %v2773_v23, %v2771_v0  ;;  %v3107_v23 = vld [vmem:[%s7214_s26 + $0x70] sm:$0xff] }
0x12ef   : > { %v4751_v57 = vpack.c.bf16 %v3108_v2, %v3107_v23  ;;  %v3474_v2 = vld [vmem:[#allocation13 + $0x70] sm:$0xff] }
0x12f8   : > { %v5316_v27 = vpop.eup %5315 }
0x12f9   : > { %2757 = vrot.lane.b32.xlu1 %v5316_v27, %s5581_s14 }
0x12fb   : > { %v1873_v29 = vpop.permute.xlu0 %1872 }
0x12fc   : > { %v1875_v56 = vadd.f32 %v1873_v29, %v1865_v28  ;;  %v2783_v28 = vld [vmem:[#allocation10 + $0x60] sm:$0xff]  ;;  %v2785_v29 = vld [vmem:[#allocation10 + $0x70] sm:$0xff] }
0x12fd   : > { %v4721_v30 = vpack.c.bf16 %v2785_v29, %v2783_v28 }
0x12fe   : > { %5317 = vtanh.f32 %v1875_v56 }
0x12ff   : > { %5319 = vpow2.f32 %v4261_v43  ;;  %v2769_v43 = vld [vmem:[#allocation2 + $0x30] sm:$0xff] }
0x1300   : > { %5321 = vpow2.f32 %v4238_v11  ;;  %v3101_v11 = vld [vmem:[%s7214_s26 + $0x40] sm:$0xff] }
0x1308   : > { %v5318_v19 = vpop.eup %5317 }
0x1309   : > { %1878 = vrot.lane.b32.xlu0 %v5318_v19, %s5581_s14  ;;  %v5320_v33 = vpop.eup %5319  ;;  %v2789_v19 = vld [vmem:[#allocation3 + $0x10] sm:$0xff] }
0x130a   : > { %v2738_v49 = vadd.f32 1.0, %v5320_v33  ;;  %v5322_v3 = vpop.eup %5321 }
0x130b   : > { %v1859_v32 = vadd.f32 1.0, %v5322_v3 }
0x130c   : > { %5323 = vrcp.f32 %v2738_v49  ;;  %v3102_v49 = vld [vmem:[%s7214_s26 + $0x48] sm:$0xff] }
0x130d   : > { %5325 = vrcp.f32 %v1859_v32  ;;  %v4739_v3 = vpack.c.bf16 %v3102_v49, %v3101_v11  ;;  %v3105_v32 = vld [vmem:[%s7214_s26 + $0x60] sm:$0xff]  ;;  %v3473_v49 = vld [vmem:[#allocation13 + $0x68] sm:$0xff] }
0x130f   : > { %4740 = vmatprep.subr.bf16.mxu1 %v4739_v3 }
0x1310   : > { %4742 = vmatpush3.bf16.msra.mxu1 %v4739_v3  ;;  %v3471_v3 = vld [vmem:[#allocation13 + $0x58] sm:$0xff] }
0x1316   : > { %v5324_v60 = vpop.eup %5323 }
0x1317   : > { %v5326_v62 = vpop.eup %5325 }
0x136b   : > { %v2758_v58 = vpop.permute.xlu1 %2757 }
0x136c   : > { %v2760_v53 = vmul.f32 %v5324_v60, %v2758_v58  ;;  %v3103_v60 = vld [vmem:[%s7214_s26 + $0x50] sm:$0xff]  ;;  %v3104_v58 = vld [vmem:[%s7214_s26 + $0x58] sm:$0xff] }
0x136e   : > { %v2761_v13 = vsel %vm1082_vm5, %v2760_v53, 0.0  ;;  %v4743_v53 = vpack.c.bf16 %v3104_v58, %v3103_v60  ;;  %v3475_v60 = vld [vmem:[#allocation13 + $0x78] sm:$0xff] }
0x136f   : > { %2762 = vst.msk [vmem:[#allocation3] sm:$0xff] %vm971_vm3, %v2761_v13  ;;  %v3106_v13 = vld [vmem:[%s7214_s26 + $0x68] sm:$0xff] }
0x1370   : > { %4744 = vmatprep.subr.bf16.mxu1 %v4743_v53  ;;  %v4747_v0 = vpack.c.bf16 %v3106_v13, %v3105_v32  ;;  %v3468_v32 = vld [vmem:[#allocation13 + $0x40] sm:$0xff] }
0x1371   : > { %4746 = vmatpush3.bf16.msra.mxu1 %v4743_v53  ;;  %v4791_v53 = vpack.c.bf16 %v3475_v60, %v3471_v3  ;;  %v3472_v13 = vld [vmem:[#allocation13 + $0x60] sm:$0xff] }
0x1372   : > { %4748 = vmatprep.subr.bf16.mxu1 %v4747_v0  ;;  %v4761_v23 = vpack.c.bf16 %v3472_v13, %v3468_v32 }
0x1375   : > { %4750 = vmatpush3.bf16.msra.mxu1 %v4747_v0  ;;  %v3470_v0 = vld [vmem:[#allocation13 + $0x50] sm:$0xff] }
0x1376   : > { %v2787_v6 = vld [vmem:[#allocation3] sm:$0xff]  ;;  %4752 = vmatprep.subr.bf16.mxu1 %v4751_v57 }
0x1377   : > { %4262 = vmatmul.mubr.msk.f32.vlgmr.msra.gmra.mrb[16].mxu0 %vm971_vm3, %v2787_v6 }
0x1378   : > { %4710 = vmatpush1.bf16.msra.mxu0 %v4709_v15  ;;  %2905 = vmatprep.mubr.f32.mxu0 %v5579_v8 }
0x1379   : > { %4712 = vmatprep.subr.bf16.mxu0 %v4711_v1  ;;  %4754 = vmatpush3.bf16.msra.mxu1 %v4751_v57  ;;  %v3477_v57 = vld [vmem:[#allocation13 + $0x88] sm:$0xff] }
0x137b   : > { %v1879_v41 = vpop.permute.xlu0 %1878  ;;  %4263 = vmatmul.mubr.msk.f32.gmra.mrb[18].mxu0 %vm971_vm3, %v2788_v42 }
0x137c   : > { %v1881_v27 = vmul.f32 %v5326_v62, %v1879_v41  ;;  %2911 = vmatprep.mubr.f32.mxu0 %v5579_v8  ;;  %4714 = vmatpush1.bf16.msra.mxu0 %v4713_v17 }
0x137d   : > { %4716 = vmatprep.subr.bf16.mxu0 %v4715_v20 }
0x137e   : > { %v1887_v56 = vsel %vm1886_vm4, %v1881_v27, 0.0 }
0x137f   : > { %1888 = vst.msk [vmem:[#allocation2 + $0x38] sm:$0xff] %vm971_vm3, %v1887_v56  ;;  %4264 = vmatmul.mubr.msk.f32.gmra.mrb[20].mxu0 %vm971_vm3, %v2789_v19 }
0x1380   : > { %2917 = vmatprep.mubr.f32.mxu0 %v5579_v8  ;;  %4718 = vmatpush1.bf16.msra.mxu0 %v4717_v38 }
0x1381   : > { %4720 = vmatprep.subr.bf16.mxu0 %v4719_v31 }
0x1383   : > { %4265 = vmatmul.mubr.msk.f32.gmra.mrb[22].mxu0 %vm971_vm3, %v2790_v39  ;;  %v5582_v39 = vmov 1  }
0x1384   : > { %2923 = vmatprep.mubr.f32.mxu0 %v5579_v8  ;;  %4722 = vmatpush1.bf16.msra.mxu0 %v4721_v30 }
0x1385   : > { %5131 = vset.pattern.permute.xlu0 %v5582_v39  ;;  %5130 = vset.pattern.permute.xlu1 %v5582_v39 }
0x1386   : > { %v2770_v33 = vld [vmem:[#allocation2 + $0x38] sm:$0xff] }
0x1387   : > { %4266 = vmatmul.mubr.msk.f32.gmra.mrb[24].mxu0 %vm971_vm3, %v2791_v47  ;;  %v3461_v47 = vld [vmem:[#allocation13 + $0x8] sm:$0xff] }
0x1388   : > { %2929 = vmatprep.mubr.f32.mxu0 %v5579_v8 }
0x138b   : > { %4267 = vmatmul.mubr.msk.f32.gmra.mrb[26].mxu0 %vm971_vm3, %v2792_v7  ;;  %v3465_v7 = vld [vmem:[#allocation13 + $0x28] sm:$0xff] }
0x138c   : > { %2935 = vmatprep.mubr.f32.mxu0 %v5579_v8 }
0x138f   : > { %4268 = vmatmul.mubr.msk.f32.gmra.mrb[28].mxu0 %vm971_vm3, %v2793_v25  ;;  %v3463_v25 = vld [vmem:[#allocation13 + $0x18] sm:$0xff] }
0x1390   : > { %2941 = vmatprep.mubr.f32.mxu0 %v5579_v8 }
0x1393   : > { %4269 = vmatmul.mubr.msk.f32.gmra.mrb[30].mxu0 %vm971_vm3, %v2794_v5  ;;  %v4755_v5 = vpack.c.bf16 %v3465_v7, %v3461_v47  ;;  %v3491_v47 = vld [vmem:[#allocation13 + $0xf8] sm:$0xff] }
0x1394   : > { %3036 = vmatprep.mubr.f32.mxu0 %v5579_v8 }
0x1395   : > { %4756 = vmatprep.subr.bf16.mxu1 %v4755_v5 }
0x1397   : > { %4270 = vmatmul.mubr.msk.f32.vlgmr.msra.gmra.mrb[16].mxu0 %vm971_vm3, %v2763_v46  ;;  %v3467_v46 = vld [vmem:[#allocation13 + $0x38] sm:$0xff] }
0x1398   : > { %3042 = vmatprep.mubr.f32.mxu0 %v5579_v8 }
0x139b   : > { %4271 = vmatmul.mubr.msk.f32.gmra.mrb[18].mxu0 %vm971_vm3, %v2764_v44  ;;  %v3460_v44 = vld [vmem:[#allocation13] sm:$0xff] }
0x139c   : > { %3048 = vmatprep.mubr.f32.mxu0 %v5579_v8 }
0x139f   : > { %4272 = vmatmul.mubr.msk.f32.gmra.mrb[20].mxu0 %vm971_vm3, %v2765_v16  ;;  %v3464_v16 = vld [vmem:[#allocation13 + $0x20] sm:$0xff] }
0x13a0   : > { %3054 = vmatprep.mubr.f32.mxu0 %v5579_v8 }
0x13a3   : > { %4273 = vmatmul.mubr.msk.f32.gmra.mrb[22].mxu0 %vm971_vm3, %v2766_v37  ;;  %v4787_v37 = vpack.c.bf16 %v3467_v46, %v3463_v25 }
0x13a4   : > { %3060 = vmatprep.mubr.f32.mxu0 %v5579_v8 }
0x13a5   : > { %4788 = vmatprep.subr.bf16.mxu0 %v4787_v37 }
0x13a7   : > { %4274 = vmatmul.mubr.msk.f32.gmra.mrb[24].mxu0 %vm971_vm3, %v2767_v52  ;;  %v4757_v52 = vpack.c.bf16 %v3464_v16, %v3460_v44 }
0x13a8   : > { %3066 = vmatprep.mubr.f32.mxu0 %v5579_v8 }
0x13ab   : > { %4275 = vmatmul.mubr.msk.f32.gmra.mrb[26].mxu0 %vm971_vm3, %v2768_v4  ;;  %v3462_v4 = vld [vmem:[#allocation13 + $0x10] sm:$0xff] }
0x13ac   : > { %3072 = vmatprep.mubr.f32.mxu0 %v5579_v8 }
0x13af   : > { %4276 = vmatmul.mubr.msk.f32.gmra.mrb[28].mxu0 %vm971_vm3, %v2769_v43  ;;  %v3466_v43 = vld [vmem:[#allocation13 + $0x30] sm:$0xff] }
0x13b0   : > { %3078 = vmatprep.mubr.f32.mxu0 %v5579_v8  ;;  %v4789_v11 = vpack.c.bf16 %v3466_v43, %v3462_v4 }
0x13b2   : > { %4790 = vmatpush1.bf16.msra.mxu0 %v4789_v11 }
0x13b3   : > { %4277 = vmatmul.mubr.msk.f32.gmra.mrb[30].mxu0 %vm971_vm3, %v2770_v33  ;;  %v3469_v33 = vld [vmem:[#allocation13 + $0x48] sm:$0xff]  ;;  %4792 = vmatprep.subr.bf16.mxu0 %v4791_v53  ;;  %vm4045_vm3 = vcmask 23552  }
0x13b4   : > { %3659 = vmatprep.mubr.f32.mxu0 %v5579_v8  ;;  %v4759_v58 = vpack.c.bf16 %v3473_v49, %v3469_v33 }
0x146a   : > { %v6639_v15 = vpop.f32.mrb[16].mxu0 }
0x146b   : > { %v3040_v1 = vpop.f32.mrb[17].mxu0 }
0x146c   : > { %5327 = vtanh.f32 %v3040_v1  ;;  %v3481_v1 = vld [vmem:[#allocation13 + $0xa8] sm:$0xff] }
0x146e   : > { %v6641_v14 = vpop.f32.mrb[18].mxu0 }
0x146f   : > { %v3046_v59 = vpop.f32.mrb[19].mxu0 }
0x1470   : > { %5329 = vtanh.f32 %v3046_v59  ;;  %v4793_v59 = vpack.c.bf16 %v3474_v2, %v3470_v0 }
0x1472   : > { %v6643_v6 = vpop.f32.mrb[20].mxu0  ;;  %4794 = vmatpush1.bf16.msra.mxu0 %v4793_v59 }
0x1473   : > { %v3052_v9 = vpop.f32.mrb[21].mxu0 }
0x1474   : > { %5331 = vtanh.f32 %v3052_v9  ;;  %v4763_v9 = vpack.c.bf16 %v3481_v1, %v3477_v57 }
0x1476   : > { %v5328_v18 = vpop.eup %5327  ;;  %v6645_v17 = vpop.f32.mrb[22].mxu0 }
0x1477   : > { %v3058_v20 = vpop.f32.mrb[23].mxu0  ;;  %4407 = vmatprep.mubr.f32.mxu1 %v5328_v18  ;;  %v3479_v18 = vld [vmem:[#allocation13 + $0x98] sm:$0xff] }
0x1478   : > { %5333 = vtanh.f32 %v3058_v20  ;;  %v3483_v20 = vld [vmem:[#allocation13 + $0xb8] sm:$0xff] }
0x147a   : > { %v5330_v24 = vpop.eup %5329  ;;  %v6647_v51 = vpop.f32.mrb[24].mxu0 }
0x147b   : > { %v3064_v42 = vpop.f32.mrb[25].mxu0  ;;  %4408 = vmatmul.mubr.f32.vlgmr.msra.gmra.mrb[20].mxu1 %v5330_v24  ;;  %v3476_v24 = vld [vmem:[#allocation13 + $0x80] sm:$0xff] }
0x147c   : > { %5335 = vtanh.f32 %v3064_v42  ;;  %4758 = vmatpush1.bf16.msra.mxu1 %v4757_v52  ;;  %v4795_v42 = vpack.c.bf16 %v3483_v20, %v3479_v18 }
0x147d   : > { %4760 = vmatprep.subr.bf16.mxu1 %v4759_v58 }
0x147e   : > { %v5332_v40 = vpop.eup %5331  ;;  %v6649_v12 = vpop.f32.mrb[26].mxu0  ;;  %4796 = vmatprep.subr.bf16.mxu0 %v4795_v42 }
0x147f   : > { %v3070_v62 = vpop.f32.mrb[27].mxu0  ;;  %4410 = vmatprep.mubr.f32.mxu1 %v5332_v40  ;;  %v3480_v40 = vld [vmem:[#allocation13 + $0xa0] sm:$0xff] }
0x1480   : > { %5337 = vtanh.f32 %v3070_v62  ;;  %v3478_v62 = vld [vmem:[#allocation13 + $0x90] sm:$0xff]  ;;  %4762 = vmatpush1.bf16.msra.mxu1 %v4761_v23 }
0x1481   : > { %4764 = vmatprep.subr.bf16.mxu1 %v4763_v9 }
0x1482   : > { %v5334_v41 = vpop.eup %5333  ;;  %v6651_v27 = vpop.f32.mrb[28].mxu0 }
0x1483   : > { %v3076_v38 = vpop.f32.mrb[29].mxu0  ;;  %4411 = vmatmul.mubr.f32.gmra.mrb[22].mxu1 %v5334_v41  ;;  %v3482_v41 = vld [vmem:[#allocation13 + $0xb0] sm:$0xff] }
0x1484   : > { %5339 = vtanh.f32 %v3076_v38  ;;  %v4765_v38 = vpack.c.bf16 %v3480_v40, %v3476_v24 }
0x1486   : > { %v5336_v31 = vpop.eup %5335  ;;  %v6653_v28 = vpop.f32.mrb[30].mxu0  ;;  %4766 = vmatpush1.bf16.msra.mxu1 %v4765_v38 }
0x1487   : > { %v3082_v29 = vpop.f32.mrb[31].mxu0  ;;  %4413 = vmatprep.mubr.f32.mxu1 %v5336_v31  ;;  %v3485_v31 = vld [vmem:[#allocation13 + $0xc8] sm:$0xff] }
0x1488   : > { %5341 = vtanh.f32 %v3082_v29  ;;  %v3489_v29 = vld [vmem:[#allocation13 + $0xe8] sm:$0xff] }
0x148a   : > { %v5338_v56 = vpop.eup %5337 }
0x148b   : > { %4414 = vmatmul.mubr.f32.gmra.mrb[24].mxu1 %v5338_v56  ;;  %v3487_v56 = vld [vmem:[#allocation13 + $0xd8] sm:$0xff] }
0x148c   : > { %v4799_v25 = vpack.c.bf16 %v3491_v47, %v3487_v56 }
0x148e   : > { %v5340_v19 = vpop.eup %5339 }
0x148f   : > { %4416 = vmatprep.mubr.f32.mxu1 %v5340_v19  ;;  %v4797_v19 = vpack.c.bf16 %v3482_v41, %v3478_v62 }
0x1491   : > { %4798 = vmatpush1.bf16.msra.mxu0 %v4797_v19 }
0x1492   : > { %v5342_v30 = vpop.eup %5341  ;;  %4800 = vmatprep.subr.bf16.mxu0 %v4799_v25 }
0x1493   : > { %4417 = vmatmul.mubr.f32.gmra.mrb[26].mxu1 %v5342_v30  ;;  %v4767_v30 = vpack.c.bf16 %v3489_v29, %v3485_v31 }
0x1494   : > { %3588 = vmatprep.mubr.f32.mxu1 %v5579_v8 }
0x1495   : > { %4768 = vmatprep.subr.bf16.mxu1 %v4767_v30 }
0x154e   : > { %v4409_v7 = vpop.f32.mrb[20].mxu1 }
0x154f   : > { %v3175_v5 = vpop.f32.mrb[21].mxu1  ;;  %v3215_v16 = vmul.f32 0.33333334, %v4409_v7 }
0x1550   : > { %v3214_v37 = vmul.f32 0.33333334, %v3175_v5 }
0x1551   : > { %v3223_v4 = vsel %vm1196_vm9, %v3215_v16, -1e+09 }
0x1552   : > { %v3222_v11 = vsel %vm1082_vm5, %v3214_v37, -1e+09  ;;  %v3232_v60 = vsel %vm3230_vm2, %v3223_v4, -inf }
0x1553   : > { %v3231_v61 = vsel %vm3230_vm2, %v3222_v11, -inf }
0x1556   : > { %v4412_v46 = vpop.f32.mrb[22].mxu1 }
0x1557   : > { %v3185_v44 = vpop.f32.mrb[23].mxu1  ;;  %v3217_v32 = vmul.f32 0.33333334, %v4412_v46 }
0x1558   : > { %v3216_v23 = vmul.f32 0.33333334, %v3185_v44 }
0x1559   : > { %v3225_v10 = vsel %vm1426_vm1, %v3217_v32, -1e+09 }
0x155a   : > { %v3224_v9 = vsel %vm1311_vm13, %v3216_v23, -1e+09  ;;  %v3234_v20 = vsel %vm3230_vm2, %v3225_v10, -inf }
0x155b   : > { %v3233_v40 = vsel %vm3230_vm2, %v3224_v9, -inf }
0x155e   : > { %v4415_v52 = vpop.f32.mrb[24].mxu1 }
0x155f   : > { %v3219_v43 = vmul.f32 0.33333334, %v4415_v52  ;;  %v3195_v33 = vpop.f32.mrb[25].mxu1 }
0x1560   : > { %v3218_v49 = vmul.f32 0.33333334, %v3195_v33 }
0x1561   : > { %v3227_v3 = vsel %vm1656_vm12, %v3219_v43, -1e+09 }
0x1562   : > { %v3237_v58 = vsel %vm3230_vm2, %v3227_v3, -inf  ;;  %v3226_v53 = vsel %vm1541_vm0, %v3218_v49, -1e+09 }
0x1563   : > { %v3238_v13 = vmax.f32 %v3232_v60, %v3237_v58  ;;  %v3235_v0 = vsel %vm3230_vm2, %v3226_v53, -inf }
0x1564   : > { %v3236_v63 = vmax.f32 %v3231_v61, %v3235_v0 }
0x1566   : > { %v3243_v2 = vmax.f32 %v3236_v63, %v3238_v13  ;;  %v4418_v57 = vpop.f32.mrb[26].mxu1 }
0x1567   : > { %v3221_v1 = vmul.f32 0.33333334, %v4418_v57  ;;  %v3205_v59 = vpop.f32.mrb[27].mxu1 }
0x1568   : > { %v3220_v21 = vmul.f32 0.33333334, %v3205_v59 }
0x1569   : > { %v3229_v18 = vsel %vm1886_vm4, %v3221_v1, -1e+09 }
0x156a   : > { %v3241_v24 = vsel %vm3230_vm2, %v3229_v18, -inf  ;;  %v3228_v42 = vsel %vm1771_vm8, %v3220_v21, -1e+09 }
0x156b   : > { %v3242_v55 = vmax.f32 %v3234_v20, %v3241_v24  ;;  %v3239_v62 = vsel %vm3230_vm2, %v3228_v42, -inf }
0x156c   : > { %v3240_v41 = vmax.f32 %v3233_v40, %v3239_v62  ;;  %v3484_v62 = vld [vmem:[#allocation13 + $0xc0] sm:$0xff] }
0x156e   : > { %v3244_v38 = vmax.f32 %v3240_v41, %v3242_v55  ;;  %v3488_v41 = vld [vmem:[#allocation13 + $0xe0] sm:$0xff] }
0x1570   : > { %v3245_v45 = vmax.f32 %v3243_v2, %v3244_v38  ;;  %v3486_v38 = vld [vmem:[#allocation13 + $0xd0] sm:$0xff] }
0x1572   : > { %v3248_v31 = vsub.f32 %v3224_v9, %v3245_v45  ;;  %v3249_v29 = vsub.f32 %v3225_v10, %v3245_v45  ;;  %v3250_v56 = vsub.f32 %v3226_v53, %v3245_v45  ;;  %v3251_v48 = vsub.f32 %v3227_v3, %v3245_v45 }
0x1573   : > { %v3252_v19 = vsub.f32 %v3228_v42, %v3245_v45  ;;  %v3253_v30 = vsub.f32 %v3229_v18, %v3245_v45  ;;  %v3246_v47 = vsub.f32 %v3222_v11, %v3245_v45  ;;  %v3247_v7 = vsub.f32 %v3223_v4, %v3245_v45 }
0x1574   : > { %v3258_v22 = vmul.f32 1.442695, %v3248_v31  ;;  %v3260_v46 = vmul.f32 1.442695, %v3249_v29  ;;  %v3262_v44 = vmul.f32 1.442695, %v3250_v56 }
0x1575   : > { %v3254_v25 = vmul.f32 1.442695, %v3246_v47  ;;  %v3256_v5 = vmul.f32 1.442695, %v3247_v7  ;;  %v3264_v16 = vmul.f32 1.442695, %v3251_v48 }
0x1576   : > { %v3266_v37 = vmul.f32 1.442695, %v3252_v19  ;;  %v3268_v52 = vmul.f32 1.442695, %v3253_v30  ;;  %v3490_v48 = vld [vmem:[#allocation13 + $0xf0] sm:$0xff]  ;;  %v4769_v19 = vpack.c.bf16 %v3488_v41, %v3484_v62  ;;  %v3493_v47 = vld [vmem:[#allocation13 + $0x108] sm:$0xff] }
0x1577   : > { %5343 = vpow2.f32 %v3254_v25  ;;  %v4801_v30 = vpack.c.bf16 %v3490_v48, %v3486_v38  ;;  %v3497_v7 = vld [vmem:[#allocation13 + $0x128] sm:$0xff]  ;;  %v3495_v25 = vld [vmem:[#allocation13 + $0x118] sm:$0xff]  ;;  %v3514_v62 = vld [vmem:[#allocation13 + $0x1b0] sm:$0xff] }
0x1578   : > { %5345 = vpow2.f32 %v3256_v5  ;;  %4770 = vmatpush1.bf16.msra.mxu1 %v4769_v19  ;;  %v4771_v5 = vpack.c.bf16 %v3497_v7, %v3493_v47  ;;  %v3517_v38 = vld [vmem:[#allocation13 + $0x1c8] sm:$0xff]  ;;  %v3519_v19 = vld [vmem:[#allocation13 + $0x1d8] sm:$0xff]  ;;  %v3516_v7 = vld [vmem:[#allocation13 + $0x1c0] sm:$0xff] }
0x1579   : > { %5347 = vpow2.f32 %v3258_v22  ;;  %4802 = vmatpush1.bf16.msra.mxu0 %v4801_v30  ;;  %v3499_v22 = vld [vmem:[#allocation13 + $0x138] sm:$0xff]  ;;  %v3521_v48 = vld [vmem:[#allocation13 + $0x1e8] sm:$0xff] }
0x157a   : > { %5349 = vpow2.f32 %v3260_v46  ;;  %v3492_v46 = vld [vmem:[#allocation13 + $0x100] sm:$0xff]  ;;  %4772 = vmatprep.subr.bf16.mxu1 %v4771_v5  ;;  %v4783_v30 = vpack.c.bf16 %v3521_v48, %v3517_v38  ;;  %v3523_v47 = vld [vmem:[#allocation13 + $0x1f8] sm:$0xff] }
0x157b   : > { %5351 = vpow2.f32 %v3262_v44  ;;  %v3496_v44 = vld [vmem:[#allocation13 + $0x120] sm:$0xff]  ;;  %v4815_v5 = vpack.c.bf16 %v3523_v47, %v3519_v19 }
0x157c   : > { %5353 = vpow2.f32 %v3264_v16  ;;  %v4803_v16 = vpack.c.bf16 %v3499_v22, %v3495_v25  ;;  %v3520_v25 = vld [vmem:[#allocation13 + $0x1e0] sm:$0xff] }
0x157d   : > { %5355 = vpow2.f32 %v3266_v37  ;;  %v4773_v37 = vpack.c.bf16 %v3496_v44, %v3492_v46  ;;  %v4785_v22 = vpack.c.bf16 %v3520_v25, %v3516_v7  ;;  %v3518_v46 = vld [vmem:[#allocation13 + $0x1d0] sm:$0xff]  ;;  %v3404_v48 = vld [vmem:[%s7216_s22 + $0x40] sm:$0xff] }
0x157e   : > { %5357 = vpow2.f32 %v3268_v52  ;;  %v3494_v52 = vld [vmem:[#allocation13 + $0x110] sm:$0xff]  ;;  %4804 = vmatprep.subr.bf16.mxu0 %v4803_v16  ;;  %v3408_v19 = vld [vmem:[%s7216_s22 + $0x60] sm:$0xff] }
0x157f   : > { %4774 = vmatpush1.bf16.msra.mxu1 %v4773_v37  ;;  %v3522_v44 = vld [vmem:[#allocation13 + $0x1f0] sm:$0xff]  ;;  %v3401_v37 = vld [vmem:[%s7216_s22 + $0x28] sm:$0xff] }
0x1580   : > { %v4817_v16 = vpack.c.bf16 %v3522_v44, %v3518_v46  ;;  %v3406_v25 = vld [vmem:[%s7216_s22 + $0x50] sm:$0xff]  ;;  %v3417_v46 = vld [vmem:[%s7216_s22 + $0xa8] sm:$0xff]  ;;  %v3415_v44 = vld [vmem:[%s7216_s22 + $0x98] sm:$0xff] }
0x1581   : > { %v5344_v43 = vpop.eup %5343 }
0x1582   : > { %v5346_v33 = vpop.eup %5345  ;;  %v3270_v4 = vsel %vm3230_vm2, %v5344_v43, 0.0 }
0x1583   : > { %v5348_v11 = vpop.eup %5347  ;;  %v3271_v49 = vsel %vm3230_vm2, %v5346_v33, 0.0 }
0x1584   : > { %v5350_v3 = vpop.eup %5349  ;;  %v3272_v60 = vadd.f32 %v3271_v49, %v3270_v4  ;;  %v3273_v58 = vsel %vm3230_vm2, %v5348_v11, 0.0  ;;  %v3501_v4 = vld [vmem:[#allocation13 + $0x148] sm:$0xff]  ;;  %v3503_v49 = vld [vmem:[#allocation13 + $0x158] sm:$0xff] }
0x1585   : > { %v5352_v53 = vpop.eup %5351  ;;  %v3275_v32 = vsel %vm3230_vm2, %v5350_v3, 0.0 }
0x1586   : > { %v3274_v61 = vadd.f32 %v3273_v58, %v3272_v60  ;;  %v5354_v13 = vpop.eup %5353  ;;  %v3277_v23 = vsel %vm3230_vm2, %v5352_v53, 0.0  ;;  %v3507_v60 = vld [vmem:[#allocation13 + $0x178] sm:$0xff]  ;;  %v3500_v58 = vld [vmem:[#allocation13 + $0x140] sm:$0xff] }
0x1587   : > { %v5356_v63 = vpop.eup %5355  ;;  %v3279_v57 = vsel %vm3230_vm2, %v5354_v13, 0.0 }
0x1588   : > { %v3276_v0 = vadd.f32 %v3275_v32, %v3274_v61  ;;  %v5358_v10 = vpop.eup %5357  ;;  %v3281_v59 = vsel %vm3230_vm2, %v5356_v63, 0.0  ;;  %v4807_v61 = vpack.c.bf16 %v3507_v60, %v3503_v49 }
0x1589   : > { %v3283_v21 = vsel %vm3230_vm2, %v5358_v10, 0.0 }
0x158a   : > { %v3278_v2 = vadd.f32 %v3277_v23, %v3276_v0  ;;  %v3506_v0 = vld [vmem:[#allocation13 + $0x170] sm:$0xff] }
0x158c   : > { %v3280_v1 = vadd.f32 %v3279_v57, %v3278_v2  ;;  %v3513_v2 = vld [vmem:[#allocation13 + $0x1a8] sm:$0xff]  ;;  %v3511_v57 = vld [vmem:[#allocation13 + $0x198] sm:$0xff] }
0x158e   : > { %v3282_v9 = vadd.f32 %v3281_v59, %v3280_v1  ;;  %v3515_v1 = vld [vmem:[#allocation13 + $0x1b8] sm:$0xff]  ;;  %v3508_v59 = vld [vmem:[#allocation13 + $0x180] sm:$0xff] }
0x1590   : > { %v3284_v18 = vadd.f32 %v3283_v21, %v3282_v9  ;;  %v3512_v9 = vld [vmem:[#allocation13 + $0x1a0] sm:$0xff]  ;;  %v4811_v21 = vpack.c.bf16 %v3515_v1, %v3511_v57  ;;  %v3398_v57 = vld [vmem:[%s7216_s22 + $0x10] sm:$0xff]  ;;  %v3405_v1 = vld [vmem:[%s7216_s22 + $0x48] sm:$0xff] }
0x1592   : > { %5359 = vrcp.f32 %v3284_v18  ;;  %v4781_v18 = vpack.c.bf16 %v3512_v9, %v3508_v59  ;;  %v3409_v9 = vld [vmem:[%s7216_s22 + $0x68] sm:$0xff] }
0x1593   : > { %v4823_v47 = vpack.c.bf16 %v3409_v9, %v3405_v1 }
0x159c   : > { %v5360_v20 = vpop.eup %5359 }
0x159d   : > { %v6690_v24 = vmul.f32 %v5360_v20, %v5346_v33  ;;  %v6692_v42 = vmul.f32 %v5360_v20, %v5344_v43  ;;  %v6694_v40 = vmul.f32 %v5360_v20, %v5352_v53  ;;  %v6696_v55 = vmul.f32 %v5360_v20, %v5348_v11  ;;  %v3498_v43 = vld [vmem:[#allocation13 + $0x130] sm:$0xff]  ;;  %v3505_v11 = vld [vmem:[#allocation13 + $0x168] sm:$0xff]  ;;  %v3504_v53 = vld [vmem:[#allocation13 + $0x160] sm:$0xff] }
0x159e   : > { %v6698_v45 = vmul.f32 %v5360_v20, %v5356_v63  ;;  %v6700_v31 = vmul.f32 %v5360_v20, %v5350_v3  ;;  %v6702_v29 = vmul.f32 %v5360_v20, %v5354_v13  ;;  %v6704_v56 = vmul.f32 %v5360_v20, %v5358_v10  ;;  %v3502_v13 = vld [vmem:[#allocation13 + $0x150] sm:$0xff]  ;;  %v3509_v63 = vld [vmem:[#allocation13 + $0x188] sm:$0xff] }
0x159f   : > { %3354 = vperm.xlu0 %5131, %v6690_v24   ;;  %3350 = vperm.xlu1 %5130, %v6692_v42   ;;  %v4805_v33 = vpack.c.bf16 %v3498_v43, %v3494_v52  ;;  %v4775_v3 = vpack.c.bf16 %v3505_v11, %v3501_v4  ;;  %v4777_v32 = vpack.c.bf16 %v3504_v53, %v3500_v58  ;;  %v3510_v20 = vld [vmem:[#allocation13 + $0x190] sm:$0xff]  ;;  %v3399_v52 = vld [vmem:[%s7216_s22 + $0x18] sm:$0xff] }
0x15a0   : > { %v4809_v23 = vpack.c.bf16 %v3506_v0, %v3502_v13  ;;  %v4779_v10 = vpack.c.bf16 %v3513_v2, %v3509_v63  ;;  %v4813_v41 = vpack.c.bf16 %v3514_v62, %v3510_v20  ;;  %v3396_v13 = vld [vmem:[%s7216_s22] sm:$0xff] }
0x15a1   : > { %4806 = vmatpush1.bf16.msra.mxu0 %v4805_v33  ;;  %4776 = vmatprep.subr.bf16.mxu1 %v4775_v3  ;;  %v3403_v33 = vld [vmem:[%s7216_s22 + $0x38] sm:$0xff]  ;;  %v3400_v0 = vld [vmem:[%s7216_s22 + $0x20] sm:$0xff] }
0x15a2   : > { %4808 = vmatprep.subr.bf16.mxu0 %v4807_v61  ;;  %4778 = vmatpush1.bf16.msra.mxu1 %v4777_v32 }
0x15a3   : > { %3366 = vperm.xlu0 %5131, %v6694_v40   ;;  %3358 = vperm.xlu1 %5130, %v6696_v55  }
0x15a4   : > { %4780 = vmatprep.subr.bf16.mxu1 %v4779_v10  ;;  %v3402_v10 = vld [vmem:[%s7216_s22 + $0x30] sm:$0xff] }
0x15a5   : > { %4810 = vmatpush1.bf16.msra.mxu0 %v4809_v23  ;;  %v4853_v38 = vpack.c.bf16 %v3402_v10, %v3398_v57  ;;  %v3431_v57 = vld [vmem:[%s7216_s22 + $0x118] sm:$0xff] }
0x15a6   : > { %4812 = vmatprep.subr.bf16.mxu0 %v4811_v21  ;;  %4782 = vmatpush1.bf16.msra.mxu1 %v4781_v18  ;;  %v3407_v21 = vld [vmem:[%s7216_s22 + $0x58] sm:$0xff] }
0x15a7   : > { %3374 = vperm.xlu0 %5131, %v6698_v45   ;;  %3362 = vperm.xlu1 %5130, %v6700_v31   ;;  %v3411_v18 = vld [vmem:[%s7216_s22 + $0x78] sm:$0xff] }
0x15a8   : > { %4784 = vmatprep.subr.bf16.mxu1 %v4783_v30  ;;  %v4855_v7 = vpack.c.bf16 %v3411_v18, %v3407_v21  ;;  %v3435_v10 = vld [vmem:[%s7216_s22 + $0x138] sm:$0xff]  ;;  %v3428_v18 = vld [vmem:[%s7216_s22 + $0x100] sm:$0xff] }
0x15a9   : > { %4814 = vmatpush1.bf16.msra.mxu0 %v4813_v41  ;;  %v4821_v41 = vpack.c.bf16 %v3400_v0, %v3396_v13  ;;  %v3422_v13 = vld [vmem:[%s7216_s22 + $0xd0] sm:$0xff]  ;;  %v3429_v0 = vld [vmem:[%s7216_s22 + $0x108] sm:$0xff] }
0x15aa   : > { %4816 = vmatprep.subr.bf16.mxu0 %v4815_v5  ;;  %4786 = vmatpush1.bf16.msra.mxu1 %v4785_v22  ;;  %v3410_v5 = vld [vmem:[%s7216_s22 + $0x70] sm:$0xff]  ;;  %v3413_v22 = vld [vmem:[%s7216_s22 + $0x88] sm:$0xff] }
0x15ab   : > { %5132 = vset.pattern.permute.xlu0 %v5580_v26  ;;  %3370 = vperm.xlu1 %5130, %v6702_v29  }
0x15ac   : > { %3296 = vperm.xlu0 %5132, %v6692_v42   ;;  %v3397_v42 = vld [vmem:[%s7215_s29 + $0x8] sm:$0xff] }
0x15ad   : > { %v4819_v43 = vpack.c.bf16 %v3401_v37, %v3397_v42  ;;  %4818 = vmatpush1.bf16.msra.mxu0 %v4817_v16  ;;  %v3419_v16 = vld [vmem:[%s7216_s22 + $0xb8] sm:$0xff] }
0x15af   : > { %3378 = vperm.xlu1 %5130, %v6704_v56   ;;  %4820 = vmatprep.subr.bf16.mxu1 %v4819_v43 }
0x15b0   : > { %3311 = vperm.xlu0 %5132, %v6700_v31   ;;  %v4851_v31 = vpack.c.bf16 %v3403_v33, %v3399_v52  ;;  %v4825_v52 = vpack.c.bf16 %v3408_v19, %v3404_v48  ;;  %v3437_v48 = vld [vmem:[%s7216_s22 + $0x148] sm:$0xff] }
0x15b2   : > { %4852 = vmatprep.subr.bf16.mxu0 %v4851_v31  ;;  %v4857_v31 = vpack.c.bf16 %v3410_v5, %v3406_v25  ;;  %v3443_v25 = vld [vmem:[%s7216_s22 + $0x178] sm:$0xff] }
0x15b3   : > { %5133 = vset.pattern.permute.xlu1 %v5580_v26 }
0x15b4   : > { %3321 = vperm.xlu0 %5132, %v6702_v29   ;;  %3301 = vperm.xlu1 %5133, %v6690_v24  }
0x15b8   : > { %3331 = vperm.xlu0 %5132, %v6704_v56   ;;  %3306 = vperm.xlu1 %5133, %v6696_v55  }
0x15bc   : > { %3316 = vperm.xlu1 %5133, %v6694_v40   ;;  %5134 = vset.pattern.permute.xlu0 %v5582_v39 }
0x15c0   : > { %3326 = vperm.xlu1 %5133, %v6698_v45  }
0x161e   : > { %v3355_v4 = vpop.permute.xlu0 %3354  ;;  %v3351_v11 = vpop.permute.xlu1 %3350 }
0x161f   : > { %v3382_v26 = vmul.f32 %v3355_v4, %v6641_v14  ;;  %v3381_v49 = vmul.f32 %v3351_v11, %v6639_v15  ;;  %v3412_v4 = vld [vmem:[%s7216_s22 + $0x80] sm:$0xff] }
0x1620   : > { %v3416_v11 = vld [vmem:[%s7216_s22 + $0xa0] sm:$0xff] }
0x1621   : > { %v3389_v29 = vadd.f32 %v3382_v26, %v3381_v49  ;;  %v4827_v26 = vpack.c.bf16 %v3417_v46, %v3413_v22  ;;  %v4859_v49 = vpack.c.bf16 %v3419_v16, %v3415_v44 }
0x1622   : > { %v3367_v3 = vpop.permute.xlu0 %3366  ;;  %v3359_v24 = vpop.permute.xlu1 %3358 }
0x1623   : > { %v3383_v60 = vmul.f32 %v3359_v24, %v6643_v6  ;;  %v3385_v39 = vmul.f32 %v3367_v3, %v6647_v51  ;;  %v3425_v24 = vld [vmem:[%s7216_s22 + $0xe8] sm:$0xff] }
0x1625   : > { %v3390_v56 = vadd.f32 %v3389_v29, %v3383_v60  ;;  %v3421_v29 = vld [vmem:[%s7216_s22 + $0xc8] sm:$0xff]  ;;  %v3423_v60 = vld [vmem:[%s7216_s22 + $0xd8] sm:$0xff] }
0x1626   : > { %v3363_v58 = vpop.permute.xlu1 %3362  ;;  %v3375_v55 = vpop.permute.xlu0 %3374 }
0x1627   : > { %v3384_v40 = vmul.f32 %v3363_v58, %v6645_v17  ;;  %v3387_v23 = vmul.f32 %v3375_v55, %v6651_v27 }
0x1629   : > { %v3391_v53 = vadd.f32 %v3390_v56, %v3384_v40  ;;  %v3427_v56 = vld [vmem:[%s7216_s22 + $0xf8] sm:$0xff]  ;;  %v4829_v40 = vpack.c.bf16 %v3416_v11, %v3412_v4 }
0x162a   : > { %v3371_v45 = vpop.permute.xlu1 %3370 }
0x162b   : > { %v3392_v61 = vadd.f32 %v3391_v53, %v3385_v39  ;;  %v3386_v32 = vmul.f32 %v3371_v45, %v6649_v12  ;;  %v3297_v2 = vpop.permute.xlu0 %3296  ;;  %v3420_v53 = vld [vmem:[%s7216_s22 + $0xc0] sm:$0xff] }
0x162c   : > { %v3334_v43 = vmul.f32 %v3297_v2, %v6639_v15  ;;  %v3414_v15 = vld [vmem:[%s7216_s22 + $0x90] sm:$0xff]  ;;  %v3424_v45 = vld [vmem:[%s7216_s22 + $0xe0] sm:$0xff]  ;;  %v3433_v2 = vld [vmem:[%s7216_s22 + $0x128] sm:$0xff] }
0x162d   : > { %v3393_v63 = vadd.f32 %v3392_v61, %v3386_v32  ;;  %v4831_v32 = vpack.c.bf16 %v3425_v24, %v3421_v29  ;;  %v3448_v24 = vld [vmem:[%s7216_s22 + $0x1a0] sm:$0xff] }
0x162e   : > { %v3379_v59 = vpop.permute.xlu1 %3378 }
0x162f   : > { %v3394_v20 = vadd.f32 %v3393_v63, %v3387_v23  ;;  %v3388_v62 = vmul.f32 %v3379_v59, %v6653_v28  ;;  %v3312_v42 = vpop.permute.xlu0 %3311  ;;  %v4833_v59 = vpack.c.bf16 %v3424_v45, %v3420_v53  ;;  %v3455_v53 = vld [vmem:[%s7216_s22 + $0x1d8] sm:$0xff] }
0x1630   : > { %v3337_v23 = vmul.f32 %v3312_v42, %v6645_v17  ;;  %v3436_v42 = vld [vmem:[%s7216_s22 + $0x140] sm:$0xff]  ;;  %v3459_v45 = vld [vmem:[%s7216_s22 + $0x1f8] sm:$0xff] }
0x1631   : > { %v3395_v30 = vadd.f32 %v3394_v20, %v3388_v62  ;;  %v3432_v20 = vld [vmem:[%s7216_s22 + $0x120] sm:$0xff]  ;;  %v4835_v62 = vpack.c.bf16 %v3433_v2, %v3429_v0  ;;  %v4879_v0 = vpack.c.bf16 %v3459_v45, %v3455_v53  ;;  %v3859_v53 = vld [vmem:[%s7217_s12 + $0xc8] sm:$0xff] }
0x1632   : > { %v4837_v46 = vpack.c.bf16 %v3432_v20, %v3428_v18  ;;  %v3850_v2 = vld [vmem:[%s7217_s12 + $0x80] sm:$0xff] }
0x1633   : > { %3589 = vmatmul.mubr.f32.vlgmr.msra.gmra.mrb[28].mxu1 %v3395_v30  ;;  %3660 = vmatmul.mubr.f32.vlgmr.msra.gmra.mrb[32].mxu0 %v3395_v30  ;;  %v3302_v37 = vpop.permute.xlu1 %3301  ;;  %v3322_v61 = vpop.permute.xlu0 %3321  ;;  %v3890_v45 = vld [vmem:[%s7217_s12 + $0x1c0] sm:$0xff] }
0x1634   : > { %4822 = vmatpush1.bf16.msra.mxu1 %v4821_v41  ;;  %4854 = vmatpush1.bf16.msra.mxu0 %v4853_v38  ;;  %v3335_v33 = vmul.f32 %v3302_v37, %v6641_v14  ;;  %v3418_v14 = vld [vmem:[%s7216_s22 + $0xb0] sm:$0xff]  ;;  %v4867_v41 = vpack.c.bf16 %v3435_v10, %v3431_v57  ;;  %v3339_v19 = vmul.f32 %v3322_v61, %v6649_v12  ;;  %v3440_v37 = vld [vmem:[%s7216_s22 + $0x160] sm:$0xff]  ;;  %v3851_v57 = vld [vmem:[%s7217_s12 + $0x88] sm:$0xff] }
0x1635   : > { %4824 = vmatprep.subr.bf16.mxu1 %v4823_v47  ;;  %4856 = vmatprep.subr.bf16.mxu0 %v4855_v7  ;;  %v4861_v39 = vpack.c.bf16 %v3418_v14, %v3414_v15  ;;  %v3430_v38 = vld [vmem:[%s7216_s22 + $0x110] sm:$0xff]  ;;  %v3441_v47 = vld [vmem:[%s7216_s22 + $0x168] sm:$0xff]  ;;  %v3439_v7 = vld [vmem:[%s7216_s22 + $0x158] sm:$0xff]  ;;  %v4841_v29 = vpack.c.bf16 %v3440_v37, %v3436_v42  ;;  %v4883_v18 = vpack.c.bf16 %v3851_v57, %v3850_v2 }
0x1636   : > { %v3342_v3 = vadd.f32 %v3335_v33, %v3334_v43  ;;  %3730 = vmatprep.mubr.f32.mxu1 %v5579_v8  ;;  %3801 = vmatprep.mubr.f32.mxu0 %v5579_v8  ;;  %v4863_v8 = vpack.c.bf16 %v3427_v56, %v3423_v60  ;;  %v4871_v43 = vpack.c.bf16 %v3443_v25, %v3439_v7  ;;  %v3438_v33 = vld [vmem:[%s7216_s22 + $0x150] sm:$0xff]  ;;  %v3451_v15 = vld [vmem:[%s7216_s22 + $0x1b8] sm:$0xff]  ;;  %v3882_v10 = vld [vmem:[%s7217_s12 + $0x180] sm:$0xff] }
0x1637   : > { %v3307_v58 = vpop.permute.xlu1 %3306  ;;  %v3332_v5 = vpop.permute.xlu0 %3331  ;;  %v3836_v7 = vld [vmem:[%s7217_s12 + $0x10] sm:$0xff]  ;;  %v3837_v25 = vld [vmem:[%s7217_s12 + $0x18] sm:$0xff]  ;;  %v3886_v42 = vld [vmem:[%s7217_s12 + $0x1a0] sm:$0xff] }
0x1638   : > { %4826 = vmatpush1.bf16.msra.mxu1 %v4825_v52  ;;  %4858 = vmatpush1.bf16.msra.mxu0 %v4857_v31  ;;  %v3336_v55 = vmul.f32 %v3307_v58, %v6643_v6  ;;  %v3426_v6 = vld [vmem:[%s7216_s22 + $0xf0] sm:$0xff]  ;;  %v4839_v52 = vpack.c.bf16 %v3441_v47, %v3437_v48  ;;  %v3445_v31 = vld [vmem:[%s7216_s22 + $0x188] sm:$0xff]  ;;  %v3341_v4 = vmul.f32 %v3332_v5, %v6653_v28  ;;  %v3444_v28 = vld [vmem:[%s7216_s22 + $0x180] sm:$0xff] }
0x1639   : > { %4828 = vmatprep.subr.bf16.mxu1 %v4827_v26  ;;  %4860 = vmatprep.subr.bf16.mxu0 %v4859_v49  ;;  %v4865_v21 = vpack.c.bf16 %v3426_v6, %v3422_v13  ;;  %v3449_v26 = vld [vmem:[%s7216_s22 + $0x1a8] sm:$0xff]  ;;  %v3447_v49 = vld [vmem:[%s7216_s22 + $0x198] sm:$0xff]  ;;  %v3446_v58 = vld [vmem:[%s7216_s22 + $0x190] sm:$0xff]  ;;  %v4845_v61 = vpack.c.bf16 %v3448_v24, %v3444_v28 }
0x163a   : > { %v3343_v63 = vadd.f32 %v3342_v3, %v3336_v55  ;;  %v4843_v60 = vpack.c.bf16 %v3449_v26, %v3445_v31  ;;  %v4875_v56 = vpack.c.bf16 %v3451_v15, %v3447_v49  ;;  %v3450_v55 = vld [vmem:[%s7216_s22 + $0x1b0] sm:$0xff]  ;;  %v3456_v13 = vld [vmem:[%s7216_s22 + $0x1e0] sm:$0xff]  ;;  %v3887_v37 = vld [vmem:[%s7217_s12 + $0x1a8] sm:$0xff] }
0x163b   : > { %v3317_v1 = vpop.permute.xlu1 %3316  ;;  %v3884_v48 = vld [vmem:[%s7217_s12 + $0x190] sm:$0xff]  ;;  %v3871_v26 = vld [vmem:[%s7217_s12 + $0x128] sm:$0xff]  ;;  %v3857_v15 = vld [vmem:[%s7217_s12 + $0xb8] sm:$0xff] }
0x163c   : > { %4830 = vmatpush1.bf16.msra.mxu1 %v4829_v40  ;;  %4862 = vmatpush1.bf16.msra.mxu0 %v4861_v39  ;;  %v3344_v9 = vadd.f32 %v3343_v63, %v3337_v23  ;;  %v3338_v17 = vmul.f32 %v3317_v1, %v6647_v51  ;;  %v3434_v51 = vld [vmem:[%s7216_s22 + $0x130] sm:$0xff]  ;;  %v3453_v40 = vld [vmem:[%s7216_s22 + $0x1c8] sm:$0xff] }
0x163d   : > { %4832 = vmatprep.subr.bf16.mxu1 %v4831_v32  ;;  %4864 = vmatprep.subr.bf16.mxu0 %v4863_v8  ;;  %v4869_v16 = vpack.c.bf16 %v3434_v51, %v3430_v38  ;;  %v3457_v39 = vld [vmem:[%s7216_s22 + $0x1e8] sm:$0xff]  ;;  %v4877_v32 = vpack.c.bf16 %v3450_v55, %v3446_v58  ;;  %v3452_v8 = vld [vmem:[%s7216_s22 + $0x1c0] sm:$0xff]  ;;  %v3454_v23 = vld [vmem:[%s7216_s22 + $0x1d0] sm:$0xff] }
0x163e   : > { %v3345_v30 = vadd.f32 %v3344_v9, %v3338_v17  ;;  %v4847_v6 = vpack.c.bf16 %v3457_v39, %v3453_v40  ;;  %v3458_v63 = vld [vmem:[%s7216_s22 + $0x1f0] sm:$0xff]  ;;  %v3883_v1 = vld [vmem:[%s7217_s12 + $0x188] sm:$0xff]  ;;  %v3834_v17 = vld [vmem:[%s7217_s12] sm:$0xff] }
0x163f   : > { %v3327_v22 = vpop.permute.xlu1 %3326  ;;  %v4881_v9 = vpack.c.bf16 %v3458_v63, %v3454_v23  ;;  %v4915_v20 = vpack.c.bf16 %v3883_v1, %v3882_v10  ;;  %v3852_v38 = vld [vmem:[%s7217_s12 + $0x90] sm:$0xff]  ;;  %v3853_v51 = vld [vmem:[%s7217_s12 + $0x98] sm:$0xff]  ;;  %v3858_v39 = vld [vmem:[%s7217_s12 + $0xc0] sm:$0xff] }
0x1640   : > { %4834 = vmatpush1.bf16.msra.mxu1 %v4833_v59  ;;  %4866 = vmatpush1.bf16.msra.mxu0 %v4865_v21  ;;  %v3346_v44 = vadd.f32 %v3345_v30, %v3339_v19  ;;  %v3340_v12 = vmul.f32 %v3327_v22, %v6651_v27  ;;  %v3442_v27 = vld [vmem:[%s7216_s22 + $0x170] sm:$0xff]  ;;  %v4849_v59 = vpack.c.bf16 %v3456_v13, %v3452_v8  ;;  %v3835_v21 = vld [vmem:[%s7217_s12 + $0x8] sm:$0xff]  ;;  %v3885_v19 = vld [vmem:[%s7217_s12 + $0x198] sm:$0xff] }
0x1641   : > { %4836 = vmatprep.subr.bf16.mxu1 %v4835_v62  ;;  %4868 = vmatprep.subr.bf16.mxu0 %v4867_v41  ;;  %v4873_v3 = vpack.c.bf16 %v3442_v27, %v3438_v33  ;;  %v3866_v62 = vld [vmem:[%s7217_s12 + $0x100] sm:$0xff]  ;;  %v3867_v41 = vld [vmem:[%s7217_s12 + $0x108] sm:$0xff]  ;;  %v4885_v30 = vpack.c.bf16 %v3835_v21, %v3834_v17  ;;  %v4887_v5 = vpack.c.bf16 %v3853_v51, %v3852_v38  ;;  %v3856_v49 = vld [vmem:[%s7217_s12 + $0xb0] sm:$0xff] }
0x1642   : > { %v3347_v11 = vadd.f32 %v3346_v44, %v3340_v12  ;;  %v4917_v47 = vpack.c.bf16 %v3867_v41, %v3866_v62  ;;  %v4919_v22 = vpack.c.bf16 %v3885_v19, %v3884_v48  ;;  %v3869_v44 = vld [vmem:[%s7217_s12 + $0x118] sm:$0xff]  ;;  %v3854_v12 = vld [vmem:[%s7217_s12 + $0xa0] sm:$0xff]  ;;  %v3839_v27 = vld [vmem:[%s7217_s12 + $0x28] sm:$0xff] }
0x1643   : > { %v3838_v33 = vld [vmem:[%s7217_s12 + $0x20] sm:$0xff]  ;;  %v3840_v24 = vld [vmem:[%s7217_s12 + $0x30] sm:$0xff]  ;;  %v3873_v40 = vld [vmem:[%s7217_s12 + $0x138] sm:$0xff] }
0x1644   : > { %v6899_v14 = vadd.f32 %v3347_v11, %v3341_v4  ;;  %4838 = vmatpush1.bf16.msra.mxu1 %v4837_v46  ;;  %4870 = vmatpush1.bf16.msra.mxu0 %v4869_v16  ;;  %v3868_v46 = vld [vmem:[%s7217_s12 + $0x110] sm:$0xff]  ;;  %v3855_v16 = vld [vmem:[%s7217_s12 + $0xa8] sm:$0xff]  ;;  %v4923_v4 = vpack.c.bf16 %v3887_v37, %v3886_v42  ;;  %v3870_v11 = vld [vmem:[%s7217_s12 + $0x120] sm:$0xff] }
0x1645   : > { %4840 = vmatprep.subr.bf16.mxu1 %v4839_v52  ;;  %4872 = vmatprep.subr.bf16.mxu0 %v4871_v43  ;;  %v4889_v52 = vpack.c.bf16 %v3837_v25, %v3836_v7  ;;  %v4921_v43 = vpack.c.bf16 %v3869_v44, %v3868_v46  ;;  %v4891_v31 = vpack.c.bf16 %v3855_v16, %v3854_v12  ;;  %v3872_v55 = vld [vmem:[%s7217_s12 + $0x130] sm:$0xff]  ;;  %v3842_v13 = vld [vmem:[%s7217_s12 + $0x40] sm:$0xff]  ;;  %v3875_v2 = vld [vmem:[%s7217_s12 + $0x148] sm:$0xff] }
0x1646   : > { %v4925_v28 = vpack.c.bf16 %v3871_v26, %v3870_v11  ;;  %v4929_v8 = vpack.c.bf16 %v3873_v40, %v3872_v55  ;;  %v3874_v63 = vld [vmem:[%s7217_s12 + $0x140] sm:$0xff]  ;;  %v3860_v57 = vld [vmem:[%s7217_s12 + $0xd0] sm:$0xff]  ;;  %v3861_v10 = vld [vmem:[%s7217_s12 + $0xd8] sm:$0xff] }
0x1647   : > { %v3892_v1 = vld [vmem:[%s7217_s12 + $0x1d0] sm:$0xff]  ;;  %v4933_v17 = vpack.c.bf16 %v3875_v2, %v3874_v63  ;;  %v3877_v38 = vld [vmem:[%s7217_s12 + $0x158] sm:$0xff]  ;;  %v3862_v51 = vld [vmem:[%s7217_s12 + $0xe0] sm:$0xff] }
0x1648   : > { %4842 = vmatpush1.bf16.msra.mxu1 %v4841_v29  ;;  %4874 = vmatpush1.bf16.msra.mxu0 %v4873_v3  ;;  %v3889_v29 = vld [vmem:[%s7217_s12 + $0x1b8] sm:$0xff]  ;;  %v4893_v3 = vpack.c.bf16 %v3839_v27, %v3838_v33  ;;  %v3844_v21 = vld [vmem:[%s7217_s12 + $0x50] sm:$0xff]  ;;  %v3863_v48 = vld [vmem:[%s7217_s12 + $0xe8] sm:$0xff] }
0x1649   : > { %4844 = vmatprep.subr.bf16.mxu1 %v4843_v60  ;;  %4876 = vmatprep.subr.bf16.mxu0 %v4875_v56  ;;  %v3841_v60 = vld [vmem:[%s7217_s12 + $0x38] sm:$0xff]  ;;  %v4895_v56 = vpack.c.bf16 %v3857_v15, %v3856_v49  ;;  %v3876_v41 = vld [vmem:[%s7217_s12 + $0x150] sm:$0xff]  ;;  %v3894_v19 = vld [vmem:[%s7217_s12 + $0x1e0] sm:$0xff] }
0x164a   : > { %v4937_v7 = vpack.c.bf16 %v3877_v38, %v3876_v41  ;;  %v3846_v25 = vld [vmem:[%s7217_s12 + $0x60] sm:$0xff]  ;;  %v3847_v46 = vld [vmem:[%s7217_s12 + $0x68] sm:$0xff]  ;;  %v3864_v37 = vld [vmem:[%s7217_s12 + $0xf0] sm:$0xff] }
0x164b   : > { %v3878_v44 = vld [vmem:[%s7217_s12 + $0x160] sm:$0xff]  ;;  %v3879_v12 = vld [vmem:[%s7217_s12 + $0x168] sm:$0xff]  ;;  %v4909_v16 = vpack.c.bf16 %v3847_v46, %v3846_v25  ;;  %v3896_v33 = vld [vmem:[%s7217_s12 + $0x1f0] sm:$0xff] }
0x164c   : > { %4846 = vmatpush1.bf16.msra.mxu1 %v4845_v61  ;;  %4878 = vmatpush1.bf16.msra.mxu0 %v4877_v32  ;;  %v3891_v61 = vld [vmem:[%s7217_s12 + $0x1c8] sm:$0xff]  ;;  %v4897_v32 = vpack.c.bf16 %v3841_v60, %v3840_v24  ;;  %v4941_v42 = vpack.c.bf16 %v3879_v12, %v3878_v44  ;;  %v3897_v27 = vld [vmem:[%s7217_s12 + $0x1f8] sm:$0xff]  ;;  %v3880_v26 = vld [vmem:[%s7217_s12 + $0x170] sm:$0xff] }
0x164d   : > { %4848 = vmatprep.subr.bf16.mxu1 %v4847_v6  ;;  %4880 = vmatprep.subr.bf16.mxu0 %v4879_v0  ;;  %v3843_v6 = vld [vmem:[%s7217_s12 + $0x48] sm:$0xff]  ;;  %v4899_v0 = vpack.c.bf16 %v3859_v53, %v3858_v39  ;;  %v4931_v23 = vpack.c.bf16 %v3891_v61, %v3890_v45  ;;  %v3849_v11 = vld [vmem:[%s7217_s12 + $0x78] sm:$0xff] }
0x164e   : > { %v3881_v49 = vld [vmem:[%s7217_s12 + $0x178] sm:$0xff] }
0x1650   : > { %4850 = vmatpush1.bf16.msra.mxu1 %v4849_v59  ;;  %4882 = vmatpush1.bf16.msra.mxu0 %v4881_v9  ;;  %v3893_v59 = vld [vmem:[%s7217_s12 + $0x1d8] sm:$0xff]  ;;  %v4901_v9 = vpack.c.bf16 %v3843_v6, %v3842_v13 }
0x1651   : > { %4884 = vmatprep.subr.bf16.mxu1 %v4883_v18  ;;  %4916 = vmatprep.subr.bf16.mxu0 %v4915_v20  ;;  %v3845_v18 = vld [vmem:[%s7217_s12 + $0x58] sm:$0xff]  ;;  %v4903_v20 = vpack.c.bf16 %v3861_v10, %v3860_v57  ;;  %v4935_v62 = vpack.c.bf16 %v3893_v59, %v3892_v1 }
0x1653   : > { %3731 = vmatmul.mubr.f32.vlgmr.msra.gmra.mrb[28].mxu1 %v6899_v14  ;;  %3802 = vmatmul.mubr.f32.vlgmr.msra.gmra.mrb[32].mxu0 %v6899_v14  ;;  %v3888_v14 = vld [vmem:[%s7217_s12 + $0x1b0] sm:$0xff] }
0x1654   : > { %4886 = vmatpush3.bf16.msra.mxu1 %v4885_v30  ;;  %4918 = vmatpush3.bf16.msra.mxu0 %v4917_v47  ;;  %v4927_v58 = vpack.c.bf16 %v3889_v29, %v3888_v14  ;;  %v3895_v30 = vld [vmem:[%s7217_s12 + $0x1e8] sm:$0xff]  ;;  %v4905_v47 = vpack.c.bf16 %v3845_v18, %v3844_v21  ;;  %v4945_v14 = vpack.c.bf16 %v3881_v49, %v3880_v26  ;;  %v3808_v29 = vld [vmem:[%s7218_s27] sm:$0xf] }
0x1655   : > { %4888 = vmatprep.subr.bf16.mxu1 %v4887_v5  ;;  %4920 = vmatprep.subr.bf16.mxu0 %v4919_v22  ;;  %v4907_v5 = vpack.c.bf16 %v3863_v48, %v3862_v51  ;;  %v4939_v22 = vpack.c.bf16 %v3895_v30, %v3894_v19  ;;  %v3813_v24 = vrot.slane %v3808_v29, %v670_v54 }
0x1656   : > { %v3821_v60 = vrot.slane %v3808_v29, %v678_v50 }
0x1658   : > { %4890 = vmatpush3.bf16.msra.mxu1 %v4889_v52  ;;  %4922 = vmatpush3.bf16.msra.mxu0 %v4921_v43  ;;  %v3865_v52 = vld [vmem:[%s7217_s12 + $0xf8] sm:$0xff] }
0x1659   : > { %4892 = vmatprep.subr.bf16.mxu1 %v4891_v31  ;;  %4924 = vmatprep.subr.bf16.mxu0 %v4923_v4  ;;  %v4911_v43 = vpack.c.bf16 %v3865_v52, %v3864_v37  ;;  %v3848_v31 = vld [vmem:[%s7217_s12 + $0x70] sm:$0xff]  ;;  %v4943_v4 = vpack.c.bf16 %v3897_v27, %v3896_v33 }
0x165a   : > { %v4913_v15 = vpack.c.bf16 %v3849_v11, %v3848_v31 }
0x165c   : > { %4894 = vmatpush3.bf16.msra.mxu1 %v4893_v3  ;;  %4926 = vmatpush3.bf16.msra.mxu0 %v4925_v28  ;;  %v3817_v3 = vrot.slane %v3808_v29, %v674_v36  ;;  %v3825_v28 = vrot.slane %v3808_v29, %v682_v35 }
0x165d   : > { %4896 = vmatprep.subr.bf16.mxu1 %v4895_v56  ;;  %4928 = vmatprep.subr.bf16.mxu0 %v4927_v58 }
0x1660   : > { %4898 = vmatpush3.bf16.msra.mxu1 %v4897_v32  ;;  %4930 = vmatpush3.bf16.msra.mxu0 %v4929_v8 }
0x1661   : > { %4900 = vmatprep.subr.bf16.mxu1 %v4899_v0  ;;  %4932 = vmatprep.subr.bf16.mxu0 %v4931_v23 }
0x1664   : > { %4902 = vmatpush3.bf16.msra.mxu1 %v4901_v9  ;;  %4934 = vmatpush3.bf16.msra.mxu0 %v4933_v17 }
0x1665   : > { %4904 = vmatprep.subr.bf16.mxu1 %v4903_v20  ;;  %4936 = vmatprep.subr.bf16.mxu0 %v4935_v62 }
0x1668   : > { %4906 = vmatpush3.bf16.msra.mxu1 %v4905_v47  ;;  %4938 = vmatpush3.bf16.msra.mxu0 %v4937_v7 }
0x1669   : > { %4908 = vmatprep.subr.bf16.mxu1 %v4907_v5  ;;  %4940 = vmatprep.subr.bf16.mxu0 %v4939_v22 }
0x166c   : > { %4910 = vmatpush3.bf16.msra.mxu1 %v4909_v16  ;;  %4942 = vmatpush3.bf16.msra.mxu0 %v4941_v42 }
0x166d   : > { %4912 = vmatprep.subr.bf16.mxu1 %v4911_v43  ;;  %4944 = vmatprep.subr.bf16.mxu0 %v4943_v4 }
0x1670   : > { %4914 = vmatpush3.bf16.msra.mxu1 %v4913_v15  ;;  %4946 = vmatpush3.bf16.msra.mxu0 %v4945_v14 }
0x1726   : > { %v3732_v56 = vpop.f32.mrb[28].mxu1  ;;  %v3803_v58 = vpop.f32.mrb[32].mxu0 }
0x1727   : > { %v3734_v55 = vpop.f32.mrb[29].mxu1  ;;  %v3805_v40 = vpop.f32.mrb[33].mxu0  ;;  %v3830_v45 = vadd.f32 %v3813_v24, %v3732_v56  ;;  %v3832_v61 = vadd.f32 %v3821_v60, %v3803_v58 }
0x1728   : > { %v3831_v39 = vadd.f32 %v3817_v3, %v3734_v55  ;;  %v3833_v53 = vadd.f32 %v3825_v28, %v3805_v40 }
0x172a   : > { %3969 = vmatprep.mubr.f32.mxu1 %v3831_v39  ;;  %4039 = vmatprep.mubr.f32.mxu0 %v3833_v53 }
0x172b   : > { %3970 = vmatmul.mubr.f32.vlgmr.msra.gmra.mrb[30].mxu1 %v3830_v45  ;;  %4040 = vmatmul.mubr.f32.vlgmr.msra.gmra.mrb[34].mxu0 %v3832_v61 }
0x17fe   : > { %v4337_v35 = vpop.f32.mrb[30].mxu1  ;;  %v4372_v36 = vpop.f32.mrb[34].mxu0 }
0x17ff   : > { %v4338_v50 = vpop.f32.mrb[31].mxu1  ;;  %v4373_v54 = vpop.f32.mrb[35].mxu0 }
0x1800   : > { %v4339_v32 = vadd.f32 %v4338_v50, %v4337_v35  ;;  %v4374_v8 = vadd.f32 %v4373_v54, %v4372_v36 }
0x1802   : > { %v3972_v13 = vadd.f32 %v4339_v32, %v4278_v34 }
0x1804   : > { %v4042_v6 = vadd.f32 %v4374_v8, %v3972_v13 }
0x1806   : > { %4046 = vst.msk [vmem:[%s632_s18] sm:$0xff] %vm4045_vm3, %v4042_v6 }
0x1807 PF: > { %s7221_s15 = sld [smem:[#allocation19_spill]]  ;;  %s7222_s17 = sld [smem:[#allocation20_spill]] }
0x1808   : > { %s7223_s29 = smov %s5563_s30 }
0x180d   : > { %p25_p6 = scmp.ge.s32.totalorder %s7221_s15, 4   ;;  %s7224_s30 = smov %s7222_s17 }
0x180f   :  { %27 = sbr.rel (!%p25_p6) target bundleno = 14 (0xe), region = 177 }
0x1816   :  { %4066 = vsyncpa [#allocation6], 1 }
0x1817   :  { %4068 = vsyncpa [#allocation6 + $0x1], 1 }
0x1818   :  { %4069 = vsyncpa [#allocation8], 1 }
0x1819   :  { %4070 = vsyncpa [#allocation11], 1 }
0x181a   :  { %4071 = vsyncpa [#allocation14], 1 }

</bundles_post_ra>
